<compile_context>
chip_gen: v7x
topology: tpu7x:2x2x1
jax: 0.10.0
libtpu: 0.0.40
codegen_flags: <defaults>
</compile_context>

<pallas_src>
import functools
import numpy as np

import jax
import jax.numpy as jnp
from jax.experimental import pallas as pl
from jax.experimental.pallas import tpu as pltpu

PAD = 0

# ------------------------- model hyper-parameters (small) -------------------------
N_TGT_VOCAB = 50
LEN_MAX_SEQ = 16            # n_position = 17
D_MODEL = 32                # == d_word_vec
N_LAYERS = 2
N_HEAD = 4
D_K = 8
D_V = 8
D_INNER = 64

BS = 2
LEN_TGT = 6
LEN_SRC = 10
NO_PAD_LEN_SRC = 8

HK = N_HEAD * D_K           # 32
HV = N_HEAD * D_V           # 32
V_PAD = 128                 # vocab padded to a full lane tile for lane-dense stores

# ---------------- packed-slab layouts (shared by packer and kernel) ----------------
# weight tiles per layer inside the (L*N_WTILES, D_MODEL, 128) slab
T_SQKV, T_SFW, T_CWQ, T_CKV, T_CFW, T_FW1 = range(6)
N_WTILES = 6
# bias / LayerNorm rows per layer inside the (L, N_VROWS, 128) slab
(R_SBQKV, R_SFB, R_LN1G, R_LN1B, R_CBQ, R_CBKV, R_CFB,
 R_LN2G, R_LN2B, R_FB1, R_FB2, R_LN3G, R_LN3B) = range(13)
N_VROWS = 16                # padded to a sublane-tile multiple


# =============================== in-kernel helpers ===============================
def _softmax_approx(x):
    m = jnp.max(x, axis=-1, keepdims=True)
    e = jnp.exp(x - m)
    return e * pl.reciprocal(jnp.sum(e, axis=-1, keepdims=True), approx=True)


def _layer_norm(x, g, b):
    # torch.nn.LayerNorm(d_model): biased variance, eps=1e-5, affine
    mu = jnp.mean(x, axis=-1, keepdims=True)
    var = jnp.mean((x - mu) ** 2, axis=-1, keepdims=True)
    return (x - mu) * jax.lax.rsqrt(var + 1e-5) * g + b


def _vrow(V, r):
    return V[r:r + 1, :]          # (1, 128) lane-0-aligned row


# =============================== fused decoder kernel ===============================
def fused_decoder_kernel(
    dec_ref, enc_ref, smask_ref, cmask_ref, npad_ref, extidx_ref,
    wmat_ref, w2_ref, vec_ref, prjw_ref, ptrw_ref, headvec_ref,
    out_ref,
    *, n_layers, n_head, d_k, d_v, d_model, d_inner, no_pad_len, v_pad,
):
    x = dec_ref[0]            # (LTp, D)
    raw = x                   # raw_dec_inp
    enc = enc_ref[0]          # (LSp, D)
    smask = smask_ref[0]      # (H*LTp, LTp) additive, pre-tiled per head
    cmask = cmask_ref[0]      # (H*LTp, LSp) additive, pre-tiled per head
    npad = npad_ref[0]        # (LTp, D)

    lt = x.shape[0]
    hk = n_head * d_k
    inv_temp = 1.0 / float(np.sqrt(d_k))

    def attend(q_full, kv_full, k_off, v_off, mask, fw_tile, fb, lng, lnb, residual):
        """One post-LN MHA sublayer.  q_full/kv_full are full-width (.,128)
        projection results; heads are stacked along sublanes for ONE softmax."""
        sc = []
        for h in range(n_head):
            qh = q_full[:, h * d_k:(h + 1) * d_k]
            kh = kv_full[:, k_off + h * d_k:k_off + (h + 1) * d_k]
            # q @ k^T without explicit transpose
            sc.append(jax.lax.dot_general(qh, kh, (((1,), (1,)), ((), ())),
                                          preferred_element_type=jnp.float32))
        s = jnp.concatenate(sc, axis=0) * inv_temp + mask         # (H*LTp, Lk)
        a = _softmax_approx(s)                                    # one softmax
        out = jnp.zeros((lt, d_model), jnp.float32)
        for h in range(n_head):
            vh = kv_full[:, v_off + h * d_v:v_off + (h + 1) * d_v]
            ctx_h = jnp.dot(a[h * lt:(h + 1) * lt, :], vh,
                            preferred_element_type=jnp.float32)   # (LTp, d_v)
            # d_v == 8 -> this fw row slice is sublane-tile aligned ("pre-split")
            out = out + jnp.dot(ctx_h, fw_tile[h * d_v:(h + 1) * d_v, :d_model],
                                preferred_element_type=jnp.float32)
        out = _layer_norm(out + fb[:, :d_model] + residual,
                          lng[:, :d_model], lnb[:, :d_model])
        return out, a

    sctx = cctx = None
    a_cross = None
    for l in range(n_layers):
        base = l * N_WTILES
        V = vec_ref[l]                                            # (N_VROWS, 128)

        # ---- masked self-attention: fused QKV projection (one dot, one bias row) ----
        qkv = (jnp.dot(x, wmat_ref[base + T_SQKV], preferred_element_type=jnp.float32)
               + _vrow(V, R_SBQKV))                               # (LTp, 128) q|k|v
        s_out, _ = attend(qkv, qkv, hk, 2 * hk, smask,
                          wmat_ref[base + T_SFW], _vrow(V, R_SFB),
                          _vrow(V, R_LN1G), _vrow(V, R_LN1B), residual=x)
        s_out = s_out * npad

        # ---- encoder-decoder (cross) attention ----
        q_c = (jnp.dot(s_out, wmat_ref[base + T_CWQ], preferred_element_type=jnp.float32)
               + _vrow(V, R_CBQ))                                 # (LTp, 128) q
        kv_c = (jnp.dot(enc, wmat_ref[base + T_CKV], preferred_element_type=jnp.float32)
                + _vrow(V, R_CBKV))                               # (LSp, 128) k|v
        c_out, a_c = attend(q_c, kv_c, 0, hk, cmask,
                            wmat_ref[base + T_CFW], _vrow(V, R_CFB),
                            _vrow(V, R_LN2G), _vrow(V, R_LN2B), residual=s_out)
        c_out = c_out * npad

        # ---- position-wise feed forward (1x1 conv == linear) ----
        h1 = jnp.maximum(
            jnp.dot(c_out, wmat_ref[base + T_FW1], preferred_element_type=jnp.float32)
            + _vrow(V, R_FB1), 0.0)                               # (LTp, 128), 0:d_inner real
        h2 = (jnp.dot(h1[:, :d_inner], w2_ref[l], preferred_element_type=jnp.float32)
              + _vrow(V, R_FB2)[:, :d_model])
        x = _layer_norm(h2 + c_out,
                        _vrow(V, R_LN3G)[:, :d_model], _vrow(V, R_LN3B)[:, :d_model]) * npad

        sctx, cctx, a_cross = s_out, c_out, a_c

    # ---------------- output head (vocab axis padded to v_pad lanes) ----------------
    hv_all = headvec_ref[...]                                     # (8, 128)
    prj_b = hv_all[0:1, :]                                        # (-1e9 in padded cols)
    ptr_b = hv_all[1:2, 0:1]                                      # (1, 1)
    hw = hv_all[2:3, :]                                           # softmax(head_w) in lanes 0:H

    logits = jnp.dot(x, prjw_ref[...], preferred_element_type=jnp.float32) + prj_b
    m = jnp.max(logits, axis=-1, keepdims=True)                   # exact final softmax
    e = jnp.exp(logits - m)
    scores = e / jnp.sum(e, axis=-1, keepdims=True)               # (LTp, Vpad)

    # pointer ratio: no lane-concat, three tiny matmuls + exact sigmoid
    pr = (jnp.dot(raw, ptrw_ref[0], preferred_element_type=jnp.float32)
          + jnp.dot(sctx, ptrw_ref[1], preferred_element_type=jnp.float32)
          + jnp.dot(cctx, ptrw_ref[2], preferred_element_type=jnp.float32)
          + ptr_b)
    ratio = 1.0 / (1.0 + jnp.exp(-pr))                            # (LTp, 1)

    # head-weighted cross-attention distribution (last layer, heads on sublanes)
    attn_dist = hw[:, 0:1] * a_cross[0:lt, :]
    for h in range(1, n_head):
        attn_dist = attn_dist + hw[:, h:h + 1] * a_cross[h * lt:(h + 1) * lt, :]

    vocab_dist = ratio * scores                                   # (LTp, Vpad)
    attn_np = (1.0 - ratio) * attn_dist[:, :no_pad_len]           # (LTp, no_pad)

    # scatter_add over the vocab axis as a one-hot matmul (one-hot built in-kernel)
    idx = extidx_ref[0]                                           # (no_pad, 1) int32
    lane = jax.lax.broadcasted_iota(jnp.int32, (no_pad_len, v_pad), 1)
    onehot = (lane == idx).astype(jnp.float32)                    # (no_pad, Vpad)
    scat = jnp.dot(attn_np, onehot, preferred_element_type=jnp.float32)

    out_ref[0] = jnp.log(vocab_dist + scat + 1e-12)


# =============================== wrappers / glue ===============================
def pack_params(params):
    """Repack the many tiny weights into tile-aligned, leading-axis-indexable slabs."""
    def tile(w):                                   # (32, <=128) -> (32, 128)
        t = jnp.zeros((D_MODEL, 128), jnp.float32)
        return t.at[:w.shape[0], :w.shape[1]].set(w)

    def row(v):                                    # (1, <=128) -> (1, 128)
        r = jnp.zeros((1, 128), jnp.float32)
        return r.at[:, :v.shape[1]].set(v)

    wtiles, w2s, vslabs = [], [], []
    for lp in params["layers"]:
        s_qkv = jnp.concatenate([lp["s_wq"], lp["s_wk"], lp["s_wv"]], axis=1)   # (32, 96)
        c_kv = jnp.concatenate([lp["c_wk"], lp["c_wv"]], axis=1)                # (32, 64)
        wtiles += [tile(s_qkv), tile(lp["s_fw"]), tile(lp["c_wq"]),
                   tile(c_kv), tile(lp["c_fw"]), tile(lp["f_w1"])]
        w2s.append(lp["f_w2"])                                                  # (64, 32)
        rows = [row(jnp.concatenate([lp["s_bq"], lp["s_bk"], lp["s_bv"]], axis=1)),
                row(lp["s_fb"]), row(lp["ln1g"]), row(lp["ln1b"]),
                row(lp["c_bq"]),
                row(jnp.concatenate([lp["c_bk"], lp["c_bv"]], axis=1)),
                row(lp["c_fb"]), row(lp["ln2g"]), row(lp["ln2b"]),
                row(lp["f_b1"]), row(lp["f_b2"]), row(lp["ln3g"]), row(lp["ln3b"])]
        rows += [jnp.zeros((1, 128), jnp.float32)] * (N_VROWS - len(rows))
        vslabs.append(jnp.concatenate(rows, axis=0))                            # (16, 128)

    wmat = jnp.stack(wtiles)           # (L*6, 32, 128)
    w2 = jnp.stack(w2s)                # (L, 64, 32)
    vec = jnp.stack(vslabs)            # (L, 16, 128)

    v = params["prj_w"].shape[1]
    prj_w_pad = jnp.zeros((D_MODEL, V_PAD), jnp.float32).at[:, :v].set(params["prj_w"])
    prj_b_pad = jnp.full((1, V_PAD), -1e9, jnp.float32).at[:, :v].set(params["prj_b"])

    hw = jax.nn.softmax(params["head_w"], axis=-1)                 # softmax(head_w) in wrapper
    head_vec = jnp.concatenate([
        prj_b_pad,
        jnp.zeros((1, V_PAD), jnp.float32).at[:, 0:1].set(params["ptr_b"]),
        jnp.zeros((1, V_PAD), jnp.float32).at[:, :N_HEAD].set(hw),
        jnp.zeros((5, V_PAD), jnp.float32)], axis=0)               # (8, 128)

    ptr_w = params["ptr_w"].reshape(3, D_MODEL, 1)                 # [raw | self_ctx | cross_ctx]

    return dict(wmat=wmat, w2=w2, vec=vec, prj_w=prj_w_pad, ptr_w=ptr_w,
                head_vec=head_vec, v=v)


def decoder_forward(params, packed, tgt_seq, tgt_pos, src_seq, src_score,
                    enc_output, extend_idx):
    del src_score  # dec_score_util == 'none'
    bs, lt = tgt_seq.shape
    ls = src_seq.shape[1]
    no_pad = extend_idx.shape[1]
    v = packed["v"]

    # pad sequence lengths to sublane multiples (6->8, 10->16); padded slots are PAD
    lt_p = ((lt + 7) // 8) * 8
    ls_p = ((ls + 7) // 8) * 8
    tgt_seq_p = jnp.zeros((bs, lt_p), tgt_seq.dtype).at[:, :lt].set(tgt_seq)
    tgt_pos_p = jnp.zeros((bs, lt_p), tgt_pos.dtype).at[:, :lt].set(tgt_pos)
    src_seq_p = jnp.zeros((bs, ls_p), src_seq.dtype).at[:, :ls].set(src_seq)
    enc_p = jnp.zeros((bs, ls_p, D_MODEL), jnp.float32).at[:, :ls, :].set(enc_output)

    # ---- glue: embeddings (gather), masks (pre-tiled per head), pointer indices ----
    dec_inp = params["emb"][tgt_seq_p] + params["pos"][tgt_pos_p]             # (bs, LTp, D)
    non_pad = (tgt_seq_p != PAD).astype(jnp.float32)[:, :, None]
    non_pad = jnp.broadcast_to(non_pad, (bs, lt_p, D_MODEL))                  # (bs, LTp, D)

    subseq = jnp.triu(jnp.ones((lt_p, lt_p), jnp.float32), k=1)[None]
    keypad = (tgt_seq_p == PAD).astype(jnp.float32)[:, None, :]
    slf_mask = jnp.where((keypad + subseq) > 0, -1e9, 0.0).astype(jnp.float32)
    enc_mask = jnp.where((src_seq_p == PAD)[:, None, :], -1e9, 0.0).astype(jnp.float32)
    enc_mask = jnp.broadcast_to(enc_mask, (bs, lt_p, ls_p))
    slf_mask = jnp.tile(slf_mask, (1, N_HEAD, 1))                             # (bs, H*LTp, LTp)
    enc_mask = jnp.tile(enc_mask, (1, N_HEAD, 1))                             # (bs, H*LTp, LSp)

    extidx = extend_idx.astype(jnp.int32)[:, :, None]                         # (bs, no_pad, 1)

    weights = [packed["wmat"], packed["w2"], packed["vec"],
               packed["prj_w"], packed["ptr_w"], packed["head_vec"]]

    in_specs = [
        pl.BlockSpec((1, lt_p, D_MODEL), lambda b: (b, 0, 0)),
        pl.BlockSpec((1, ls_p, D_MODEL), lambda b: (b, 0, 0)),
        pl.BlockSpec((1, N_HEAD * lt_p, lt_p), lambda b: (b, 0, 0)),
        pl.BlockSpec((1, N_HEAD * lt_p, ls_p), lambda b: (b, 0, 0)),
        pl.BlockSpec((1, lt_p, D_MODEL), lambda b: (b, 0, 0)),
        pl.BlockSpec((1, no_pad, 1), lambda b: (b, 0, 0)),
    ] + [pl.BlockSpec(w.shape, (lambda nd: (lambda b: (0,) * nd))(w.ndim))
         for w in weights]

    out_specs = pl.BlockSpec((1, lt_p, V_PAD), lambda b: (b, 0, 0))
    out_shape = jax.ShapeDtypeStruct((bs, lt_p, V_PAD), jnp.float32)

    kernel = functools.partial(
        fused_decoder_kernel,
        n_layers=len(params["layers"]), n_head=N_HEAD, d_k=D_K, d_v=D_V,
        d_model=D_MODEL, d_inner=D_INNER, no_pad_len=no_pad, v_pad=V_PAD)

    padded = pl.pallas_call(
        kernel,
        grid=(bs,),
        in_specs=in_specs,
        out_specs=out_specs,
        out_shape=out_shape,
        compiler_params=pltpu.CompilerParams(dimension_semantics=("parallel",)),
    )(dec_inp, enc_p, slf_mask, enc_mask, non_pad, extidx, *weights)

    return padded[:, :lt, :v]


# =============================== parameters ===============================
def get_sinusoid_encoding_table(n_position, d_hid, padding_idx=None):
    def cal_angle(position, hid_idx):
        return position / np.power(10000, 2 * (hid_idx // 2) / d_hid)

    def get_posi_angle_vec(position):
        return [cal_angle(position, hid_j) for hid_j in range(d_hid)]

    tbl = np.array([get_posi_angle_vec(p) for p in range(n_position)])
    tbl[:, 0::2] = np.sin(tbl[:, 0::2])
    tbl[:, 1::2] = np.cos(tbl[:, 1::2])
    if padding_idx is not None:
        tbl[padding_idx] = 0.0
    return jnp.asarray(tbl, dtype=jnp.float32)


def init_params(key):
    def nrm(k, shape, scale=0.1):
        return jax.random.normal(k, shape, dtype=jnp.float32) * scale

    keys = iter(jax.random.split(key, 256))
    params = {}

    emb = nrm(next(keys), (N_TGT_VOCAB, D_MODEL))
    emb = emb.at[PAD].set(0.0)                      # padding_idx=PAD
    params["emb"] = emb
    params["pos"] = get_sinusoid_encoding_table(LEN_MAX_SEQ + 1, D_MODEL, padding_idx=0)

    layers = []
    for _ in range(N_LAYERS):
        lp = {}
        for pfx, dk in (("s", D_K), ("c", D_K)):
            lp[f"{pfx}_wq"] = nrm(next(keys), (D_MODEL, N_HEAD * dk))
            lp[f"{pfx}_wk"] = nrm(next(keys), (D_MODEL, N_HEAD * dk))
            lp[f"{pfx}_wv"] = nrm(next(keys), (D_MODEL, N_HEAD * D_V))
            lp[f"{pfx}_bq"] = nrm(next(keys), (1, N_HEAD * dk), 0.02)
            lp[f"{pfx}_bk"] = nrm(next(keys), (1, N_HEAD * dk), 0.02)
            lp[f"{pfx}_bv"] = nrm(next(keys), (1, N_HEAD * D_V), 0.02)
            lp[f"{pfx}_fw"] = nrm(next(keys), (N_HEAD * D_V, D_MODEL))
            lp[f"{pfx}_fb"] = nrm(next(keys), (1, D_MODEL), 0.02)
        lp["ln1g"] = jnp.ones((1, D_MODEL), jnp.float32)
        lp["ln1b"] = jnp.zeros((1, D_MODEL), jnp.float32)
        lp["ln2g"] = jnp.ones((1, D_MODEL), jnp.float32)
        lp["ln2b"] = jnp.zeros((1, D_MODEL), jnp.float32)
        lp["f_w1"] = nrm(next(keys), (D_MODEL, D_INNER))
        lp["f_b1"] = nrm(next(keys), (1, D_INNER), 0.02)
        lp["f_w2"] = nrm(next(keys), (D_INNER, D_MODEL))
        lp["f_b2"] = nrm(next(keys), (1, D_MODEL), 0.02)
        lp["ln3g"] = jnp.ones((1, D_MODEL), jnp.float32)
        lp["ln3b"] = jnp.zeros((1, D_MODEL), jnp.float32)
        layers.append(lp)
    params["layers"] = layers

    params["prj_w"] = nrm(next(keys), (D_MODEL, N_TGT_VOCAB))
    params["prj_b"] = nrm(next(keys), (1, N_TGT_VOCAB), 0.02)
    params["ptr_w"] = nrm(next(keys), (3 * D_MODEL, 1))
    params["ptr_b"] = nrm(next(keys), (1, 1), 0.02)
    params["head_w"] = jnp.ones((1, N_HEAD), jnp.float32)   # nn.Parameter(torch.ones(n_head))
    return params


# =============================== main ===============================
if __name__ == "__main__":
    root = jax.random.PRNGKey(0)
    k_par, k_tgt, k_src, k_score, k_enc, k_ext = jax.random.split(root, 6)

    params = init_params(k_par)
    packed = pack_params(params)

    # target sequence with trailing PAD
    tgt_seq = jax.random.randint(k_tgt, (BS, LEN_TGT), 1, N_TGT_VOCAB, dtype=jnp.int32)
    tgt_seq = tgt_seq.at[0, 4:].set(PAD)
    tgt_seq = tgt_seq.at[1, 5:].set(PAD)
    pos = jnp.arange(1, LEN_TGT + 1, dtype=jnp.int32)[None, :]
    tgt_pos = jnp.where(tgt_seq != PAD, pos, 0)

    # source sequence with trailing PAD
    src_seq = jax.random.randint(k_src, (BS, LEN_SRC), 1, N_TGT_VOCAB, dtype=jnp.int32)
    src_seq = src_seq.at[:, NO_PAD_LEN_SRC:].set(PAD)
    src_score = jax.random.uniform(k_score, (BS, LEN_SRC), dtype=jnp.float32)

    enc_output = jax.random.normal(k_enc, (BS, LEN_SRC, D_MODEL), dtype=jnp.float32)
    extend_idx = jax.random.randint(k_ext, (BS, NO_PAD_LEN_SRC), 1, N_TGT_VOCAB, dtype=jnp.int32)

    final_dist = decoder_forward(params, packed, tgt_seq, tgt_pos, src_seq, src_score,
                                 enc_output, extend_idx)
    final_dist = jax.block_until_ready(final_dist)

    assert final_dist.shape == (BS, LEN_TGT, N_TGT_VOCAB), final_dist.shape
    assert bool(jnp.all(jnp.isfinite(final_dist)))
    print("KERNEL_OK")
</pallas_src>

<mosaic_0001>
module attributes {stable_mosaic.version = 11 : i64} {
  func.func @fused_decoder_kernel(%arg0: i32, %arg1: memref<1x8x32xf32, #tpu.memory_space<vmem>>, %arg2: memref<1x16x32xf32, #tpu.memory_space<vmem>>, %arg3: memref<1x32x8xf32, #tpu.memory_space<vmem>>, %arg4: memref<1x32x16xf32, #tpu.memory_space<vmem>>, %arg5: memref<1x8x32xf32, #tpu.memory_space<vmem>>, %arg6: memref<1x8x1xi32, #tpu.memory_space<vmem>>, %arg7: memref<12x32x128xf32, #tpu.memory_space<vmem>>, %arg8: memref<2x64x32xf32, #tpu.memory_space<vmem>>, %arg9: memref<2x16x128xf32, #tpu.memory_space<vmem>>, %arg10: memref<32x128xf32, #tpu.memory_space<vmem>>, %arg11: memref<3x32x1xf32, #tpu.memory_space<vmem>>, %arg12: memref<8x128xf32, #tpu.memory_space<vmem>>, %arg13: memref<1x8x128xf32, #tpu.memory_space<vmem>>) attributes {dimension_semantics = [#tpu.dimension_semantics<parallel>], iteration_bounds = array<i64: 2>, scalar_prefetch = 0 : i64, scratch_operands = 0 : i64, tpu.core_type = #tpu.core_type<tc>, window_params = [{transform_indices = @transform_0, window_bounds = array<i64: 1, 8, 32>}, {transform_indices = @transform_1, window_bounds = array<i64: 1, 16, 32>}, {transform_indices = @transform_2, window_bounds = array<i64: 1, 32, 8>}, {transform_indices = @transform_3, window_bounds = array<i64: 1, 32, 16>}, {transform_indices = @transform_4, window_bounds = array<i64: 1, 8, 32>}, {transform_indices = @transform_5, window_bounds = array<i64: 1, 8, 1>}, {pipeline_mode = #tpu.pipeline_mode<synchronous>, transform_indices = @transform_6, window_bounds = array<i64: 12, 32, 128>}, {pipeline_mode = #tpu.pipeline_mode<synchronous>, transform_indices = @transform_7, window_bounds = array<i64: 2, 64, 32>}, {pipeline_mode = #tpu.pipeline_mode<synchronous>, transform_indices = @transform_8, window_bounds = array<i64: 2, 16, 128>}, {pipeline_mode = #tpu.pipeline_mode<synchronous>, transform_indices = @transform_9, window_bounds = array<i64: 32, 128>}, {pipeline_mode = #tpu.pipeline_mode<synchronous>, transform_indices = @transform_10, window_bounds = array<i64: 3, 32, 1>}, {pipeline_mode = #tpu.pipeline_mode<synchronous>, transform_indices = @transform_11, window_bounds = array<i64: 8, 128>}, {transform_indices = @transform_12, window_bounds = array<i64: 1, 8, 128>}]} {
    %c0 = arith.constant 0 : index
    %c0_0 = arith.constant 0 : index
    %c0_1 = arith.constant 0 : index
    %0 = vector.load %arg1[%c0, %c0_0, %c0_1] : memref<1x8x32xf32, #tpu.memory_space<vmem>>, vector<1x8x32xf32>
    %1 = vector.shape_cast %0 : vector<1x8x32xf32> to vector<8x32xf32>
    %c0_2 = arith.constant 0 : index
    %c0_3 = arith.constant 0 : index
    %c0_4 = arith.constant 0 : index
    %2 = vector.load %arg2[%c0_2, %c0_3, %c0_4] : memref<1x16x32xf32, #tpu.memory_space<vmem>>, vector<1x16x32xf32>
    %3 = vector.shape_cast %2 : vector<1x16x32xf32> to vector<16x32xf32>
    %c0_5 = arith.constant 0 : index
    %c0_6 = arith.constant 0 : index
    %c0_7 = arith.constant 0 : index
    %4 = vector.load %arg3[%c0_5, %c0_6, %c0_7] : memref<1x32x8xf32, #tpu.memory_space<vmem>>, vector<1x32x8xf32>
    %5 = vector.shape_cast %4 : vector<1x32x8xf32> to vector<32x8xf32>
    %c0_8 = arith.constant 0 : index
    %c0_9 = arith.constant 0 : index
    %c0_10 = arith.constant 0 : index
    %6 = vector.load %arg4[%c0_8, %c0_9, %c0_10] : memref<1x32x16xf32, #tpu.memory_space<vmem>>, vector<1x32x16xf32>
    %7 = vector.shape_cast %6 : vector<1x32x16xf32> to vector<32x16xf32>
    %c0_11 = arith.constant 0 : index
    %c0_12 = arith.constant 0 : index
    %c0_13 = arith.constant 0 : index
    %8 = vector.load %arg5[%c0_11, %c0_12, %c0_13] : memref<1x8x32xf32, #tpu.memory_space<vmem>>, vector<1x8x32xf32>
    %9 = vector.shape_cast %8 : vector<1x8x32xf32> to vector<8x32xf32>
    %c0_14 = arith.constant 0 : index
    %c0_15 = arith.constant 0 : index
    %c0_16 = arith.constant 0 : index
    %10 = vector.load %arg9[%c0_14, %c0_15, %c0_16] : memref<2x16x128xf32, #tpu.memory_space<vmem>>, vector<1x16x128xf32>
    %11 = vector.shape_cast %10 : vector<1x16x128xf32> to vector<16x128xf32>
    %c0_17 = arith.constant 0 : index
    %c0_18 = arith.constant 0 : index
    %c0_19 = arith.constant 0 : index
    %12 = vector.load %arg7[%c0_17, %c0_18, %c0_19] : memref<12x32x128xf32, #tpu.memory_space<vmem>>, vector<1x32x128xf32>
    %13 = vector.shape_cast %12 : vector<1x32x128xf32> to vector<32x128xf32>
    %cst = arith.constant dense<0.000000e+00> : vector<8x128xf32>
    %14 = tpu.matmul %1, %13, %cst {dimension_numbers = #tpu.dot_dimension_numbers<[1], [0], [0], [1], [0, 0, 1, 1], [], []>} : vector<8x32xf32>, vector<32x128xf32>, vector<8x128xf32> -> vector<8x128xf32>
    %15 = vector.extract_strided_slice %11 {offsets = [0, 0], sizes = [1, 128], strides = [1, 1]} : vector<16x128xf32> to vector<1x128xf32>
    %16 = vector.broadcast %15 : vector<1x128xf32> to vector<8x128xf32>
    %17 = arith.addf %14, %16 : vector<8x128xf32>
    %c1 = arith.constant 1 : index
    %c0_20 = arith.constant 0 : index
    %c0_21 = arith.constant 0 : index
    %18 = vector.load %arg7[%c1, %c0_20, %c0_21] : memref<12x32x128xf32, #tpu.memory_space<vmem>>, vector<1x32x128xf32>
    %19 = vector.shape_cast %18 : vector<1x32x128xf32> to vector<32x128xf32>
    %20 = vector.extract_strided_slice %11 {offsets = [1, 0], sizes = [1, 128], strides = [1, 1]} : vector<16x128xf32> to vector<1x128xf32>
    %21 = vector.extract_strided_slice %11 {offsets = [2, 0], sizes = [1, 128], strides = [1, 1]} : vector<16x128xf32> to vector<1x128xf32>
    %22 = vector.extract_strided_slice %11 {offsets = [3, 0], sizes = [1, 128], strides = [1, 1]} : vector<16x128xf32> to vector<1x128xf32>
    %23 = vector.extract_strided_slice %17 {offsets = [0, 0], sizes = [8, 8], strides = [1, 1]} : vector<8x128xf32> to vector<8x8xf32>
    %24 = vector.extract_strided_slice %17 {offsets = [0, 32], sizes = [8, 8], strides = [1, 1]} : vector<8x128xf32> to vector<8x8xf32>
    %cst_22 = arith.constant dense<0.000000e+00> : vector<8x8xf32>
    %25 = tpu.matmul %23, %24, %cst_22 {dimension_numbers = #tpu.dot_dimension_numbers<[1], [1], [0], [0], [0, 0, 1, 0], [], []>} : vector<8x8xf32>, vector<8x8xf32>, vector<8x8xf32> -> vector<8x8xf32>
    %26 = vector.extract_strided_slice %17 {offsets = [0, 8], sizes = [8, 8], strides = [1, 1]} : vector<8x128xf32> to vector<8x8xf32>
    %27 = vector.extract_strided_slice %17 {offsets = [0, 40], sizes = [8, 8], strides = [1, 1]} : vector<8x128xf32> to vector<8x8xf32>
    %cst_23 = arith.constant dense<0.000000e+00> : vector<8x8xf32>
    %28 = tpu.matmul %26, %27, %cst_23 {dimension_numbers = #tpu.dot_dimension_numbers<[1], [1], [0], [0], [0, 0, 1, 0], [], []>} : vector<8x8xf32>, vector<8x8xf32>, vector<8x8xf32> -> vector<8x8xf32>
    %29 = vector.extract_strided_slice %17 {offsets = [0, 16], sizes = [8, 8], strides = [1, 1]} : vector<8x128xf32> to vector<8x8xf32>
    %30 = vector.extract_strided_slice %17 {offsets = [0, 48], sizes = [8, 8], strides = [1, 1]} : vector<8x128xf32> to vector<8x8xf32>
    %cst_24 = arith.constant dense<0.000000e+00> : vector<8x8xf32>
    %31 = tpu.matmul %29, %30, %cst_24 {dimension_numbers = #tpu.dot_dimension_numbers<[1], [1], [0], [0], [0, 0, 1, 0], [], []>} : vector<8x8xf32>, vector<8x8xf32>, vector<8x8xf32> -> vector<8x8xf32>
    %32 = vector.extract_strided_slice %17 {offsets = [0, 24], sizes = [8, 8], strides = [1, 1]} : vector<8x128xf32> to vector<8x8xf32>
    %33 = vector.extract_strided_slice %17 {offsets = [0, 56], sizes = [8, 8], strides = [1, 1]} : vector<8x128xf32> to vector<8x8xf32>
    %cst_25 = arith.constant dense<0.000000e+00> : vector<8x8xf32>
    %34 = tpu.matmul %32, %33, %cst_25 {dimension_numbers = #tpu.dot_dimension_numbers<[1], [1], [0], [0], [0, 0, 1, 0], [], []>} : vector<8x8xf32>, vector<8x8xf32>, vector<8x8xf32> -> vector<8x8xf32>
    %35 = tpu.concatenate %25, %28, %31, %34 in 0 : vector<8x8xf32>, vector<8x8xf32>, vector<8x8xf32>, vector<8x8xf32> -> vector<32x8xf32>
    %cst_26 = arith.constant 0.353553385 : f32
    %36 = vector.broadcast %cst_26 : f32 to vector<32x8xf32>
    %37 = arith.mulf %35, %36 : vector<32x8xf32>
    %38 = arith.addf %37, %5 : vector<32x8xf32>
    %cst_27 = arith.constant dense<0xFF800000> : vector<32xf32>
    %39 = vector.multi_reduction <maximumf>, %38, %cst_27 [1] : vector<32x8xf32> to vector<32xf32>
    %40 = vector.shape_cast %39 : vector<32xf32> to vector<32x1xf32>
    %41 = vector.broadcast %40 : vector<32x1xf32> to vector<32x8xf32>
    %42 = arith.subf %38, %41 : vector<32x8xf32>
    %43 = math.exp %42 : vector<32x8xf32>
    %cst_28 = arith.constant dense<0.000000e+00> : vector<32xf32>
    %44 = vector.multi_reduction <add>, %43, %cst_28 [1] : vector<32x8xf32> to vector<32xf32>
    %45 = vector.shape_cast %44 : vector<32xf32> to vector<32x1xf32>
    %46 = tpu.reciprocal %45 {approx = true} : vector<32x1xf32> -> vector<32x1xf32>
    %47 = vector.broadcast %46 : vector<32x1xf32> to vector<32x8xf32>
    %48 = arith.mulf %43, %47 : vector<32x8xf32>
    %cst_29 = arith.constant 0.000000e+00 : f32
    %49 = vector.broadcast %cst_29 : f32 to vector<8x32xf32>
    %50 = vector.extract_strided_slice %17 {offsets = [0, 64], sizes = [8, 8], strides = [1, 1]} : vector<8x128xf32> to vector<8x8xf32>
    %51 = vector.extract_strided_slice %48 {offsets = [0, 0], sizes = [8, 8], strides = [1, 1]} : vector<32x8xf32> to vector<8x8xf32>
    %cst_30 = arith.constant dense<0.000000e+00> : vector<8x8xf32>
    %52 = tpu.matmul %51, %50, %cst_30 {dimension_numbers = #tpu.dot_dimension_numbers<[1], [0], [0], [1], [0, 0, 1, 1], [], []>} : vector<8x8xf32>, vector<8x8xf32>, vector<8x8xf32> -> vector<8x8xf32>
    %53 = vector.extract_strided_slice %19 {offsets = [0, 0], sizes = [8, 32], strides = [1, 1]} : vector<32x128xf32> to vector<8x32xf32>
    %cst_31 = arith.constant dense<0.000000e+00> : vector<8x32xf32>
    %54 = tpu.matmul %52, %53, %cst_31 {dimension_numbers = #tpu.dot_dimension_numbers<[1], [0], [0], [1], [0, 0, 1, 1], [], []>} : vector<8x8xf32>, vector<8x32xf32>, vector<8x32xf32> -> vector<8x32xf32>
    %55 = arith.addf %49, %54 : vector<8x32xf32>
    %56 = vector.extract_strided_slice %17 {offsets = [0, 72], sizes = [8, 8], strides = [1, 1]} : vector<8x128xf32> to vector<8x8xf32>
    %57 = vector.extract_strided_slice %48 {offsets = [8, 0], sizes = [8, 8], strides = [1, 1]} : vector<32x8xf32> to vector<8x8xf32>
    %cst_32 = arith.constant dense<0.000000e+00> : vector<8x8xf32>
    %58 = tpu.matmul %57, %56, %cst_32 {dimension_numbers = #tpu.dot_dimension_numbers<[1], [0], [0], [1], [0, 0, 1, 1], [], []>} : vector<8x8xf32>, vector<8x8xf32>, vector<8x8xf32> -> vector<8x8xf32>
    %59 = vector.extract_strided_slice %19 {offsets = [8, 0], sizes = [8, 32], strides = [1, 1]} : vector<32x128xf32> to vector<8x32xf32>
    %cst_33 = arith.constant dense<0.000000e+00> : vector<8x32xf32>
    %60 = tpu.matmul %58, %59, %cst_33 {dimension_numbers = #tpu.dot_dimension_numbers<[1], [0], [0], [1], [0, 0, 1, 1], [], []>} : vector<8x8xf32>, vector<8x32xf32>, vector<8x32xf32> -> vector<8x32xf32>
    %61 = arith.addf %55, %60 : vector<8x32xf32>
    %62 = vector.extract_strided_slice %17 {offsets = [0, 80], sizes = [8, 8], strides = [1, 1]} : vector<8x128xf32> to vector<8x8xf32>
    %63 = vector.extract_strided_slice %48 {offsets = [16, 0], sizes = [8, 8], strides = [1, 1]} : vector<32x8xf32> to vector<8x8xf32>
    %cst_34 = arith.constant dense<0.000000e+00> : vector<8x8xf32>
    %64 = tpu.matmul %63, %62, %cst_34 {dimension_numbers = #tpu.dot_dimension_numbers<[1], [0], [0], [1], [0, 0, 1, 1], [], []>} : vector<8x8xf32>, vector<8x8xf32>, vector<8x8xf32> -> vector<8x8xf32>
    %65 = vector.extract_strided_slice %19 {offsets = [16, 0], sizes = [8, 32], strides = [1, 1]} : vector<32x128xf32> to vector<8x32xf32>
    %cst_35 = arith.constant dense<0.000000e+00> : vector<8x32xf32>
    %66 = tpu.matmul %64, %65, %cst_35 {dimension_numbers = #tpu.dot_dimension_numbers<[1], [0], [0], [1], [0, 0, 1, 1], [], []>} : vector<8x8xf32>, vector<8x32xf32>, vector<8x32xf32> -> vector<8x32xf32>
    %67 = arith.addf %61, %66 : vector<8x32xf32>
    %68 = vector.extract_strided_slice %17 {offsets = [0, 88], sizes = [8, 8], strides = [1, 1]} : vector<8x128xf32> to vector<8x8xf32>
    %69 = vector.extract_strided_slice %48 {offsets = [24, 0], sizes = [8, 8], strides = [1, 1]} : vector<32x8xf32> to vector<8x8xf32>
    %cst_36 = arith.constant dense<0.000000e+00> : vector<8x8xf32>
    %70 = tpu.matmul %69, %68, %cst_36 {dimension_numbers = #tpu.dot_dimension_numbers<[1], [0], [0], [1], [0, 0, 1, 1], [], []>} : vector<8x8xf32>, vector<8x8xf32>, vector<8x8xf32> -> vector<8x8xf32>
    %71 = vector.extract_strided_slice %19 {offsets = [24, 0], sizes = [8, 32], strides = [1, 1]} : vector<32x128xf32> to vector<8x32xf32>
    %cst_37 = arith.constant dense<0.000000e+00> : vector<8x32xf32>
    %72 = tpu.matmul %70, %71, %cst_37 {dimension_numbers = #tpu.dot_dimension_numbers<[1], [0], [0], [1], [0, 0, 1, 1], [], []>} : vector<8x8xf32>, vector<8x32xf32>, vector<8x32xf32> -> vector<8x32xf32>
    %73 = arith.addf %67, %72 : vector<8x32xf32>
    %74 = vector.extract_strided_slice %20 {offsets = [0, 0], sizes = [1, 32], strides = [1, 1]} : vector<1x128xf32> to vector<1x32xf32>
    %75 = vector.broadcast %74 : vector<1x32xf32> to vector<8x32xf32>
    %76 = arith.addf %73, %75 : vector<8x32xf32>
    %77 = arith.addf %76, %1 : vector<8x32xf32>
    %78 = vector.extract_strided_slice %21 {offsets = [0, 0], sizes = [1, 32], strides = [1, 1]} : vector<1x128xf32> to vector<1x32xf32>
    %79 = vector.extract_strided_slice %22 {offsets = [0, 0], sizes = [1, 32], strides = [1, 1]} : vector<1x128xf32> to vector<1x32xf32>
    %cst_38 = arith.constant dense<0.000000e+00> : vector<8xf32>
    %80 = vector.multi_reduction <add>, %77, %cst_38 [1] : vector<8x32xf32> to vector<8xf32>
    %81 = vector.shape_cast %80 : vector<8xf32> to vector<8x1xf32>
    %cst_39 = arith.constant 3.200000e+01 : f32
    %82 = vector.broadcast %cst_39 : f32 to vector<8x1xf32>
    %83 = arith.divf %81, %82 : vector<8x1xf32>
    %84 = vector.broadcast %83 : vector<8x1xf32> to vector<8x32xf32>
    %85 = arith.subf %77, %84 : vector<8x32xf32>
    %86 = arith.mulf %85, %85 : vector<8x32xf32>
    %cst_40 = arith.constant dense<0.000000e+00> : vector<8xf32>
    %87 = vector.multi_reduction <add>, %86, %cst_40 [1] : vector<8x32xf32> to vector<8xf32>
    %88 = vector.shape_cast %87 : vector<8xf32> to vector<8x1xf32>
    %cst_41 = arith.constant 3.200000e+01 : f32
    %89 = vector.broadcast %cst_41 : f32 to vector<8x1xf32>
    %90 = arith.divf %88, %89 : vector<8x1xf32>
    %91 = vector.broadcast %83 : vector<8x1xf32> to vector<8x32xf32>
    %92 = arith.subf %77, %91 : vector<8x32xf32>
    %cst_42 = arith.constant 9.99999974E-6 : f32
    %93 = vector.broadcast %cst_42 : f32 to vector<8x1xf32>
    %94 = arith.addf %90, %93 : vector<8x1xf32>
    %95 = math.rsqrt %94 : vector<8x1xf32>
    %96 = vector.broadcast %95 : vector<8x1xf32> to vector<8x32xf32>
    %97 = arith.mulf %92, %96 : vector<8x32xf32>
    %98 = vector.broadcast %78 : vector<1x32xf32> to vector<8x32xf32>
    %99 = arith.mulf %97, %98 : vector<8x32xf32>
    %100 = vector.broadcast %79 : vector<1x32xf32> to vector<8x32xf32>
    %101 = arith.addf %99, %100 : vector<8x32xf32>
    %102 = arith.mulf %101, %9 : vector<8x32xf32>
    %c2 = arith.constant 2 : index
    %c0_43 = arith.constant 0 : index
    %c0_44 = arith.constant 0 : index
    %103 = vector.load %arg7[%c2, %c0_43, %c0_44] : memref<12x32x128xf32, #tpu.memory_space<vmem>>, vector<1x32x128xf32>
    %104 = vector.shape_cast %103 : vector<1x32x128xf32> to vector<32x128xf32>
    %cst_45 = arith.constant dense<0.000000e+00> : vector<8x128xf32>
    %105 = tpu.matmul %102, %104, %cst_45 {dimension_numbers = #tpu.dot_dimension_numbers<[1], [0], [0], [1], [0, 0, 1, 1], [], []>} : vector<8x32xf32>, vector<32x128xf32>, vector<8x128xf32> -> vector<8x128xf32>
    %106 = vector.extract_strided_slice %11 {offsets = [4, 0], sizes = [1, 128], strides = [1, 1]} : vector<16x128xf32> to vector<1x128xf32>
    %107 = vector.broadcast %106 : vector<1x128xf32> to vector<8x128xf32>
    %108 = arith.addf %105, %107 : vector<8x128xf32>
    %c3 = arith.constant 3 : index
    %c0_46 = arith.constant 0 : index
    %c0_47 = arith.constant 0 : index
    %109 = vector.load %arg7[%c3, %c0_46, %c0_47] : memref<12x32x128xf32, #tpu.memory_space<vmem>>, vector<1x32x128xf32>
    %110 = vector.shape_cast %109 : vector<1x32x128xf32> to vector<32x128xf32>
    %cst_48 = arith.constant dense<0.000000e+00> : vector<16x128xf32>
    %111 = tpu.matmul %3, %110, %cst_48 {dimension_numbers = #tpu.dot_dimension_numbers<[1], [0], [0], [1], [0, 0, 1, 1], [], []>} : vector<16x32xf32>, vector<32x128xf32>, vector<16x128xf32> -> vector<16x128xf32>
    %112 = vector.extract_strided_slice %11 {offsets = [5, 0], sizes = [1, 128], strides = [1, 1]} : vector<16x128xf32> to vector<1x128xf32>
    %113 = vector.broadcast %112 : vector<1x128xf32> to vector<16x128xf32>
    %114 = arith.addf %111, %113 : vector<16x128xf32>
    %c4 = arith.constant 4 : index
    %c0_49 = arith.constant 0 : index
    %c0_50 = arith.constant 0 : index
    %115 = vector.load %arg7[%c4, %c0_49, %c0_50] : memref<12x32x128xf32, #tpu.memory_space<vmem>>, vector<1x32x128xf32>
    %116 = vector.shape_cast %115 : vector<1x32x128xf32> to vector<32x128xf32>
    %117 = vector.extract_strided_slice %11 {offsets = [6, 0], sizes = [1, 128], strides = [1, 1]} : vector<16x128xf32> to vector<1x128xf32>
    %118 = vector.extract_strided_slice %11 {offsets = [7, 0], sizes = [1, 128], strides = [1, 1]} : vector<16x128xf32> to vector<1x128xf32>
    %119 = vector.extract_strided_slice %11 {offsets = [8, 0], sizes = [1, 128], strides = [1, 1]} : vector<16x128xf32> to vector<1x128xf32>
    %120 = vector.extract_strided_slice %108 {offsets = [0, 0], sizes = [8, 8], strides = [1, 1]} : vector<8x128xf32> to vector<8x8xf32>
    %121 = vector.extract_strided_slice %114 {offsets = [0, 0], sizes = [16, 8], strides = [1, 1]} : vector<16x128xf32> to vector<16x8xf32>
    %cst_51 = arith.constant dense<0.000000e+00> : vector<8x16xf32>
    %122 = tpu.matmul %120, %121, %cst_51 {dimension_numbers = #tpu.dot_dimension_numbers<[1], [1], [0], [0], [0, 0, 1, 0], [], []>} : vector<8x8xf32>, vector<16x8xf32>, vector<8x16xf32> -> vector<8x16xf32>
    %123 = vector.extract_strided_slice %108 {offsets = [0, 8], sizes = [8, 8], strides = [1, 1]} : vector<8x128xf32> to vector<8x8xf32>
    %124 = vector.extract_strided_slice %114 {offsets = [0, 8], sizes = [16, 8], strides = [1, 1]} : vector<16x128xf32> to vector<16x8xf32>
    %cst_52 = arith.constant dense<0.000000e+00> : vector<8x16xf32>
    %125 = tpu.matmul %123, %124, %cst_52 {dimension_numbers = #tpu.dot_dimension_numbers<[1], [1], [0], [0], [0, 0, 1, 0], [], []>} : vector<8x8xf32>, vector<16x8xf32>, vector<8x16xf32> -> vector<8x16xf32>
    %126 = vector.extract_strided_slice %108 {offsets = [0, 16], sizes = [8, 8], strides = [1, 1]} : vector<8x128xf32> to vector<8x8xf32>
    %127 = vector.extract_strided_slice %114 {offsets = [0, 16], sizes = [16, 8], strides = [1, 1]} : vector<16x128xf32> to vector<16x8xf32>
    %cst_53 = arith.constant dense<0.000000e+00> : vector<8x16xf32>
    %128 = tpu.matmul %126, %127, %cst_53 {dimension_numbers = #tpu.dot_dimension_numbers<[1], [1], [0], [0], [0, 0, 1, 0], [], []>} : vector<8x8xf32>, vector<16x8xf32>, vector<8x16xf32> -> vector<8x16xf32>
    %129 = vector.extract_strided_slice %108 {offsets = [0, 24], sizes = [8, 8], strides = [1, 1]} : vector<8x128xf32> to vector<8x8xf32>
    %130 = vector.extract_strided_slice %114 {offsets = [0, 24], sizes = [16, 8], strides = [1, 1]} : vector<16x128xf32> to vector<16x8xf32>
    %cst_54 = arith.constant dense<0.000000e+00> : vector<8x16xf32>
    %131 = tpu.matmul %129, %130, %cst_54 {dimension_numbers = #tpu.dot_dimension_numbers<[1], [1], [0], [0], [0, 0, 1, 0], [], []>} : vector<8x8xf32>, vector<16x8xf32>, vector<8x16xf32> -> vector<8x16xf32>
    %132 = tpu.concatenate %122, %125, %128, %131 in 0 : vector<8x16xf32>, vector<8x16xf32>, vector<8x16xf32>, vector<8x16xf32> -> vector<32x16xf32>
    %cst_55 = arith.constant 0.353553385 : f32
    %133 = vector.broadcast %cst_55 : f32 to vector<32x16xf32>
    %134 = arith.mulf %132, %133 : vector<32x16xf32>
    %135 = arith.addf %134, %7 : vector<32x16xf32>
    %cst_56 = arith.constant dense<0xFF800000> : vector<32xf32>
    %136 = vector.multi_reduction <maximumf>, %135, %cst_56 [1] : vector<32x16xf32> to vector<32xf32>
    %137 = vector.shape_cast %136 : vector<32xf32> to vector<32x1xf32>
    %138 = vector.broadcast %137 : vector<32x1xf32> to vector<32x16xf32>
    %139 = arith.subf %135, %138 : vector<32x16xf32>
    %140 = math.exp %139 : vector<32x16xf32>
    %cst_57 = arith.constant dense<0.000000e+00> : vector<32xf32>
    %141 = vector.multi_reduction <add>, %140, %cst_57 [1] : vector<32x16xf32> to vector<32xf32>
    %142 = vector.shape_cast %141 : vector<32xf32> to vector<32x1xf32>
    %143 = tpu.reciprocal %142 {approx = true} : vector<32x1xf32> -> vector<32x1xf32>
    %144 = vector.broadcast %143 : vector<32x1xf32> to vector<32x16xf32>
    %145 = arith.mulf %140, %144 : vector<32x16xf32>
    %cst_58 = arith.constant 0.000000e+00 : f32
    %146 = vector.broadcast %cst_58 : f32 to vector<8x32xf32>
    %147 = vector.extract_strided_slice %114 {offsets = [0, 32], sizes = [16, 8], strides = [1, 1]} : vector<16x128xf32> to vector<16x8xf32>
    %148 = vector.extract_strided_slice %145 {offsets = [0, 0], sizes = [8, 16], strides = [1, 1]} : vector<32x16xf32> to vector<8x16xf32>
    %cst_59 = arith.constant dense<0.000000e+00> : vector<8x8xf32>
    %149 = tpu.matmul %148, %147, %cst_59 {dimension_numbers = #tpu.dot_dimension_numbers<[1], [0], [0], [1], [0, 0, 1, 1], [], []>} : vector<8x16xf32>, vector<16x8xf32>, vector<8x8xf32> -> vector<8x8xf32>
    %150 = vector.extract_strided_slice %116 {offsets = [0, 0], sizes = [8, 32], strides = [1, 1]} : vector<32x128xf32> to vector<8x32xf32>
    %cst_60 = arith.constant dense<0.000000e+00> : vector<8x32xf32>
    %151 = tpu.matmul %149, %150, %cst_60 {dimension_numbers = #tpu.dot_dimension_numbers<[1], [0], [0], [1], [0, 0, 1, 1], [], []>} : vector<8x8xf32>, vector<8x32xf32>, vector<8x32xf32> -> vector<8x32xf32>
    %152 = arith.addf %146, %151 : vector<8x32xf32>
    %153 = vector.extract_strided_slice %114 {offsets = [0, 40], sizes = [16, 8], strides = [1, 1]} : vector<16x128xf32> to vector<16x8xf32>
    %154 = vector.extract_strided_slice %145 {offsets = [8, 0], sizes = [8, 16], strides = [1, 1]} : vector<32x16xf32> to vector<8x16xf32>
    %cst_61 = arith.constant dense<0.000000e+00> : vector<8x8xf32>
    %155 = tpu.matmul %154, %153, %cst_61 {dimension_numbers = #tpu.dot_dimension_numbers<[1], [0], [0], [1], [0, 0, 1, 1], [], []>} : vector<8x16xf32>, vector<16x8xf32>, vector<8x8xf32> -> vector<8x8xf32>
    %156 = vector.extract_strided_slice %116 {offsets = [8, 0], sizes = [8, 32], strides = [1, 1]} : vector<32x128xf32> to vector<8x32xf32>
    %cst_62 = arith.constant dense<0.000000e+00> : vector<8x32xf32>
    %157 = tpu.matmul %155, %156, %cst_62 {dimension_numbers = #tpu.dot_dimension_numbers<[1], [0], [0], [1], [0, 0, 1, 1], [], []>} : vector<8x8xf32>, vector<8x32xf32>, vector<8x32xf32> -> vector<8x32xf32>
    %158 = arith.addf %152, %157 : vector<8x32xf32>
    %159 = vector.extract_strided_slice %114 {offsets = [0, 48], sizes = [16, 8], strides = [1, 1]} : vector<16x128xf32> to vector<16x8xf32>
    %160 = vector.extract_strided_slice %145 {offsets = [16, 0], sizes = [8, 16], strides = [1, 1]} : vector<32x16xf32> to vector<8x16xf32>
    %cst_63 = arith.constant dense<0.000000e+00> : vector<8x8xf32>
    %161 = tpu.matmul %160, %159, %cst_63 {dimension_numbers = #tpu.dot_dimension_numbers<[1], [0], [0], [1], [0, 0, 1, 1], [], []>} : vector<8x16xf32>, vector<16x8xf32>, vector<8x8xf32> -> vector<8x8xf32>
    %162 = vector.extract_strided_slice %116 {offsets = [16, 0], sizes = [8, 32], strides = [1, 1]} : vector<32x128xf32> to vector<8x32xf32>
    %cst_64 = arith.constant dense<0.000000e+00> : vector<8x32xf32>
    %163 = tpu.matmul %161, %162, %cst_64 {dimension_numbers = #tpu.dot_dimension_numbers<[1], [0], [0], [1], [0, 0, 1, 1], [], []>} : vector<8x8xf32>, vector<8x32xf32>, vector<8x32xf32> -> vector<8x32xf32>
    %164 = arith.addf %158, %163 : vector<8x32xf32>
    %165 = vector.extract_strided_slice %114 {offsets = [0, 56], sizes = [16, 8], strides = [1, 1]} : vector<16x128xf32> to vector<16x8xf32>
    %166 = vector.extract_strided_slice %145 {offsets = [24, 0], sizes = [8, 16], strides = [1, 1]} : vector<32x16xf32> to vector<8x16xf32>
    %cst_65 = arith.constant dense<0.000000e+00> : vector<8x8xf32>
    %167 = tpu.matmul %166, %165, %cst_65 {dimension_numbers = #tpu.dot_dimension_numbers<[1], [0], [0], [1], [0, 0, 1, 1], [], []>} : vector<8x16xf32>, vector<16x8xf32>, vector<8x8xf32> -> vector<8x8xf32>
    %168 = vector.extract_strided_slice %116 {offsets = [24, 0], sizes = [8, 32], strides = [1, 1]} : vector<32x128xf32> to vector<8x32xf32>
    %cst_66 = arith.constant dense<0.000000e+00> : vector<8x32xf32>
    %169 = tpu.matmul %167, %168, %cst_66 {dimension_numbers = #tpu.dot_dimension_numbers<[1], [0], [0], [1], [0, 0, 1, 1], [], []>} : vector<8x8xf32>, vector<8x32xf32>, vector<8x32xf32> -> vector<8x32xf32>
    %170 = arith.addf %164, %169 : vector<8x32xf32>
    %171 = vector.extract_strided_slice %117 {offsets = [0, 0], sizes = [1, 32], strides = [1, 1]} : vector<1x128xf32> to vector<1x32xf32>
    %172 = vector.broadcast %171 : vector<1x32xf32> to vector<8x32xf32>
    %173 = arith.addf %170, %172 : vector<8x32xf32>
    %174 = arith.addf %173, %102 : vector<8x32xf32>
    %175 = vector.extract_strided_slice %118 {offsets = [0, 0], sizes = [1, 32], strides = [1, 1]} : vector<1x128xf32> to vector<1x32xf32>
    %176 = vector.extract_strided_slice %119 {offsets = [0, 0], sizes = [1, 32], strides = [1, 1]} : vector<1x128xf32> to vector<1x32xf32>
    %cst_67 = arith.constant dense<0.000000e+00> : vector<8xf32>
    %177 = vector.multi_reduction <add>, %174, %cst_67 [1] : vector<8x32xf32> to vector<8xf32>
    %178 = vector.shape_cast %177 : vector<8xf32> to vector<8x1xf32>
    %cst_68 = arith.constant 3.200000e+01 : f32
    %179 = vector.broadcast %cst_68 : f32 to vector<8x1xf32>
    %180 = arith.divf %178, %179 : vector<8x1xf32>
    %181 = vector.broadcast %180 : vector<8x1xf32> to vector<8x32xf32>
    %182 = arith.subf %174, %181 : vector<8x32xf32>
    %183 = arith.mulf %182, %182 : vector<8x32xf32>
    %cst_69 = arith.constant dense<0.000000e+00> : vector<8xf32>
    %184 = vector.multi_reduction <add>, %183, %cst_69 [1] : vector<8x32xf32> to vector<8xf32>
    %185 = vector.shape_cast %184 : vector<8xf32> to vector<8x1xf32>
    %cst_70 = arith.constant 3.200000e+01 : f32
    %186 = vector.broadcast %cst_70 : f32 to vector<8x1xf32>
    %187 = arith.divf %185, %186 : vector<8x1xf32>
    %188 = vector.broadcast %180 : vector<8x1xf32> to vector<8x32xf32>
    %189 = arith.subf %174, %188 : vector<8x32xf32>
    %cst_71 = arith.constant 9.99999974E-6 : f32
    %190 = vector.broadcast %cst_71 : f32 to vector<8x1xf32>
    %191 = arith.addf %187, %190 : vector<8x1xf32>
    %192 = math.rsqrt %191 : vector<8x1xf32>
    %193 = vector.broadcast %192 : vector<8x1xf32> to vector<8x32xf32>
    %194 = arith.mulf %189, %193 : vector<8x32xf32>
    %195 = vector.broadcast %175 : vector<1x32xf32> to vector<8x32xf32>
    %196 = arith.mulf %194, %195 : vector<8x32xf32>
    %197 = vector.broadcast %176 : vector<1x32xf32> to vector<8x32xf32>
    %198 = arith.addf %196, %197 : vector<8x32xf32>
    %199 = arith.mulf %198, %9 : vector<8x32xf32>
    %c5 = arith.constant 5 : index
    %c0_72 = arith.constant 0 : index
    %c0_73 = arith.constant 0 : index
    %200 = vector.load %arg7[%c5, %c0_72, %c0_73] : memref<12x32x128xf32, #tpu.memory_space<vmem>>, vector<1x32x128xf32>
    %201 = vector.shape_cast %200 : vector<1x32x128xf32> to vector<32x128xf32>
    %cst_74 = arith.constant dense<0.000000e+00> : vector<8x128xf32>
    %202 = tpu.matmul %199, %201, %cst_74 {dimension_numbers = #tpu.dot_dimension_numbers<[1], [0], [0], [1], [0, 0, 1, 1], [], []>} : vector<8x32xf32>, vector<32x128xf32>, vector<8x128xf32> -> vector<8x128xf32>
    %203 = vector.extract_strided_slice %11 {offsets = [9, 0], sizes = [1, 128], strides = [1, 1]} : vector<16x128xf32> to vector<1x128xf32>
    %204 = vector.broadcast %203 : vector<1x128xf32> to vector<8x128xf32>
    %205 = arith.addf %202, %204 : vector<8x128xf32>
    %cst_75 = arith.constant 0.000000e+00 : f32
    %206 = vector.broadcast %cst_75 : f32 to vector<8x128xf32>
    %207 = arith.maximumf %205, %206 : vector<8x128xf32>
    %208 = vector.extract_strided_slice %207 {offsets = [0, 0], sizes = [8, 64], strides = [1, 1]} : vector<8x128xf32> to vector<8x64xf32>
    %c0_76 = arith.constant 0 : index
    %c0_77 = arith.constant 0 : index
    %c0_78 = arith.constant 0 : index
    %209 = vector.load %arg8[%c0_76, %c0_77, %c0_78] : memref<2x64x32xf32, #tpu.memory_space<vmem>>, vector<1x64x32xf32>
    %210 = vector.shape_cast %209 : vector<1x64x32xf32> to vector<64x32xf32>
    %cst_79 = arith.constant dense<0.000000e+00> : vector<8x32xf32>
    %211 = tpu.matmul %208, %210, %cst_79 {dimension_numbers = #tpu.dot_dimension_numbers<[1], [0], [0], [1], [0, 0, 1, 1], [], []>} : vector<8x64xf32>, vector<64x32xf32>, vector<8x32xf32> -> vector<8x32xf32>
    %212 = vector.extract_strided_slice %11 {offsets = [10, 0], sizes = [1, 128], strides = [1, 1]} : vector<16x128xf32> to vector<1x128xf32>
    %213 = vector.extract_strided_slice %212 {offsets = [0, 0], sizes = [1, 32], strides = [1, 1]} : vector<1x128xf32> to vector<1x32xf32>
    %214 = vector.broadcast %213 : vector<1x32xf32> to vector<8x32xf32>
    %215 = arith.addf %211, %214 : vector<8x32xf32>
    %216 = arith.addf %215, %199 : vector<8x32xf32>
    %217 = vector.extract_strided_slice %11 {offsets = [11, 0], sizes = [1, 128], strides = [1, 1]} : vector<16x128xf32> to vector<1x128xf32>
    %218 = vector.extract_strided_slice %217 {offsets = [0, 0], sizes = [1, 32], strides = [1, 1]} : vector<1x128xf32> to vector<1x32xf32>
    %219 = vector.extract_strided_slice %11 {offsets = [12, 0], sizes = [1, 128], strides = [1, 1]} : vector<16x128xf32> to vector<1x128xf32>
    %220 = vector.extract_strided_slice %219 {offsets = [0, 0], sizes = [1, 32], strides = [1, 1]} : vector<1x128xf32> to vector<1x32xf32>
    %cst_80 = arith.constant dense<0.000000e+00> : vector<8xf32>
    %221 = vector.multi_reduction <add>, %216, %cst_80 [1] : vector<8x32xf32> to vector<8xf32>
    %222 = vector.shape_cast %221 : vector<8xf32> to vector<8x1xf32>
    %cst_81 = arith.constant 3.200000e+01 : f32
    %223 = vector.broadcast %cst_81 : f32 to vector<8x1xf32>
    %224 = arith.divf %222, %223 : vector<8x1xf32>
    %225 = vector.broadcast %224 : vector<8x1xf32> to vector<8x32xf32>
    %226 = arith.subf %216, %225 : vector<8x32xf32>
    %227 = arith.mulf %226, %226 : vector<8x32xf32>
    %cst_82 = arith.constant dense<0.000000e+00> : vector<8xf32>
    %228 = vector.multi_reduction <add>, %227, %cst_82 [1] : vector<8x32xf32> to vector<8xf32>
    %229 = vector.shape_cast %228 : vector<8xf32> to vector<8x1xf32>
    %cst_83 = arith.constant 3.200000e+01 : f32
    %230 = vector.broadcast %cst_83 : f32 to vector<8x1xf32>
    %231 = arith.divf %229, %230 : vector<8x1xf32>
    %232 = vector.broadcast %224 : vector<8x1xf32> to vector<8x32xf32>
    %233 = arith.subf %216, %232 : vector<8x32xf32>
    %cst_84 = arith.constant 9.99999974E-6 : f32
    %234 = vector.broadcast %cst_84 : f32 to vector<8x1xf32>
    %235 = arith.addf %231, %234 : vector<8x1xf32>
    %236 = math.rsqrt %235 : vector<8x1xf32>
    %237 = vector.broadcast %236 : vector<8x1xf32> to vector<8x32xf32>
    %238 = arith.mulf %233, %237 : vector<8x32xf32>
    %239 = vector.broadcast %218 : vector<1x32xf32> to vector<8x32xf32>
    %240 = arith.mulf %238, %239 : vector<8x32xf32>
    %241 = vector.broadcast %220 : vector<1x32xf32> to vector<8x32xf32>
    %242 = arith.addf %240, %241 : vector<8x32xf32>
    %243 = arith.mulf %242, %9 : vector<8x32xf32>
    %c1_85 = arith.constant 1 : index
    %c0_86 = arith.constant 0 : index
    %c0_87 = arith.constant 0 : index
    %244 = vector.load %arg9[%c1_85, %c0_86, %c0_87] : memref<2x16x128xf32, #tpu.memory_space<vmem>>, vector<1x16x128xf32>
    %245 = vector.shape_cast %244 : vector<1x16x128xf32> to vector<16x128xf32>
    %c6 = arith.constant 6 : index
    %c0_88 = arith.constant 0 : index
    %c0_89 = arith.constant 0 : index
    %246 = vector.load %arg7[%c6, %c0_88, %c0_89] : memref<12x32x128xf32, #tpu.memory_space<vmem>>, vector<1x32x128xf32>
    %247 = vector.shape_cast %246 : vector<1x32x128xf32> to vector<32x128xf32>
    %cst_90 = arith.constant dense<0.000000e+00> : vector<8x128xf32>
    %248 = tpu.matmul %243, %247, %cst_90 {dimension_numbers = #tpu.dot_dimension_numbers<[1], [0], [0], [1], [0, 0, 1, 1], [], []>} : vector<8x32xf32>, vector<32x128xf32>, vector<8x128xf32> -> vector<8x128xf32>
    %249 = vector.extract_strided_slice %245 {offsets = [0, 0], sizes = [1, 128], strides = [1, 1]} : vector<16x128xf32> to vector<1x128xf32>
    %250 = vector.broadcast %249 : vector<1x128xf32> to vector<8x128xf32>
    %251 = arith.addf %248, %250 : vector<8x128xf32>
    %c7 = arith.constant 7 : index
    %c0_91 = arith.constant 0 : index
    %c0_92 = arith.constant 0 : index
    %252 = vector.load %arg7[%c7, %c0_91, %c0_92] : memref<12x32x128xf32, #tpu.memory_space<vmem>>, vector<1x32x128xf32>
    %253 = vector.shape_cast %252 : vector<1x32x128xf32> to vector<32x128xf32>
    %254 = vector.extract_strided_slice %245 {offsets = [1, 0], sizes = [1, 128], strides = [1, 1]} : vector<16x128xf32> to vector<1x128xf32>
    %255 = vector.extract_strided_slice %245 {offsets = [2, 0], sizes = [1, 128], strides = [1, 1]} : vector<16x128xf32> to vector<1x128xf32>
    %256 = vector.extract_strided_slice %245 {offsets = [3, 0], sizes = [1, 128], strides = [1, 1]} : vector<16x128xf32> to vector<1x128xf32>
    %257 = vector.extract_strided_slice %251 {offsets = [0, 0], sizes = [8, 8], strides = [1, 1]} : vector<8x128xf32> to vector<8x8xf32>
    %258 = vector.extract_strided_slice %251 {offsets = [0, 32], sizes = [8, 8], strides = [1, 1]} : vector<8x128xf32> to vector<8x8xf32>
    %cst_93 = arith.constant dense<0.000000e+00> : vector<8x8xf32>
    %259 = tpu.matmul %257, %258, %cst_93 {dimension_numbers = #tpu.dot_dimension_numbers<[1], [1], [0], [0], [0, 0, 1, 0], [], []>} : vector<8x8xf32>, vector<8x8xf32>, vector<8x8xf32> -> vector<8x8xf32>
    %260 = vector.extract_strided_slice %251 {offsets = [0, 8], sizes = [8, 8], strides = [1, 1]} : vector<8x128xf32> to vector<8x8xf32>
    %261 = vector.extract_strided_slice %251 {offsets = [0, 40], sizes = [8, 8], strides = [1, 1]} : vector<8x128xf32> to vector<8x8xf32>
    %cst_94 = arith.constant dense<0.000000e+00> : vector<8x8xf32>
    %262 = tpu.matmul %260, %261, %cst_94 {dimension_numbers = #tpu.dot_dimension_numbers<[1], [1], [0], [0], [0, 0, 1, 0], [], []>} : vector<8x8xf32>, vector<8x8xf32>, vector<8x8xf32> -> vector<8x8xf32>
    %263 = vector.extract_strided_slice %251 {offsets = [0, 16], sizes = [8, 8], strides = [1, 1]} : vector<8x128xf32> to vector<8x8xf32>
    %264 = vector.extract_strided_slice %251 {offsets = [0, 48], sizes = [8, 8], strides = [1, 1]} : vector<8x128xf32> to vector<8x8xf32>
    %cst_95 = arith.constant dense<0.000000e+00> : vector<8x8xf32>
    %265 = tpu.matmul %263, %264, %cst_95 {dimension_numbers = #tpu.dot_dimension_numbers<[1], [1], [0], [0], [0, 0, 1, 0], [], []>} : vector<8x8xf32>, vector<8x8xf32>, vector<8x8xf32> -> vector<8x8xf32>
    %266 = vector.extract_strided_slice %251 {offsets = [0, 24], sizes = [8, 8], strides = [1, 1]} : vector<8x128xf32> to vector<8x8xf32>
    %267 = vector.extract_strided_slice %251 {offsets = [0, 56], sizes = [8, 8], strides = [1, 1]} : vector<8x128xf32> to vector<8x8xf32>
    %cst_96 = arith.constant dense<0.000000e+00> : vector<8x8xf32>
    %268 = tpu.matmul %266, %267, %cst_96 {dimension_numbers = #tpu.dot_dimension_numbers<[1], [1], [0], [0], [0, 0, 1, 0], [], []>} : vector<8x8xf32>, vector<8x8xf32>, vector<8x8xf32> -> vector<8x8xf32>
    %269 = tpu.concatenate %259, %262, %265, %268 in 0 : vector<8x8xf32>, vector<8x8xf32>, vector<8x8xf32>, vector<8x8xf32> -> vector<32x8xf32>
    %cst_97 = arith.constant 0.353553385 : f32
    %270 = vector.broadcast %cst_97 : f32 to vector<32x8xf32>
    %271 = arith.mulf %269, %270 : vector<32x8xf32>
    %272 = arith.addf %271, %5 : vector<32x8xf32>
    %cst_98 = arith.constant dense<0xFF800000> : vector<32xf32>
    %273 = vector.multi_reduction <maximumf>, %272, %cst_98 [1] : vector<32x8xf32> to vector<32xf32>
    %274 = vector.shape_cast %273 : vector<32xf32> to vector<32x1xf32>
    %275 = vector.broadcast %274 : vector<32x1xf32> to vector<32x8xf32>
    %276 = arith.subf %272, %275 : vector<32x8xf32>
    %277 = math.exp %276 : vector<32x8xf32>
    %cst_99 = arith.constant dense<0.000000e+00> : vector<32xf32>
    %278 = vector.multi_reduction <add>, %277, %cst_99 [1] : vector<32x8xf32> to vector<32xf32>
    %279 = vector.shape_cast %278 : vector<32xf32> to vector<32x1xf32>
    %280 = tpu.reciprocal %279 {approx = true} : vector<32x1xf32> -> vector<32x1xf32>
    %281 = vector.broadcast %280 : vector<32x1xf32> to vector<32x8xf32>
    %282 = arith.mulf %277, %281 : vector<32x8xf32>
    %cst_100 = arith.constant 0.000000e+00 : f32
    %283 = vector.broadcast %cst_100 : f32 to vector<8x32xf32>
    %284 = vector.extract_strided_slice %251 {offsets = [0, 64], sizes = [8, 8], strides = [1, 1]} : vector<8x128xf32> to vector<8x8xf32>
    %285 = vector.extract_strided_slice %282 {offsets = [0, 0], sizes = [8, 8], strides = [1, 1]} : vector<32x8xf32> to vector<8x8xf32>
    %cst_101 = arith.constant dense<0.000000e+00> : vector<8x8xf32>
    %286 = tpu.matmul %285, %284, %cst_101 {dimension_numbers = #tpu.dot_dimension_numbers<[1], [0], [0], [1], [0, 0, 1, 1], [], []>} : vector<8x8xf32>, vector<8x8xf32>, vector<8x8xf32> -> vector<8x8xf32>
    %287 = vector.extract_strided_slice %253 {offsets = [0, 0], sizes = [8, 32], strides = [1, 1]} : vector<32x128xf32> to vector<8x32xf32>
    %cst_102 = arith.constant dense<0.000000e+00> : vector<8x32xf32>
    %288 = tpu.matmul %286, %287, %cst_102 {dimension_numbers = #tpu.dot_dimension_numbers<[1], [0], [0], [1], [0, 0, 1, 1], [], []>} : vector<8x8xf32>, vector<8x32xf32>, vector<8x32xf32> -> vector<8x32xf32>
    %289 = arith.addf %283, %288 : vector<8x32xf32>
    %290 = vector.extract_strided_slice %251 {offsets = [0, 72], sizes = [8, 8], strides = [1, 1]} : vector<8x128xf32> to vector<8x8xf32>
    %291 = vector.extract_strided_slice %282 {offsets = [8, 0], sizes = [8, 8], strides = [1, 1]} : vector<32x8xf32> to vector<8x8xf32>
    %cst_103 = arith.constant dense<0.000000e+00> : vector<8x8xf32>
    %292 = tpu.matmul %291, %290, %cst_103 {dimension_numbers = #tpu.dot_dimension_numbers<[1], [0], [0], [1], [0, 0, 1, 1], [], []>} : vector<8x8xf32>, vector<8x8xf32>, vector<8x8xf32> -> vector<8x8xf32>
    %293 = vector.extract_strided_slice %253 {offsets = [8, 0], sizes = [8, 32], strides = [1, 1]} : vector<32x128xf32> to vector<8x32xf32>
    %cst_104 = arith.constant dense<0.000000e+00> : vector<8x32xf32>
    %294 = tpu.matmul %292, %293, %cst_104 {dimension_numbers = #tpu.dot_dimension_numbers<[1], [0], [0], [1], [0, 0, 1, 1], [], []>} : vector<8x8xf32>, vector<8x32xf32>, vector<8x32xf32> -> vector<8x32xf32>
    %295 = arith.addf %289, %294 : vector<8x32xf32>
    %296 = vector.extract_strided_slice %251 {offsets = [0, 80], sizes = [8, 8], strides = [1, 1]} : vector<8x128xf32> to vector<8x8xf32>
    %297 = vector.extract_strided_slice %282 {offsets = [16, 0], sizes = [8, 8], strides = [1, 1]} : vector<32x8xf32> to vector<8x8xf32>
    %cst_105 = arith.constant dense<0.000000e+00> : vector<8x8xf32>
    %298 = tpu.matmul %297, %296, %cst_105 {dimension_numbers = #tpu.dot_dimension_numbers<[1], [0], [0], [1], [0, 0, 1, 1], [], []>} : vector<8x8xf32>, vector<8x8xf32>, vector<8x8xf32> -> vector<8x8xf32>
    %299 = vector.extract_strided_slice %253 {offsets = [16, 0], sizes = [8, 32], strides = [1, 1]} : vector<32x128xf32> to vector<8x32xf32>
    %cst_106 = arith.constant dense<0.000000e+00> : vector<8x32xf32>
    %300 = tpu.matmul %298, %299, %cst_106 {dimension_numbers = #tpu.dot_dimension_numbers<[1], [0], [0], [1], [0, 0, 1, 1], [], []>} : vector<8x8xf32>, vector<8x32xf32>, vector<8x32xf32> -> vector<8x32xf32>
    %301 = arith.addf %295, %300 : vector<8x32xf32>
    %302 = vector.extract_strided_slice %251 {offsets = [0, 88], sizes = [8, 8], strides = [1, 1]} : vector<8x128xf32> to vector<8x8xf32>
    %303 = vector.extract_strided_slice %282 {offsets = [24, 0], sizes = [8, 8], strides = [1, 1]} : vector<32x8xf32> to vector<8x8xf32>
    %cst_107 = arith.constant dense<0.000000e+00> : vector<8x8xf32>
    %304 = tpu.matmul %303, %302, %cst_107 {dimension_numbers = #tpu.dot_dimension_numbers<[1], [0], [0], [1], [0, 0, 1, 1], [], []>} : vector<8x8xf32>, vector<8x8xf32>, vector<8x8xf32> -> vector<8x8xf32>
    %305 = vector.extract_strided_slice %253 {offsets = [24, 0], sizes = [8, 32], strides = [1, 1]} : vector<32x128xf32> to vector<8x32xf32>
    %cst_108 = arith.constant dense<0.000000e+00> : vector<8x32xf32>
    %306 = tpu.matmul %304, %305, %cst_108 {dimension_numbers = #tpu.dot_dimension_numbers<[1], [0], [0], [1], [0, 0, 1, 1], [], []>} : vector<8x8xf32>, vector<8x32xf32>, vector<8x32xf32> -> vector<8x32xf32>
    %307 = arith.addf %301, %306 : vector<8x32xf32>
    %308 = vector.extract_strided_slice %254 {offsets = [0, 0], sizes = [1, 32], strides = [1, 1]} : vector<1x128xf32> to vector<1x32xf32>
    %309 = vector.broadcast %308 : vector<1x32xf32> to vector<8x32xf32>
    %310 = arith.addf %307, %309 : vector<8x32xf32>
    %311 = arith.addf %310, %243 : vector<8x32xf32>
    %312 = vector.extract_strided_slice %255 {offsets = [0, 0], sizes = [1, 32], strides = [1, 1]} : vector<1x128xf32> to vector<1x32xf32>
    %313 = vector.extract_strided_slice %256 {offsets = [0, 0], sizes = [1, 32], strides = [1, 1]} : vector<1x128xf32> to vector<1x32xf32>
    %cst_109 = arith.constant dense<0.000000e+00> : vector<8xf32>
    %314 = vector.multi_reduction <add>, %311, %cst_109 [1] : vector<8x32xf32> to vector<8xf32>
    %315 = vector.shape_cast %314 : vector<8xf32> to vector<8x1xf32>
    %cst_110 = arith.constant 3.200000e+01 : f32
    %316 = vector.broadcast %cst_110 : f32 to vector<8x1xf32>
    %317 = arith.divf %315, %316 : vector<8x1xf32>
    %318 = vector.broadcast %317 : vector<8x1xf32> to vector<8x32xf32>
    %319 = arith.subf %311, %318 : vector<8x32xf32>
    %320 = arith.mulf %319, %319 : vector<8x32xf32>
    %cst_111 = arith.constant dense<0.000000e+00> : vector<8xf32>
    %321 = vector.multi_reduction <add>, %320, %cst_111 [1] : vector<8x32xf32> to vector<8xf32>
    %322 = vector.shape_cast %321 : vector<8xf32> to vector<8x1xf32>
    %cst_112 = arith.constant 3.200000e+01 : f32
    %323 = vector.broadcast %cst_112 : f32 to vector<8x1xf32>
    %324 = arith.divf %322, %323 : vector<8x1xf32>
    %325 = vector.broadcast %317 : vector<8x1xf32> to vector<8x32xf32>
    %326 = arith.subf %311, %325 : vector<8x32xf32>
    %cst_113 = arith.constant 9.99999974E-6 : f32
    %327 = vector.broadcast %cst_113 : f32 to vector<8x1xf32>
    %328 = arith.addf %324, %327 : vector<8x1xf32>
    %329 = math.rsqrt %328 : vector<8x1xf32>
    %330 = vector.broadcast %329 : vector<8x1xf32> to vector<8x32xf32>
    %331 = arith.mulf %326, %330 : vector<8x32xf32>
    %332 = vector.broadcast %312 : vector<1x32xf32> to vector<8x32xf32>
    %333 = arith.mulf %331, %332 : vector<8x32xf32>
    %334 = vector.broadcast %313 : vector<1x32xf32> to vector<8x32xf32>
    %335 = arith.addf %333, %334 : vector<8x32xf32>
    %336 = arith.mulf %335, %9 : vector<8x32xf32>
    %c8 = arith.constant 8 : index
    %c0_114 = arith.constant 0 : index
    %c0_115 = arith.constant 0 : index
    %337 = vector.load %arg7[%c8, %c0_114, %c0_115] : memref<12x32x128xf32, #tpu.memory_space<vmem>>, vector<1x32x128xf32>
    %338 = vector.shape_cast %337 : vector<1x32x128xf32> to vector<32x128xf32>
    %cst_116 = arith.constant dense<0.000000e+00> : vector<8x128xf32>
    %339 = tpu.matmul %336, %338, %cst_116 {dimension_numbers = #tpu.dot_dimension_numbers<[1], [0], [0], [1], [0, 0, 1, 1], [], []>} : vector<8x32xf32>, vector<32x128xf32>, vector<8x128xf32> -> vector<8x128xf32>
    %340 = vector.extract_strided_slice %245 {offsets = [4, 0], sizes = [1, 128], strides = [1, 1]} : vector<16x128xf32> to vector<1x128xf32>
    %341 = vector.broadcast %340 : vector<1x128xf32> to vector<8x128xf32>
    %342 = arith.addf %339, %341 : vector<8x128xf32>
    %c9 = arith.constant 9 : index
    %c0_117 = arith.constant 0 : index
    %c0_118 = arith.constant 0 : index
    %343 = vector.load %arg7[%c9, %c0_117, %c0_118] : memref<12x32x128xf32, #tpu.memory_space<vmem>>, vector<1x32x128xf32>
    %344 = vector.shape_cast %343 : vector<1x32x128xf32> to vector<32x128xf32>
    %cst_119 = arith.constant dense<0.000000e+00> : vector<16x128xf32>
    %345 = tpu.matmul %3, %344, %cst_119 {dimension_numbers = #tpu.dot_dimension_numbers<[1], [0], [0], [1], [0, 0, 1, 1], [], []>} : vector<16x32xf32>, vector<32x128xf32>, vector<16x128xf32> -> vector<16x128xf32>
    %346 = vector.extract_strided_slice %245 {offsets = [5, 0], sizes = [1, 128], strides = [1, 1]} : vector<16x128xf32> to vector<1x128xf32>
    %347 = vector.broadcast %346 : vector<1x128xf32> to vector<16x128xf32>
    %348 = arith.addf %345, %347 : vector<16x128xf32>
    %c10 = arith.constant 10 : index
    %c0_120 = arith.constant 0 : index
    %c0_121 = arith.constant 0 : index
    %349 = vector.load %arg7[%c10, %c0_120, %c0_121] : memref<12x32x128xf32, #tpu.memory_space<vmem>>, vector<1x32x128xf32>
    %350 = vector.shape_cast %349 : vector<1x32x128xf32> to vector<32x128xf32>
    %351 = vector.extract_strided_slice %245 {offsets = [6, 0], sizes = [1, 128], strides = [1, 1]} : vector<16x128xf32> to vector<1x128xf32>
    %352 = vector.extract_strided_slice %245 {offsets = [7, 0], sizes = [1, 128], strides = [1, 1]} : vector<16x128xf32> to vector<1x128xf32>
    %353 = vector.extract_strided_slice %245 {offsets = [8, 0], sizes = [1, 128], strides = [1, 1]} : vector<16x128xf32> to vector<1x128xf32>
    %354 = vector.extract_strided_slice %342 {offsets = [0, 0], sizes = [8, 8], strides = [1, 1]} : vector<8x128xf32> to vector<8x8xf32>
    %355 = vector.extract_strided_slice %348 {offsets = [0, 0], sizes = [16, 8], strides = [1, 1]} : vector<16x128xf32> to vector<16x8xf32>
    %cst_122 = arith.constant dense<0.000000e+00> : vector<8x16xf32>
    %356 = tpu.matmul %354, %355, %cst_122 {dimension_numbers = #tpu.dot_dimension_numbers<[1], [1], [0], [0], [0, 0, 1, 0], [], []>} : vector<8x8xf32>, vector<16x8xf32>, vector<8x16xf32> -> vector<8x16xf32>
    %357 = vector.extract_strided_slice %342 {offsets = [0, 8], sizes = [8, 8], strides = [1, 1]} : vector<8x128xf32> to vector<8x8xf32>
    %358 = vector.extract_strided_slice %348 {offsets = [0, 8], sizes = [16, 8], strides = [1, 1]} : vector<16x128xf32> to vector<16x8xf32>
    %cst_123 = arith.constant dense<0.000000e+00> : vector<8x16xf32>
    %359 = tpu.matmul %357, %358, %cst_123 {dimension_numbers = #tpu.dot_dimension_numbers<[1], [1], [0], [0], [0, 0, 1, 0], [], []>} : vector<8x8xf32>, vector<16x8xf32>, vector<8x16xf32> -> vector<8x16xf32>
    %360 = vector.extract_strided_slice %342 {offsets = [0, 16], sizes = [8, 8], strides = [1, 1]} : vector<8x128xf32> to vector<8x8xf32>
    %361 = vector.extract_strided_slice %348 {offsets = [0, 16], sizes = [16, 8], strides = [1, 1]} : vector<16x128xf32> to vector<16x8xf32>
    %cst_124 = arith.constant dense<0.000000e+00> : vector<8x16xf32>
    %362 = tpu.matmul %360, %361, %cst_124 {dimension_numbers = #tpu.dot_dimension_numbers<[1], [1], [0], [0], [0, 0, 1, 0], [], []>} : vector<8x8xf32>, vector<16x8xf32>, vector<8x16xf32> -> vector<8x16xf32>
    %363 = vector.extract_strided_slice %342 {offsets = [0, 24], sizes = [8, 8], strides = [1, 1]} : vector<8x128xf32> to vector<8x8xf32>
    %364 = vector.extract_strided_slice %348 {offsets = [0, 24], sizes = [16, 8], strides = [1, 1]} : vector<16x128xf32> to vector<16x8xf32>
    %cst_125 = arith.constant dense<0.000000e+00> : vector<8x16xf32>
    %365 = tpu.matmul %363, %364, %cst_125 {dimension_numbers = #tpu.dot_dimension_numbers<[1], [1], [0], [0], [0, 0, 1, 0], [], []>} : vector<8x8xf32>, vector<16x8xf32>, vector<8x16xf32> -> vector<8x16xf32>
    %366 = tpu.concatenate %356, %359, %362, %365 in 0 : vector<8x16xf32>, vector<8x16xf32>, vector<8x16xf32>, vector<8x16xf32> -> vector<32x16xf32>
    %cst_126 = arith.constant 0.353553385 : f32
    %367 = vector.broadcast %cst_126 : f32 to vector<32x16xf32>
    %368 = arith.mulf %366, %367 : vector<32x16xf32>
    %369 = arith.addf %368, %7 : vector<32x16xf32>
    %cst_127 = arith.constant dense<0xFF800000> : vector<32xf32>
    %370 = vector.multi_reduction <maximumf>, %369, %cst_127 [1] : vector<32x16xf32> to vector<32xf32>
    %371 = vector.shape_cast %370 : vector<32xf32> to vector<32x1xf32>
    %372 = vector.broadcast %371 : vector<32x1xf32> to vector<32x16xf32>
    %373 = arith.subf %369, %372 : vector<32x16xf32>
    %374 = math.exp %373 : vector<32x16xf32>
    %cst_128 = arith.constant dense<0.000000e+00> : vector<32xf32>
    %375 = vector.multi_reduction <add>, %374, %cst_128 [1] : vector<32x16xf32> to vector<32xf32>
    %376 = vector.shape_cast %375 : vector<32xf32> to vector<32x1xf32>
    %377 = tpu.reciprocal %376 {approx = true} : vector<32x1xf32> -> vector<32x1xf32>
    %378 = vector.broadcast %377 : vector<32x1xf32> to vector<32x16xf32>
    %379 = arith.mulf %374, %378 : vector<32x16xf32>
    %cst_129 = arith.constant 0.000000e+00 : f32
    %380 = vector.broadcast %cst_129 : f32 to vector<8x32xf32>
    %381 = vector.extract_strided_slice %348 {offsets = [0, 32], sizes = [16, 8], strides = [1, 1]} : vector<16x128xf32> to vector<16x8xf32>
    %382 = vector.extract_strided_slice %379 {offsets = [0, 0], sizes = [8, 16], strides = [1, 1]} : vector<32x16xf32> to vector<8x16xf32>
    %cst_130 = arith.constant dense<0.000000e+00> : vector<8x8xf32>
    %383 = tpu.matmul %382, %381, %cst_130 {dimension_numbers = #tpu.dot_dimension_numbers<[1], [0], [0], [1], [0, 0, 1, 1], [], []>} : vector<8x16xf32>, vector<16x8xf32>, vector<8x8xf32> -> vector<8x8xf32>
    %384 = vector.extract_strided_slice %350 {offsets = [0, 0], sizes = [8, 32], strides = [1, 1]} : vector<32x128xf32> to vector<8x32xf32>
    %cst_131 = arith.constant dense<0.000000e+00> : vector<8x32xf32>
    %385 = tpu.matmul %383, %384, %cst_131 {dimension_numbers = #tpu.dot_dimension_numbers<[1], [0], [0], [1], [0, 0, 1, 1], [], []>} : vector<8x8xf32>, vector<8x32xf32>, vector<8x32xf32> -> vector<8x32xf32>
    %386 = arith.addf %380, %385 : vector<8x32xf32>
    %387 = vector.extract_strided_slice %348 {offsets = [0, 40], sizes = [16, 8], strides = [1, 1]} : vector<16x128xf32> to vector<16x8xf32>
    %388 = vector.extract_strided_slice %379 {offsets = [8, 0], sizes = [8, 16], strides = [1, 1]} : vector<32x16xf32> to vector<8x16xf32>
    %cst_132 = arith.constant dense<0.000000e+00> : vector<8x8xf32>
    %389 = tpu.matmul %388, %387, %cst_132 {dimension_numbers = #tpu.dot_dimension_numbers<[1], [0], [0], [1], [0, 0, 1, 1], [], []>} : vector<8x16xf32>, vector<16x8xf32>, vector<8x8xf32> -> vector<8x8xf32>
    %390 = vector.extract_strided_slice %350 {offsets = [8, 0], sizes = [8, 32], strides = [1, 1]} : vector<32x128xf32> to vector<8x32xf32>
    %cst_133 = arith.constant dense<0.000000e+00> : vector<8x32xf32>
    %391 = tpu.matmul %389, %390, %cst_133 {dimension_numbers = #tpu.dot_dimension_numbers<[1], [0], [0], [1], [0, 0, 1, 1], [], []>} : vector<8x8xf32>, vector<8x32xf32>, vector<8x32xf32> -> vector<8x32xf32>
    %392 = arith.addf %386, %391 : vector<8x32xf32>
    %393 = vector.extract_strided_slice %348 {offsets = [0, 48], sizes = [16, 8], strides = [1, 1]} : vector<16x128xf32> to vector<16x8xf32>
    %394 = vector.extract_strided_slice %379 {offsets = [16, 0], sizes = [8, 16], strides = [1, 1]} : vector<32x16xf32> to vector<8x16xf32>
    %cst_134 = arith.constant dense<0.000000e+00> : vector<8x8xf32>
    %395 = tpu.matmul %394, %393, %cst_134 {dimension_numbers = #tpu.dot_dimension_numbers<[1], [0], [0], [1], [0, 0, 1, 1], [], []>} : vector<8x16xf32>, vector<16x8xf32>, vector<8x8xf32> -> vector<8x8xf32>
    %396 = vector.extract_strided_slice %350 {offsets = [16, 0], sizes = [8, 32], strides = [1, 1]} : vector<32x128xf32> to vector<8x32xf32>
    %cst_135 = arith.constant dense<0.000000e+00> : vector<8x32xf32>
    %397 = tpu.matmul %395, %396, %cst_135 {dimension_numbers = #tpu.dot_dimension_numbers<[1], [0], [0], [1], [0, 0, 1, 1], [], []>} : vector<8x8xf32>, vector<8x32xf32>, vector<8x32xf32> -> vector<8x32xf32>
    %398 = arith.addf %392, %397 : vector<8x32xf32>
    %399 = vector.extract_strided_slice %348 {offsets = [0, 56], sizes = [16, 8], strides = [1, 1]} : vector<16x128xf32> to vector<16x8xf32>
    %400 = vector.extract_strided_slice %379 {offsets = [24, 0], sizes = [8, 16], strides = [1, 1]} : vector<32x16xf32> to vector<8x16xf32>
    %cst_136 = arith.constant dense<0.000000e+00> : vector<8x8xf32>
    %401 = tpu.matmul %400, %399, %cst_136 {dimension_numbers = #tpu.dot_dimension_numbers<[1], [0], [0], [1], [0, 0, 1, 1], [], []>} : vector<8x16xf32>, vector<16x8xf32>, vector<8x8xf32> -> vector<8x8xf32>
    %402 = vector.extract_strided_slice %350 {offsets = [24, 0], sizes = [8, 32], strides = [1, 1]} : vector<32x128xf32> to vector<8x32xf32>
    %cst_137 = arith.constant dense<0.000000e+00> : vector<8x32xf32>
    %403 = tpu.matmul %401, %402, %cst_137 {dimension_numbers = #tpu.dot_dimension_numbers<[1], [0], [0], [1], [0, 0, 1, 1], [], []>} : vector<8x8xf32>, vector<8x32xf32>, vector<8x32xf32> -> vector<8x32xf32>
    %404 = arith.addf %398, %403 : vector<8x32xf32>
    %405 = vector.extract_strided_slice %351 {offsets = [0, 0], sizes = [1, 32], strides = [1, 1]} : vector<1x128xf32> to vector<1x32xf32>
    %406 = vector.broadcast %405 : vector<1x32xf32> to vector<8x32xf32>
    %407 = arith.addf %404, %406 : vector<8x32xf32>
    %408 = arith.addf %407, %336 : vector<8x32xf32>
    %409 = vector.extract_strided_slice %352 {offsets = [0, 0], sizes = [1, 32], strides = [1, 1]} : vector<1x128xf32> to vector<1x32xf32>
    %410 = vector.extract_strided_slice %353 {offsets = [0, 0], sizes = [1, 32], strides = [1, 1]} : vector<1x128xf32> to vector<1x32xf32>
    %cst_138 = arith.constant dense<0.000000e+00> : vector<8xf32>
    %411 = vector.multi_reduction <add>, %408, %cst_138 [1] : vector<8x32xf32> to vector<8xf32>
    %412 = vector.shape_cast %411 : vector<8xf32> to vector<8x1xf32>
    %cst_139 = arith.constant 3.200000e+01 : f32
    %413 = vector.broadcast %cst_139 : f32 to vector<8x1xf32>
    %414 = arith.divf %412, %413 : vector<8x1xf32>
    %415 = vector.broadcast %414 : vector<8x1xf32> to vector<8x32xf32>
    %416 = arith.subf %408, %415 : vector<8x32xf32>
    %417 = arith.mulf %416, %416 : vector<8x32xf32>
    %cst_140 = arith.constant dense<0.000000e+00> : vector<8xf32>
    %418 = vector.multi_reduction <add>, %417, %cst_140 [1] : vector<8x32xf32> to vector<8xf32>
    %419 = vector.shape_cast %418 : vector<8xf32> to vector<8x1xf32>
    %cst_141 = arith.constant 3.200000e+01 : f32
    %420 = vector.broadcast %cst_141 : f32 to vector<8x1xf32>
    %421 = arith.divf %419, %420 : vector<8x1xf32>
    %422 = vector.broadcast %414 : vector<8x1xf32> to vector<8x32xf32>
    %423 = arith.subf %408, %422 : vector<8x32xf32>
    %cst_142 = arith.constant 9.99999974E-6 : f32
    %424 = vector.broadcast %cst_142 : f32 to vector<8x1xf32>
    %425 = arith.addf %421, %424 : vector<8x1xf32>
    %426 = math.rsqrt %425 : vector<8x1xf32>
    %427 = vector.broadcast %426 : vector<8x1xf32> to vector<8x32xf32>
    %428 = arith.mulf %423, %427 : vector<8x32xf32>
    %429 = vector.broadcast %409 : vector<1x32xf32> to vector<8x32xf32>
    %430 = arith.mulf %428, %429 : vector<8x32xf32>
    %431 = vector.broadcast %410 : vector<1x32xf32> to vector<8x32xf32>
    %432 = arith.addf %430, %431 : vector<8x32xf32>
    %433 = arith.mulf %432, %9 : vector<8x32xf32>
    %c11 = arith.constant 11 : index
    %c0_143 = arith.constant 0 : index
    %c0_144 = arith.constant 0 : index
    %434 = vector.load %arg7[%c11, %c0_143, %c0_144] : memref<12x32x128xf32, #tpu.memory_space<vmem>>, vector<1x32x128xf32>
    %435 = vector.shape_cast %434 : vector<1x32x128xf32> to vector<32x128xf32>
    %cst_145 = arith.constant dense<0.000000e+00> : vector<8x128xf32>
    %436 = tpu.matmul %433, %435, %cst_145 {dimension_numbers = #tpu.dot_dimension_numbers<[1], [0], [0], [1], [0, 0, 1, 1], [], []>} : vector<8x32xf32>, vector<32x128xf32>, vector<8x128xf32> -> vector<8x128xf32>
    %437 = vector.extract_strided_slice %245 {offsets = [9, 0], sizes = [1, 128], strides = [1, 1]} : vector<16x128xf32> to vector<1x128xf32>
    %438 = vector.broadcast %437 : vector<1x128xf32> to vector<8x128xf32>
    %439 = arith.addf %436, %438 : vector<8x128xf32>
    %cst_146 = arith.constant 0.000000e+00 : f32
    %440 = vector.broadcast %cst_146 : f32 to vector<8x128xf32>
    %441 = arith.maximumf %439, %440 : vector<8x128xf32>
    %442 = vector.extract_strided_slice %441 {offsets = [0, 0], sizes = [8, 64], strides = [1, 1]} : vector<8x128xf32> to vector<8x64xf32>
    %c1_147 = arith.constant 1 : index
    %c0_148 = arith.constant 0 : index
    %c0_149 = arith.constant 0 : index
    %443 = vector.load %arg8[%c1_147, %c0_148, %c0_149] : memref<2x64x32xf32, #tpu.memory_space<vmem>>, vector<1x64x32xf32>
    %444 = vector.shape_cast %443 : vector<1x64x32xf32> to vector<64x32xf32>
    %cst_150 = arith.constant dense<0.000000e+00> : vector<8x32xf32>
    %445 = tpu.matmul %442, %444, %cst_150 {dimension_numbers = #tpu.dot_dimension_numbers<[1], [0], [0], [1], [0, 0, 1, 1], [], []>} : vector<8x64xf32>, vector<64x32xf32>, vector<8x32xf32> -> vector<8x32xf32>
    %446 = vector.extract_strided_slice %245 {offsets = [10, 0], sizes = [1, 128], strides = [1, 1]} : vector<16x128xf32> to vector<1x128xf32>
    %447 = vector.extract_strided_slice %446 {offsets = [0, 0], sizes = [1, 32], strides = [1, 1]} : vector<1x128xf32> to vector<1x32xf32>
    %448 = vector.broadcast %447 : vector<1x32xf32> to vector<8x32xf32>
    %449 = arith.addf %445, %448 : vector<8x32xf32>
    %450 = arith.addf %449, %433 : vector<8x32xf32>
    %451 = vector.extract_strided_slice %245 {offsets = [11, 0], sizes = [1, 128], strides = [1, 1]} : vector<16x128xf32> to vector<1x128xf32>
    %452 = vector.extract_strided_slice %451 {offsets = [0, 0], sizes = [1, 32], strides = [1, 1]} : vector<1x128xf32> to vector<1x32xf32>
    %453 = vector.extract_strided_slice %245 {offsets = [12, 0], sizes = [1, 128], strides = [1, 1]} : vector<16x128xf32> to vector<1x128xf32>
    %454 = vector.extract_strided_slice %453 {offsets = [0, 0], sizes = [1, 32], strides = [1, 1]} : vector<1x128xf32> to vector<1x32xf32>
    %cst_151 = arith.constant dense<0.000000e+00> : vector<8xf32>
    %455 = vector.multi_reduction <add>, %450, %cst_151 [1] : vector<8x32xf32> to vector<8xf32>
    %456 = vector.shape_cast %455 : vector<8xf32> to vector<8x1xf32>
    %cst_152 = arith.constant 3.200000e+01 : f32
    %457 = vector.broadcast %cst_152 : f32 to vector<8x1xf32>
    %458 = arith.divf %456, %457 : vector<8x1xf32>
    %459 = vector.broadcast %458 : vector<8x1xf32> to vector<8x32xf32>
    %460 = arith.subf %450, %459 : vector<8x32xf32>
    %461 = arith.mulf %460, %460 : vector<8x32xf32>
    %cst_153 = arith.constant dense<0.000000e+00> : vector<8xf32>
    %462 = vector.multi_reduction <add>, %461, %cst_153 [1] : vector<8x32xf32> to vector<8xf32>
    %463 = vector.shape_cast %462 : vector<8xf32> to vector<8x1xf32>
    %cst_154 = arith.constant 3.200000e+01 : f32
    %464 = vector.broadcast %cst_154 : f32 to vector<8x1xf32>
    %465 = arith.divf %463, %464 : vector<8x1xf32>
    %466 = vector.broadcast %458 : vector<8x1xf32> to vector<8x32xf32>
    %467 = arith.subf %450, %466 : vector<8x32xf32>
    %cst_155 = arith.constant 9.99999974E-6 : f32
    %468 = vector.broadcast %cst_155 : f32 to vector<8x1xf32>
    %469 = arith.addf %465, %468 : vector<8x1xf32>
    %470 = math.rsqrt %469 : vector<8x1xf32>
    %471 = vector.broadcast %470 : vector<8x1xf32> to vector<8x32xf32>
    %472 = arith.mulf %467, %471 : vector<8x32xf32>
    %473 = vector.broadcast %452 : vector<1x32xf32> to vector<8x32xf32>
    %474 = arith.mulf %472, %473 : vector<8x32xf32>
    %475 = vector.broadcast %454 : vector<1x32xf32> to vector<8x32xf32>
    %476 = arith.addf %474, %475 : vector<8x32xf32>
    %477 = arith.mulf %476, %9 : vector<8x32xf32>
    %c0_156 = arith.constant 0 : index
    %c0_157 = arith.constant 0 : index
    %478 = vector.load %arg12[%c0_156, %c0_157] : memref<8x128xf32, #tpu.memory_space<vmem>>, vector<8x128xf32>
    %479 = vector.extract_strided_slice %478 {offsets = [0, 0], sizes = [1, 128], strides = [1, 1]} : vector<8x128xf32> to vector<1x128xf32>
    %480 = vector.extract_strided_slice %478 {offsets = [1, 0], sizes = [1, 1], strides = [1, 1]} : vector<8x128xf32> to vector<1x1xf32>
    %481 = vector.extract_strided_slice %478 {offsets = [2, 0], sizes = [1, 128], strides = [1, 1]} : vector<8x128xf32> to vector<1x128xf32>
    %c0_158 = arith.constant 0 : index
    %c0_159 = arith.constant 0 : index
    %482 = vector.load %arg10[%c0_158, %c0_159] : memref<32x128xf32, #tpu.memory_space<vmem>>, vector<32x128xf32>
    %cst_160 = arith.constant dense<0.000000e+00> : vector<8x128xf32>
    %483 = tpu.matmul %477, %482, %cst_160 {dimension_numbers = #tpu.dot_dimension_numbers<[1], [0], [0], [1], [0, 0, 1, 1], [], []>} : vector<8x32xf32>, vector<32x128xf32>, vector<8x128xf32> -> vector<8x128xf32>
    %484 = vector.broadcast %479 : vector<1x128xf32> to vector<8x128xf32>
    %485 = arith.addf %483, %484 : vector<8x128xf32>
    %cst_161 = arith.constant dense<0xFF800000> : vector<8xf32>
    %486 = vector.multi_reduction <maximumf>, %485, %cst_161 [1] : vector<8x128xf32> to vector<8xf32>
    %487 = vector.shape_cast %486 : vector<8xf32> to vector<8x1xf32>
    %488 = vector.broadcast %487 : vector<8x1xf32> to vector<8x128xf32>
    %489 = arith.subf %485, %488 : vector<8x128xf32>
    %490 = math.exp %489 : vector<8x128xf32>
    %cst_162 = arith.constant dense<0.000000e+00> : vector<8xf32>
    %491 = vector.multi_reduction <add>, %490, %cst_162 [1] : vector<8x128xf32> to vector<8xf32>
    %492 = vector.shape_cast %491 : vector<8xf32> to vector<8x1xf32>
    %493 = vector.broadcast %492 : vector<8x1xf32> to vector<8x128xf32>
    %494 = arith.divf %490, %493 : vector<8x128xf32>
    %c0_163 = arith.constant 0 : index
    %c0_164 = arith.constant 0 : index
    %c0_165 = arith.constant 0 : index
    %495 = vector.load %arg11[%c0_163, %c0_164, %c0_165] : memref<3x32x1xf32, #tpu.memory_space<vmem>>, vector<1x32x1xf32>
    %496 = vector.shape_cast %495 : vector<1x32x1xf32> to vector<32x1xf32>
    %cst_166 = arith.constant dense<0.000000e+00> : vector<8x1xf32>
    %497 = tpu.matmul %1, %496, %cst_166 {dimension_numbers = #tpu.dot_dimension_numbers<[1], [0], [0], [1], [0, 0, 1, 1], [], []>} : vector<8x32xf32>, vector<32x1xf32>, vector<8x1xf32> -> vector<8x1xf32>
    %c1_167 = arith.constant 1 : index
    %c0_168 = arith.constant 0 : index
    %c0_169 = arith.constant 0 : index
    %498 = vector.load %arg11[%c1_167, %c0_168, %c0_169] : memref<3x32x1xf32, #tpu.memory_space<vmem>>, vector<1x32x1xf32>
    %499 = vector.shape_cast %498 : vector<1x32x1xf32> to vector<32x1xf32>
    %cst_170 = arith.constant dense<0.000000e+00> : vector<8x1xf32>
    %500 = tpu.matmul %336, %499, %cst_170 {dimension_numbers = #tpu.dot_dimension_numbers<[1], [0], [0], [1], [0, 0, 1, 1], [], []>} : vector<8x32xf32>, vector<32x1xf32>, vector<8x1xf32> -> vector<8x1xf32>
    %501 = arith.addf %497, %500 : vector<8x1xf32>
    %c2_171 = arith.constant 2 : index
    %c0_172 = arith.constant 0 : index
    %c0_173 = arith.constant 0 : index
    %502 = vector.load %arg11[%c2_171, %c0_172, %c0_173] : memref<3x32x1xf32, #tpu.memory_space<vmem>>, vector<1x32x1xf32>
    %503 = vector.shape_cast %502 : vector<1x32x1xf32> to vector<32x1xf32>
    %cst_174 = arith.constant dense<0.000000e+00> : vector<8x1xf32>
    %504 = tpu.matmul %433, %503, %cst_174 {dimension_numbers = #tpu.dot_dimension_numbers<[1], [0], [0], [1], [0, 0, 1, 1], [], []>} : vector<8x32xf32>, vector<32x1xf32>, vector<8x1xf32> -> vector<8x1xf32>
    %505 = arith.addf %501, %504 : vector<8x1xf32>
    %506 = vector.broadcast %480 : vector<1x1xf32> to vector<8x1xf32>
    %507 = arith.addf %505, %506 : vector<8x1xf32>
    %cst_175 = arith.constant 0.000000e+00 : f32
    %508 = vector.broadcast %cst_175 : f32 to vector<8x1xf32>
    %509 = arith.subf %508, %507 : vector<8x1xf32>
    %510 = math.exp %509 : vector<8x1xf32>
    %cst_176 = arith.constant 1.000000e+00 : f32
    %511 = vector.broadcast %cst_176 : f32 to vector<8x1xf32>
    %512 = arith.addf %511, %510 : vector<8x1xf32>
    %cst_177 = arith.constant 1.000000e+00 : f32
    %513 = vector.broadcast %cst_177 : f32 to vector<8x1xf32>
    %514 = arith.divf %513, %512 : vector<8x1xf32>
    %515 = vector.extract_strided_slice %481 {offsets = [0, 0], sizes = [1, 1], strides = [1, 1]} : vector<1x128xf32> to vector<1x1xf32>
    %516 = vector.extract_strided_slice %379 {offsets = [0, 0], sizes = [8, 16], strides = [1, 1]} : vector<32x16xf32> to vector<8x16xf32>
    %517 = vector.broadcast %515 : vector<1x1xf32> to vector<8x16xf32>
    %518 = arith.mulf %517, %516 : vector<8x16xf32>
    %519 = vector.extract_strided_slice %481 {offsets = [0, 1], sizes = [1, 1], strides = [1, 1]} : vector<1x128xf32> to vector<1x1xf32>
    %520 = vector.extract_strided_slice %379 {offsets = [8, 0], sizes = [8, 16], strides = [1, 1]} : vector<32x16xf32> to vector<8x16xf32>
    %521 = vector.broadcast %519 : vector<1x1xf32> to vector<8x16xf32>
    %522 = arith.mulf %521, %520 : vector<8x16xf32>
    %523 = arith.addf %518, %522 : vector<8x16xf32>
    %524 = vector.extract_strided_slice %481 {offsets = [0, 2], sizes = [1, 1], strides = [1, 1]} : vector<1x128xf32> to vector<1x1xf32>
    %525 = vector.extract_strided_slice %379 {offsets = [16, 0], sizes = [8, 16], strides = [1, 1]} : vector<32x16xf32> to vector<8x16xf32>
    %526 = vector.broadcast %524 : vector<1x1xf32> to vector<8x16xf32>
    %527 = arith.mulf %526, %525 : vector<8x16xf32>
    %528 = arith.addf %523, %527 : vector<8x16xf32>
    %529 = vector.extract_strided_slice %481 {offsets = [0, 3], sizes = [1, 1], strides = [1, 1]} : vector<1x128xf32> to vector<1x1xf32>
    %530 = vector.extract_strided_slice %379 {offsets = [24, 0], sizes = [8, 16], strides = [1, 1]} : vector<32x16xf32> to vector<8x16xf32>
    %531 = vector.broadcast %529 : vector<1x1xf32> to vector<8x16xf32>
    %532 = arith.mulf %531, %530 : vector<8x16xf32>
    %533 = arith.addf %528, %532 : vector<8x16xf32>
    %534 = vector.broadcast %514 : vector<8x1xf32> to vector<8x128xf32>
    %535 = arith.mulf %534, %494 : vector<8x128xf32>
    %cst_178 = arith.constant 1.000000e+00 : f32
    %536 = vector.broadcast %cst_178 : f32 to vector<8x1xf32>
    %537 = arith.subf %536, %514 : vector<8x1xf32>
    %538 = vector.extract_strided_slice %533 {offsets = [0, 0], sizes = [8, 8], strides = [1, 1]} : vector<8x16xf32> to vector<8x8xf32>
    %539 = vector.broadcast %537 : vector<8x1xf32> to vector<8x8xf32>
    %540 = arith.mulf %539, %538 : vector<8x8xf32>
    %c0_179 = arith.constant 0 : index
    %c0_180 = arith.constant 0 : index
    %c0_181 = arith.constant 0 : index
    %541 = vector.load %arg6[%c0_179, %c0_180, %c0_181] : memref<1x8x1xi32, #tpu.memory_space<vmem>>, vector<1x8x1xi32>
    %542 = vector.shape_cast %541 : vector<1x8x1xi32> to vector<8x1xi32>
    %543 = tpu.iota {dimensions = array<i32: 1>} : vector<8x128xi32>
    %544 = vector.broadcast %542 : vector<8x1xi32> to vector<8x128xi32>
    %545 = arith.cmpi eq, %543, %544 : vector<8x128xi32>
    %546 = arith.extui %545 : vector<8x128xi1> to vector<8x128xi32>
    %547 = arith.sitofp %546 : vector<8x128xi32> to vector<8x128xf32>
    %cst_182 = arith.constant dense<0.000000e+00> : vector<8x128xf32>
    %548 = tpu.matmul %540, %547, %cst_182 {dimension_numbers = #tpu.dot_dimension_numbers<[1], [0], [0], [1], [0, 0, 1, 1], [], []>} : vector<8x8xf32>, vector<8x128xf32>, vector<8x128xf32> -> vector<8x128xf32>
    %549 = arith.addf %535, %548 : vector<8x128xf32>
    %cst_183 = arith.constant 9.99999996E-13 : f32
    %550 = vector.broadcast %cst_183 : f32 to vector<8x128xf32>
    %551 = arith.addf %549, %550 : vector<8x128xf32>
    %552 = math.log %551 : vector<8x128xf32>
    %c0_184 = arith.constant 0 : index
    %c0_185 = arith.constant 0 : index
    %c0_186 = arith.constant 0 : index
    %553 = vector.load %arg13[%c0_184, %c0_185, %c0_186] : memref<1x8x128xf32, #tpu.memory_space<vmem>>, vector<1x8x128xf32>
    %554 = vector.shape_cast %553 : vector<1x8x128xf32> to vector<8x128xf32>
    %555 = vector.shape_cast %552 : vector<8x128xf32> to vector<1x8x128xf32>
    tpu.vector_store %arg13[%c0_184, %c0_185, %c0_186], %555 {strides = array<i32>} : memref<1x8x128xf32, #tpu.memory_space<vmem>>, vector<1x8x128xf32>,
    return
  }
  func.func @transform_0(%arg0: i32) -> (i32, i32, i32) {
    %c0_i32 = arith.constant 0 : i32
    %c0_i32_0 = arith.constant 0 : i32
    %c0_i32_1 = arith.constant 0 : i32
    return %arg0, %c0_i32, %c0_i32_0 : i32, i32, i32
  }
  func.func @transform_1(%arg0: i32) -> (i32, i32, i32) {
    %c0_i32 = arith.constant 0 : i32
    %c0_i32_0 = arith.constant 0 : i32
    %c0_i32_1 = arith.constant 0 : i32
    return %arg0, %c0_i32, %c0_i32_0 : i32, i32, i32
  }
  func.func @transform_2(%arg0: i32) -> (i32, i32, i32) {
    %c0_i32 = arith.constant 0 : i32
    %c0_i32_0 = arith.constant 0 : i32
    %c0_i32_1 = arith.constant 0 : i32
    return %arg0, %c0_i32, %c0_i32_0 : i32, i32, i32
  }
  func.func @transform_3(%arg0: i32) -> (i32, i32, i32) {
    %c0_i32 = arith.constant 0 : i32
    %c0_i32_0 = arith.constant 0 : i32
    %c0_i32_1 = arith.constant 0 : i32
    return %arg0, %c0_i32, %c0_i32_0 : i32, i32, i32
  }
  func.func @transform_4(%arg0: i32) -> (i32, i32, i32) {
    %c0_i32 = arith.constant 0 : i32
    %c0_i32_0 = arith.constant 0 : i32
    %c0_i32_1 = arith.constant 0 : i32
    return %arg0, %c0_i32, %c0_i32_0 : i32, i32, i32
  }
  func.func @transform_5(%arg0: i32) -> (i32, i32, i32) {
    %c0_i32 = arith.constant 0 : i32
    %c0_i32_0 = arith.constant 0 : i32
    %c0_i32_1 = arith.constant 0 : i32
    return %arg0, %c0_i32, %c0_i32_0 : i32, i32, i32
  }
  func.func @transform_6(%arg0: i32) -> (i32, i32, i32) {
    %c0_i32 = arith.constant 0 : i32
    %c0_i32_0 = arith.constant 0 : i32
    %c0_i32_1 = arith.constant 0 : i32
    %c0_i32_2 = arith.constant 0 : i32
    return %c0_i32, %c0_i32_0, %c0_i32_1 : i32, i32, i32
  }
  func.func @transform_7(%arg0: i32) -> (i32, i32, i32) {
    %c0_i32 = arith.constant 0 : i32
    %c0_i32_0 = arith.constant 0 : i32
    %c0_i32_1 = arith.constant 0 : i32
    %c0_i32_2 = arith.constant 0 : i32
    return %c0_i32, %c0_i32_0, %c0_i32_1 : i32, i32, i32
  }
  func.func @transform_8(%arg0: i32) -> (i32, i32, i32) {
    %c0_i32 = arith.constant 0 : i32
    %c0_i32_0 = arith.constant 0 : i32
    %c0_i32_1 = arith.constant 0 : i32
    %c0_i32_2 = arith.constant 0 : i32
    return %c0_i32, %c0_i32_0, %c0_i32_1 : i32, i32, i32
  }
  func.func @transform_9(%arg0: i32) -> (i32, i32) {
    %c0_i32 = arith.constant 0 : i32
    %c0_i32_0 = arith.constant 0 : i32
    %c0_i32_1 = arith.constant 0 : i32
    return %c0_i32, %c0_i32_0 : i32, i32
  }
  func.func @transform_10(%arg0: i32) -> (i32, i32, i32) {
    %c0_i32 = arith.constant 0 : i32
    %c0_i32_0 = arith.constant 0 : i32
    %c0_i32_1 = arith.constant 0 : i32
    %c0_i32_2 = arith.constant 0 : i32
    return %c0_i32, %c0_i32_0, %c0_i32_1 : i32, i32, i32
  }
  func.func @transform_11(%arg0: i32) -> (i32, i32) {
    %c0_i32 = arith.constant 0 : i32
    %c0_i32_0 = arith.constant 0 : i32
    %c0_i32_1 = arith.constant 0 : i32
    return %c0_i32, %c0_i32_0 : i32, i32
  }
  func.func @transform_12(%arg0: i32) -> (i32, i32, i32) {
    %c0_i32 = arith.constant 0 : i32
    %c0_i32_0 = arith.constant 0 : i32
    %c0_i32_1 = arith.constant 0 : i32
    return %arg0, %c0_i32, %c0_i32_0 : i32, i32, i32
  }
}

</mosaic_0001>

<bundles_post_ra>
// kernel: tpu_custom_call.1
= control target key start
LH: loop header
LB: loop body
LE: loop exit
PB: predicated region body
PF: predicated region fallthrough
CT: control target
= control target key end

     0   :  { %s8722_s0 = inlined_call_operand.hbm [shape: f32[2,8,32], index: 0, kind: input, shape index: {}]   ;;  %s8723_s1 = inlined_call_operand.vmem [shape: f32[2,16,32], index: 1, kind: input, shape index: {}]   ;;  %s8724_s2 = inlined_call_operand.vmem [shape: f32[2,32,8], index: 2, kind: input, shape index: {}]   ;;  %s8725_s3 = inlined_call_operand.vmem [shape: f32[2,32,16], index: 3, kind: input, shape index: {}]   ;;  %s8726_s4 = inlined_call_operand.hbm [shape: f32[2,8,32], index: 4, kind: input, shape index: {}]   ;;  %s8727_s5 = inlined_call_operand.vmem [shape: s32[2,8,1], index: 5, kind: input, shape index: {}]   ;;  %s8728_s6 = inlined_call_operand.vmem [shape: f32[12,32,128], index: 6, kind: input, shape index: {}]   ;;  %s8729_s7 = inlined_call_operand.vmem [shape: f32[2,64,32], index: 7, kind: input, shape index: {}]   ;;  %s8730_s8 = inlined_call_operand.vmem [shape: f32[2,16,128], index: 8, kind: input, shape index: {}]   ;;  %s8731_s9 = inlined_call_operand.hbm [shape: f32[32,128], index: 9, kind: input, shape index: {}]   ;;  %s8732_s10 = inlined_call_operand.vmem [shape: f32[3,32,1], index: 10, kind: input, shape index: {}]   ;;  %s8733_s11 = inlined_call_operand.vmem [shape: f32[8,128], index: 11, kind: input, shape index: {}]   ;;  %s8734_s12 = inlined_call_operand.hbm [shape: f32[2,8,128], index: 12, kind: output, shape index: {}]  }
   0x1   :  { %8767 = sst [smem:[#allocation19_spill]] %s8722_s0 }
   0x2   :  { %8768 = sst [smem:[#allocation20_spill]] %s8723_s1 }
   0x3   :  { %8769 = sst [smem:[#allocation21_spill]] %s8727_s5 }
   0x4   :  { %8770 = sst [smem:[#allocation22_spill]] %s8731_s9 }
   0x5   :  { %8771 = sst [smem:[#allocation23_spill]] %s8734_s12 }
   0x6   :  { %17 = vsyncpa [#allocation3], 0 }
   0x7   :  { %19 = vsyncpa [#allocation3 + $0x1], 0 }
   0x8   :  { %20 = vsyncpa [#allocation6], 0 }
   0x9   :  { %22 = vsyncpa [#allocation6 + $0x1], 0 }
   0xa   :  { %23 = vsyncpa [#allocation4], 0 }
   0xb   :  { %25 = vsyncpa [#allocation4 + $0x1], 0  ;;  %s7612_s21 = smov 0   ;;  %s7614_s22 = smov 0  }
   0xc   :  { %s7616_s23 = smov 0   ;;  %s7618_s24 = smov 0  }
   0xd LB: > { %8772 = sst [smem:[#allocation13_spill]] %s7508_s21  ;;  %s7633_s25 = sadd.s32 4294967295, %s7520_s24   ;;  %s7520_s24 = sphi %s7618_s24, %s8817_s24   ;;  %s7516_s23 = sphi %s7616_s23, %s8822_s23   ;;  %s7512_s22 = sphi %s7614_s22, %s8821_s22   ;;  %s7508_s21 = sphi %s7612_s21, %s8820_s21  }
   0xe   : > { %8773 = sst [smem:[#allocation14_spill]] %s7516_s23  ;;  %s6121_s26 = sadd.s32 4294967294, %s7520_s24  }
   0xf   : > { %p51_p0 = scmp.ne.s32.totalorder %s7512_s22, %s7508_s21  ;;  %p8739_p1 = scmp.eq.s32.totalorder %s7633_s25, 0 }
  0x10   : > { %p337_p3 = scmp.eq.s32.totalorder %s6121_s26, 1  ;;  %p6122_p5 = scmp.ge.s32.totalorder %s7520_s24, 1 }
  0x11   : > { %p7642_p4 = por %p8739_p1, %p51_p0  ;;  %p344_p7 = scmp.lt.s32.totalorder %s7520_s24, 3 }
  0x12   : > { %p7647_p6 = por %p337_p3, %p51_p0  ;;  %s7522_s30 = smov [#allocation7]  }
  0x13   : > { %s8774_s27 = scalar_select %p7642_p4, 1, 0 }
  0x14   : > { %s8775_s28 = scalar_select %p7647_p6, 1, 0 }
  0x15   : > { %p7652_p8 = pnand %p6122_p5, %p344_p7  ;;  %s365_s13 = sshll.u32 %s7522_s30, 4  ;;  %s7656_s13 = int_to_ptr.vmem [resolvable:$true] %s365_s13 }
  0x16   : > { %8776 = sst [smem:[#allocation15_spill]] %s8775_s28  ;;  %s7668_s15 = sadd.s32 1, %s7520_s24  }
  0x17   : > { %s8777_s29 = scalar_select %p7652_p8, 1, 0 }
  0x18   : > { %p7116_p9 = pneg %p7652_p8  ;;  %8779 = sst [smem:[#allocation16_spill]] %s7668_s15 }
  0x19   : > { %s38_s16 = sadd.s32 1, %s7516_s23  ;;  %s35_s17 = ssub.s32 %s7520_s24, %s7668_s15 }
  0x1a   : > { %p7663_p11 = pnand %p7116_p9, %p8739_p1  ;;  %s8780_s9 = sld [smem:[#allocation22_spill]] }
  0x1c   : > { %p7360_p13 = pneg %p7663_p11 }
  0x20   : > { %s7358_s20 = scalar_lea.hbm %s8780_s9, 512 }
  0x21   : > { %p7359_p12 = scmp.ne.s32.totalorder %s8780_s9, %s7358_s20  ;;  %p7365_p5 = scmp.lt.u32.totalorder %s7358_s20, %s8780_s9 }
  0x23   : > { %p7361_p0 = pnand %p7360_p13, %p7359_p12 }
  0x25   : > { %p7362_p3 = pneg %p7361_p0 }
  0x27   : > { %p7367_p7 = pnand %p7365_p5, %p7362_p3 }
  0x29   : > { %7370 = shalt.err (!%p7367_p7)
}
  0x2a   : > { %s7371_s15 = scalar_lea.vmem %s7656_s13, 512  ;;  %p7379_p2 = scmp.lt.s32.totalorder %s7656_s13, %s7656_s13 }
  0x2b   : > { %p7372_p9 = scmp.ne.s32.totalorder %s7656_s13, %s7371_s15  ;;  %p7380_p6 = scmp.lt.s32.totalorder %s7371_s15, %s7371_s15 }
  0x2d   : > { %p7374_p10 = pnand %p7372_p9, %p7360_p13  ;;  %p7381_p4 = por %p7380_p6, %p7379_p2 }
  0x2f   : > { %p7375_p1 = pneg %p7374_p10 }
  0x31   : > { %p7382_p8 = pnand %p7381_p4, %p7375_p1 }
  0x33   : > { %7385 = shalt.err (!%p7382_p8)
}
  0x34   : > { %s7523_s18 = smov 128   ;;  %s7524_s21 = smov 8  }
  0x35   : > { %7119 = dma.hbm_to_vmem [thread:$0]  (!%p7663_p11), %s8780_s9, 512, %s7656_s13, [#allocation6], %s7523_s18, %s7523_s18, %s7524_s21  }
  0x36   : > { %p36_p2 = scmp.eq.s32.totalorder %s35_s17, 0  ;;  %p45_p1 = scmp.ne.s32.totalorder %s7516_s23, %s7512_s22 }
  0x37   : > { %p46_p4 = scmp.eq.s32.totalorder %s7520_s24, 0  ;;  %p7132_p6 = scmp.lt.s32.totalorder %s7520_s24, 2 }
  0x38   : > { %s7699_s15 = scalar_select %p36_p2, %s7516_s23, %s38_s16  }
  0x39   : > { %p47_p8 = por %p46_p4, %p45_p1  ;;  %p8782_p10 = scmp.eq.s32.totalorder %s7633_s25, 1 }
  0x3a   : > { %8781 = sst [smem:[#allocation17_spill]] %s7699_s15  ;;  %s385_s26 = sand.u32 1, %s7516_s23  }
  0x3b   : > { %p7703_p12 = por %p8782_p10, %p45_p1  ;;  %s6126_s30 = sshll.u32 %s7520_s24, 7 }
  0x3c   : > { %s7709_s12 = sshll.u32 %s385_s26, 3  ;;  %s8785_s0 = sld [smem:[#allocation19_spill]] }
  0x3d   : > { %s8783_s20 = scalar_select %p7703_p12, 1, 0 }
  0x3e   : > { %s389_s16 = scalar_lea.vmem [#allocation2], %s7709_s12  ;;  %p7717_p11 = pnand %p7132_p6, %p47_p8 }
  0x3f   : > { %8784 = sst [smem:[#allocation18_spill]] %s8783_s20  ;;  %s396_s17 = sshll.u32 %s389_s16, 4  ;;  %s7721_s17 = int_to_ptr.vmem [resolvable:$true] %s396_s17 }
  0x40   : > { %s7726_s5 = scalar_lea.hbm %s8726_s4, %s6126_s30  ;;  %s386_s19 = scalar_lea.sflag [#allocation3], %s385_s26 }
  0x41   : > { %p7388_p0 = pneg %p7717_p11 }
  0x42   : > { %s7714_s13 = scalar_lea.hbm %s8785_s0, %s6126_s30  ;;  %s7391_s15 = scalar_lea.hbm %s8785_s0, 256 }
  0x43   : > { %s7386_s14 = scalar_lea.hbm %s7714_s13, 128  ;;  %p7392_p7 = scmp.lt.u32.totalorder %s7714_s13, %s8785_s0 }
  0x44   : > { %p7387_p13 = scmp.ne.s32.totalorder %s7714_s13, %s7386_s14  ;;  %p7393_p9 = scmp.lt.u32.totalorder %s7391_s15, %s7386_s14 }
  0x45   : > { %p7395_p1 = scmp.lt.u32.totalorder %s7386_s14, %s7714_s13 }
  0x46   : > { %p7389_p3 = pnand %p7388_p0, %p7387_p13  ;;  %p7394_p2 = por %p7393_p9, %p7392_p7 }
  0x48   : > { %p7390_p5 = pneg %p7389_p3  ;;  %p7396_p4 = por %p7395_p1, %p7394_p2 }
  0x4a   : > { %p7397_p6 = pnand %p7396_p4, %p7390_p5 }
  0x4c   : > { %7400 = shalt.err (!%p7397_p6)
}
  0x4d   : > { %s7401_s26 = scalar_lea.vmem %s7721_s17, 128  ;;  %s7525_s9 = smov [#allocation2]  }
  0x4e   : > { %p7402_p8 = scmp.ne.s32.totalorder %s7721_s17, %s7401_s26  ;;  %s7406_s30 = sshll.u32 %s7525_s9, 4  ;;  %s7407_s30 = int_to_ptr.vmem [resolvable:$false] %s7406_s30 }
  0x4f   : > { %s7408_s23 = scalar_lea.vmem %s7407_s30, 256  ;;  %p7409_p3 = scmp.lt.s32.totalorder %s7721_s17, %s7407_s30 }
  0x50   : > { %p7404_p10 = pnand %p7402_p8, %p7388_p0  ;;  %p7410_p7 = scmp.lt.s32.totalorder %s7408_s23, %s7401_s26 }
  0x52   : > { %p7405_p13 = pneg %p7404_p10  ;;  %p7411_p9 = por %p7410_p7, %p7409_p3 }
  0x54   : > { %p7412_p2 = pnand %p7411_p9, %p7405_p13 }
  0x56   : > { %7415 = shalt.err (!%p7412_p2)
}
  0x57   : > { %7123 = dma.hbm_to_vmem [thread:$0]  (!%p7717_p11), %s7714_s13, 128, %s7721_s17, %s386_s19  }
  0x58   : > { %s427_s15 = sand.u32 1, %s7520_s24   ;;  %s431_s20 = scalar_lea.vmem [#allocation5], %s7709_s12 }
  0x59   : > { %s438_s21 = sshll.u32 %s431_s20, 4  ;;  %s428_s28 = scalar_lea.sflag [#allocation6], %s427_s15  ;;  %s439_s21 = int_to_ptr.vmem [resolvable:$true] %s438_s21 }
  0x5a   : > { %s7416_s14 = scalar_lea.hbm %s7726_s5, 128  ;;  %s7421_s9 = scalar_lea.hbm %s8726_s4, 256 }
  0x5b   : > { %p7417_p5 = scmp.ne.s32.totalorder %s7726_s5, %s7416_s14  ;;  %p7422_p6 = scmp.lt.u32.totalorder %s7726_s5, %s8726_s4 }
  0x5c   : > { %p7423_p8 = scmp.lt.u32.totalorder %s7421_s9, %s7416_s14  ;;  %p7425_p13 = scmp.lt.u32.totalorder %s7416_s14, %s7726_s5 }
  0x5d   : > { %p7419_p1 = pnand %p7417_p5, %p7388_p0 }
  0x5e   : > { %p7424_p10 = por %p7423_p8, %p7422_p6 }
  0x5f   : > { %p7420_p4 = pneg %p7419_p1 }
  0x60   : > { %p7426_p3 = por %p7425_p13, %p7424_p10 }
  0x62   : > { %p7427_p7 = pnand %p7426_p3, %p7420_p4 }
  0x64   : > { %7430 = shalt.err (!%p7427_p7)
}
  0x65   : > { %s7431_s12 = scalar_lea.vmem %s439_s21, 128  ;;  %s7526_s13 = smov [#allocation5]  }
  0x66   : > { %p7432_p9 = scmp.ne.s32.totalorder %s439_s21, %s7431_s12  ;;  %s7436_s17 = sshll.u32 %s7526_s13, 4  ;;  %s7437_s17 = int_to_ptr.vmem [resolvable:$false] %s7436_s17 }
  0x67   : > { %s7438_s19 = scalar_lea.vmem %s7437_s17, 256  ;;  %p7439_p1 = scmp.lt.s32.totalorder %s439_s21, %s7437_s17 }
  0x68   : > { %p7434_p2 = pnand %p7432_p9, %p7388_p0  ;;  %p7440_p12 = scmp.lt.s32.totalorder %s7438_s19, %s7431_s12 }
  0x6a   : > { %p7435_p5 = pneg %p7434_p2  ;;  %p7441_p6 = por %p7440_p12, %p7439_p1 }
  0x6c   : > { %p7442_p8 = pnand %p7441_p6, %p7435_p5 }
  0x6e   : > { %7445 = shalt.err (!%p7442_p8)
}
  0x6f   : > { %7126 = dma.hbm_to_vmem [thread:$0]  (!%p7717_p11), %s7726_s5, 128, %s439_s21, %s428_s28  }
  0x70   : > { %p8787_p4 = scmp.ne.s32.totalorder %s8777_s29, 0 }
  0x71   : > { %s7777_s15 = sand.u32 (!%p8787_p4), 1, %s7512_s22   ;;  %p8788_p12 = scmp.ne.s32.totalorder (!%p8787_p4), %s8774_s27, 0 }
  0x72   : > { %454 = sbr.rel (%p8787_p4) target bundleno = 9585 (0x2571), region = 68  ;;  %s7780_s20 = sshll.u32 (!%p8787_p4), %s7777_s15, 3 }
  0x73   : > { %s457_s14 = scalar_lea.sflag (!%p8787_p4), [#allocation3], %s7777_s15  ;;  %s8747_s16 = scalar_lea.vmem (!%p8787_p4), [#allocation2], %s7780_s20 }
  0x79   : > { %7491 = dma.done.wait (%p8788_p12), %s457_s14, 128  }
  0x7a   : > { %7493 = vsyncadd (%p8788_p12), %s457_s14, 4294967168  ;;  %s465_s29 = sand.u32 1, %s7633_s25  }
  0x7b   : > { %s466_s18 = scalar_lea.sflag [#allocation6], %s465_s29 }
  0x7c   : > { %7495 = dma.done.wait (%p8788_p12), %s466_s18, 128  }
  0x7d   : > { %7497 = vsyncadd (%p8788_p12), %s466_s18, 4294967168  ;;  %p8789_p11 = scmp.eq.s32.totalorder %s7633_s25, 0 }
  0x7f   : > { %7499 = dma.done.wait (%p8789_p11), [#allocation6], 512   ;;  %p8790_p0 = pmov %p8789_p11 }
  0x80   : > { %v7527_v0 = vmov 0.0|0.0   ;;  %vm7528_vm0 = vmmov 0   ;;  %v7529_v1 = vmov 0.0   ;;  %v571_v2 = vld [vmem:[%s8728_s6] sm:$0xff]  ;;  %v572_v3 = vld [vmem:[%s8728_s6 + $0x8] sm:$0xff]  ;;  %v573_v4 = vld [vmem:[%s8728_s6 + $0x10] sm:$0xff]  ;;  %v575_v9 = vlaneseq }
  0x81   : > { %7501 = vsyncadd (%p8790_p0), [#allocation6], 4294966784  ;;  %6942 = vmatprep.subr.bf16.mxu0 %v7527_v0  ;;  %6503 = vmatprep.mubr.msk.f32.mxu0 %vm7528_vm0, %v7529_v1  ;;  %v6943_v5 = vpack.c.bf16 %v572_v3, %v571_v2  ;;  %v574_v6 = vld [vmem:[%s8728_s6 + $0x18] sm:$0xff]  ;;  %v7819_v8 = vld [vmem:[%s8747_s16] sm:$0xff]  ;;  %vm579_vm1 = vcmask 261120   ;;  %s8765_s19 = smov 120  }
  0x82   : > { %6506 = vmatprep.subr.mxu1 %v7529_v1  ;;  %6508 = vmatprep.mubr.msk.f32.mxu1 %vm7528_vm0, %v7529_v1  ;;  %v6946_v7 = vpack.c.bf16 %v574_v6, %v573_v4  ;;  %v7827_v10 = vshrl.u32 %v575_v9, 7  ;;  %v7835_v12 = vld [vmem:[%s8730_s8] sm:$0xff]  ;;  %s8756_s14 = smov 96   ;;  %s8754_s29 = smov 80   ;;  %vm661_vm2 = vcmask 64512   ;;  %vm2161_vm4 = vcmask 130048  }
  0x83   : > { %6944 = vmatpush3.bf16.msra.mxu0 %v6943_v5  ;;  %s8758_s18 = smov 88   ;;  %s8752_s27 = smov 72   ;;  %vm8030_vm3 = vmpackc.low %vm661_vm2, %vm661_vm2  ;;  %vm2941_vm5 = vcmask 523264  }
  0x84   : > { %6945 = vmatprep.subr.bf16.mxu0 %v7527_v0  ;;  %v7830_v11 = vsub.s32 0, %v7827_v10  ;;  %s8763_s21 = smov 112   ;;  %s8761_s28 = smov 104  }
  0x85   : > { %p538_p10 = scmp.lt.s32.totalorder %s7633_s25, 1  ;;  %s8751_s13 = smov 56  }
  0x86   : > { %v578_v13 = vrot.slane %v7835_v12, %v7830_v11  ;;  %s8750_s17 = smov 64   ;;  %s8749_s30 = smov 48  }
  0x87   : > { %6947 = vmatpush3.bf16.msra.mxu0 %v6946_v7  ;;  %s7878_s26 = scalar_select %p538_p10, %s7633_s25, 1 }
  0x88   : > { %6516 = vmatprep.subr.mxu0 %v7529_v1  ;;  %s8748_s23 = smov 40   ;;  %s8791_s1 = sld [smem:[#allocation20_spill]] }
  0x89   : > { %s8760_s9 = sshll.u32 %s7878_s26, 5  ;;  %s8802_s16 = smov 112  }
  0x8a   : > { %6504 = vmatmul.mubr.msk.f32.vlgmr.msra.gmra.mrb[0].mxu0 %vm579_vm1, %v7819_v8  ;;  %s7886_s12 = scalar_lea.vmem %s8724_s2, %s8760_s9  ;;  %s8799_s9 = smov 80  }
  0x8b   : > { %6518 = vmatprep.mubr.msk.f32.mxu0 %vm7528_vm0, %v7529_v1  ;;  %v561_v27 = vld [vmem:[%s7886_s12 + $0x8] sm:$0xff]  ;;  %v560_v33 = vld [vmem:[%s7886_s12] sm:$0xff]  ;;  %v562_v40 = vld [vmem:[%s7886_s12 + $0x10] sm:$0xff] }
  0x8c   : > { %v563_v44 = vld [vmem:[%s7886_s12 + $0x18] sm:$0xff] }
 0x15d   : > { %v649_v14 = vpop.f32.mrb[0].mxu0 }
 0x15e   : > { %v7839_v15 = vadd.f32 %v649_v14, %v578_v13  ;;  %v6505_v16 = vpop.f32.mrb[1].mxu0 }
 0x160   : > { %736 = vrot.lane.b32.xlu1 %v7839_v15, %s8765_s19  ;;  %659 = vrot.lane.b32.xlu0 %v7839_v15, %s8756_s14  ;;  %s8801_s14 = smov 120  }
 0x164   : > { %816 = vrot.lane.b32.xlu1 %v7839_v15, %s8754_s29  ;;  %738 = vrot.lane.b32.xlu0 %v7839_v15, %s8758_s18  ;;  %s6298_s29 = sshll.u32 %s7878_s26, 4  ;;  %s8797_s18 = smov 88  }
 0x168   : > { %894 = vrot.lane.b32.xlu1 %v7839_v15, %s8752_s27  ;;  %814 = vrot.lane.b32.xlu0 %v7839_v15, %s8763_s21  ;;  %s8798_s27 = smov 96  }
 0x16c   : > { %892 = vrot.lane.b32.xlu0 %v7839_v15, %s8761_s28  ;;  %s7972_s28 = scalar_lea.vmem %s8791_s1, %s6298_s29  ;;  %s8805_s1 = smov 48  }
 0x1d2   : > { %v737_v17 = vpop.permute.xlu1 %736  ;;  %v660_v18 = vpop.permute.xlu0 %659 }
 0x1d3   : > { %6507 = vmatpush3.xpose.msk.msra.mxu1 %vm661_vm2, %v660_v18 }
 0x1d4   : > { %6511 = vmatprep.subr.mxu1 %v7529_v1 }
 0x1d6   : > { %v817_v19 = vpop.permute.xlu1 %816  ;;  %6509 = vmatmul.mubr.msk.f32.vlgmr.msra.gmra.mrb[0].mxu1 %vm661_vm2, %v7839_v15  ;;  %v739_v20 = vpop.permute.xlu0 %738 }
 0x1d7   : > { %6512 = vmatpush3.xpose.msk.msra.mxu1 %vm661_vm2, %v739_v20  ;;  %6517 = vmatpush3.xpose.msk.msra.mxu0 %vm661_vm2, %v817_v19  ;;  %v6143_v19 = vld [vmem:[%s8728_s6 + $0x28] sm:$0xff]  ;;  %v6142_v20 = vld [vmem:[%s8728_s6 + $0x20] sm:$0xff] }
 0x1d8   : > { %6513 = vmatprep.mubr.msk.f32.mxu1 %vm7528_vm0, %v7529_v1  ;;  %6521 = vmatprep.subr.mxu1 %v7529_v1 }
 0x1d9   : > { %6526 = vmatprep.subr.mxu0 %v7529_v1 }
 0x1da   : > { %v895_v21 = vpop.permute.xlu1 %894  ;;  %6514 = vmatmul.mubr.msk.f32.vlgmr.msra.gmra.mrb[2].mxu1 %vm661_vm2, %v737_v17  ;;  %v815_v22 = vpop.permute.xlu0 %814 }
 0x1db   : > { %6519 = vmatmul.mubr.msk.f32.vlgmr.msra.gmra.mrb[2].mxu0 %vm661_vm2, %v815_v22  ;;  %6522 = vmatpush3.xpose.msk.msra.mxu1 %vm661_vm2, %v895_v21 }
 0x1dc   : > { %6523 = vmatprep.mubr.msk.f32.mxu1 %vm7528_vm0, %v7529_v1  ;;  %6531 = vmatprep.subr.mxu1 %v7529_v1 }
 0x1dd   : > { %6528 = vmatprep.mubr.msk.f32.mxu0 %vm7528_vm0, %v7529_v1 }
 0x1de   : > { %v893_v23 = vpop.permute.xlu0 %892 }
 0x1df   : > { %6524 = vmatmul.mubr.msk.f32.vlgmr.msra.gmra.mrb[4].mxu1 %vm661_vm2, %v893_v23 }
 0x1e0   : > { %6533 = vmatprep.mubr.msk.f32.mxu1 %vm7528_vm0, %v7529_v1 }
 0x2a9   : > { %v732_v24 = vpop.f32.mrb[0].mxu1 }
 0x2aa   : > { %v6510_v25 = vpop.f32.mrb[1].mxu1  ;;  %v970_v28 = vmul.f32 0.35355338, %v732_v24 }
 0x2ac   : > { %v974_v38 = vadd.f32 %v970_v28, %v560_v33  ;;  %v6144_v33 = vld [vmem:[%s8728_s6 + $0x30] sm:$0xff] }
 0x2ad   : > { %v810_v26 = vpop.f32.mrb[2].mxu1 }
 0x2ae   : > { %v971_v29 = vmul.f32 0.35355338, %v810_v26  ;;  %v6515_v30 = vpop.f32.mrb[3].mxu1  ;;  %v888_v31 = vpop.f32.mrb[2].mxu0  ;;  %v978_v42 = vsel %vm661_vm2, %v974_v38, -inf }
 0x2af   : > { %v6520_v32 = vpop.f32.mrb[3].mxu0  ;;  %v972_v35 = vmul.f32 0.35355338, %v888_v31 }
 0x2b0   : > { %v975_v34 = vadd.f32 %v971_v29, %v561_v27 }
 0x2b1   : > { %v976_v43 = vadd.f32 %v972_v35, %v562_v40 }
 0x2b2   : > { %v966_v36 = vpop.f32.mrb[4].mxu1  ;;  %v981_v37 = vsel %vm661_vm2, %v975_v34, -inf }
 0x2b3   : > { %982 = vmax.xlane.f32.xlu1 %v981_v37  ;;  %v6525_v39 = vpop.f32.mrb[5].mxu1  ;;  %v973_v41 = vmul.f32 0.35355338, %v966_v36  ;;  %v984_v45 = vsel %vm661_vm2, %v976_v43, -inf  ;;  %v6145_v36 = vld [vmem:[%s8728_s6 + $0x38] sm:$0xff] }
 0x2b5   : > { %v977_v46 = vadd.f32 %v973_v41, %v563_v44  ;;  %v7950_v44 = vsub.s32 1, %v7827_v10 }
 0x2b7   : > { %979 = vmax.xlane.f32.xlu1 %v978_v42  ;;  %v987_v47 = vsel %vm661_vm2, %v977_v46, -inf }
 0x2bb   : > { %985 = vmax.xlane.f32.xlu1 %v984_v45 }
 0x2bf   : > { %988 = vmax.xlane.f32.xlu1 %v987_v47 }
 0x340   : > { %v983_v48 = vpop.xlane.xlu1 %982 }
 0x341   : > { %v991_v49 = vsub.f32 %v975_v34, %v983_v48  ;;  %v1623_v48 = vrot.slane %v7835_v12, %v7950_v44 }
 0x343   : > { %v996_v50 = vmul.f32 1.442695, %v991_v49 }
 0x344   : > { %v980_v51 = vpop.xlane.xlu1 %979 }
 0x345   : > { %7261 = vpow2.f32 %v996_v50  ;;  %v990_v52 = vsub.f32 %v974_v38, %v980_v51 }
 0x347   : > { %v994_v53 = vmul.f32 1.442695, %v990_v52 }
 0x348   : > { %v986_v54 = vpop.xlane.xlu1 %985 }
 0x349   : > { %7263 = vpow2.f32 %v994_v53  ;;  %v992_v55 = vsub.f32 %v976_v43, %v986_v54 }
 0x34b   : > { %v998_v56 = vmul.f32 1.442695, %v992_v55  ;;  %v6167_v55 = vld [vmem:[%s8728_s6 + $0x60] sm:$0xff] }
 0x34c   : > { %v989_v57 = vpop.xlane.xlu1 %988 }
 0x34d   : > { %7265 = vpow2.f32 %v998_v56  ;;  %v993_v58 = vsub.f32 %v977_v46, %v989_v57  ;;  %v6168_v56 = vld [vmem:[%s8728_s6 + $0x68] sm:$0xff]  ;;  %v6169_v57 = vld [vmem:[%s8728_s6 + $0x70] sm:$0xff] }
 0x34f   : > { %v7262_v59 = vpop.eup %7261  ;;  %v1000_v60 = vmul.f32 1.442695, %v993_v58  ;;  %v6954_v58 = vpack.c.bf16 %v6168_v56, %v6167_v55 }
 0x350   : > { %v1005_v61 = vsel %vm661_vm2, %v7262_v59, 0.0 }
 0x351   : > { %7267 = vpow2.f32 %v1000_v60  ;;  %1006 = vadd.xlane.f32.xlu0 %v1005_v61  ;;  %v7975_v60 = vld [vmem:[%s7972_s28] sm:$0xff]  ;;  %v559_v61 = vld [vmem:[%s7972_s28 + $0x8] sm:$0xff] }
 0x353   : > { %v7264_v62 = vpop.eup %7263 }
 0x354   : > { %v1002_v63 = vsel %vm661_vm2, %v7264_v62, 0.0 }
 0x355   : > { %1003 = vadd.xlane.f32.xlu1 %v1002_v63 }
 0x357   : > { %v7266_v2 = vpop.eup %7265 }
 0x358   : > { %v1008_v3 = vsel %vm661_vm2, %v7266_v2, 0.0 }
 0x359   : > { %1009 = vadd.xlane.f32.xlu1 %v1008_v3 }
 0x35b   : > { %v7268_v4 = vpop.eup %7267 }
 0x35c   : > { %v1011_v5 = vsel %vm661_vm2, %v7268_v4, 0.0 }
 0x35d   : > { %1012 = vadd.xlane.f32.xlu1 %v1011_v5  ;;  %v6162_v5 = vld [vmem:[%s8728_s6 + $0x40] sm:$0xff] }
 0x367   : > { %1098 = vrot.lane.b32.xlu0 %v7839_v15, %s8751_s13  ;;  %s8800_s13 = smov 72  }
 0x36b   : > { %1022 = vrot.lane.b32.xlu0 %v7839_v15, %s8750_s17  ;;  %s8792_s17 = smov 104  }
 0x36e   : > { %1320 = vrot.lane.b32.xlu1 %v7839_v15, %s8749_s30  ;;  %s8793_s30 = scalar_lea.vmem [#allocation5], %s7780_s20 }
 0x36f   : > { %1470 = vrot.lane.b32.xlu0 %v7839_v15, %s8748_s23  ;;  %s8796_s23 = sshll.u32 %s7878_s26, 5 }
 0x370   : > { %s8075_s29 = scalar_lea.vmem %s8725_s3, %s8796_s23 }
 0x3de   : > { %v1007_v6 = vpop.xlane.xlu0 %1006 }
 0x3df   : > { %7269 = vrcp.f32 %v1007_v6  ;;  %v6163_v6 = vld [vmem:[%s8728_s6 + $0x48] sm:$0xff] }
 0x3e2   : > { %v1099_v7 = vpop.permute.xlu0 %1098  ;;  %v1004_v13 = vpop.xlane.xlu1 %1003 }
 0x3e3   : > { %7271 = vrcp.f32 %v1004_v13  ;;  %6532 = vmatpush3.msra.mxu1 %v1099_v7  ;;  %v6949_v7 = vpack.c.bf16 %v6163_v6, %v6162_v5  ;;  %v6164_v13 = vld [vmem:[%s8728_s6 + $0x50] sm:$0xff]  ;;  %v564_v6 = vld [vmem:[%s8075_s29] sm:$0xff] }
 0x3e4   : > { %6541 = vmatprep.subr.mxu1 %v7529_v1 }
 0x3e6   : > { %v1023_v14 = vpop.permute.xlu0 %1022  ;;  %v1010_v21 = vpop.xlane.xlu1 %1009 }
 0x3e7   : > { %6527 = vmatpush3.msra.mxu0 %v1023_v14  ;;  %7273 = vrcp.f32 %v1010_v21  ;;  %v6165_v14 = vld [vmem:[%s8728_s6 + $0x58] sm:$0xff] }
 0x3e8   : > { %6536 = vmatprep.subr.mxu0 %v7529_v1 }
 0x3e9   : > { %v7270_v16 = vpop.eup %7269 }
 0x3ea   : > { %v1019_v17 = vmul.f32 %v7270_v16, %v7262_v59  ;;  %v1013_v22 = vpop.xlane.xlu1 %1012  ;;  %v1471_v30 = vpop.permute.xlu0 %1470  ;;  %v6952_v16 = vpack.c.bf16 %v6165_v14, %v6164_v13 }
 0x3eb   : > { %7275 = vrcp.f32 %v1013_v22 }
 0x3ec   : > { %6534 = vmatmul.mubr.msk.f32.vlgmr.msra.gmra.mrb[6].mxu1 %vm661_vm2, %v1019_v17  ;;  %v1740_v17 = vsub.s32 5, %v7827_v10 }
 0x3ed   : > { %v7272_v18 = vpop.eup %7271  ;;  %6543 = vmatprep.mubr.msk.f32.mxu1 %vm7528_vm0, %v7529_v1  ;;  %6542 = vmatpush3.msra.mxu1 %v6142_v20 }
 0x3ee   : > { %v1018_v15 = vmul.f32 %v7272_v18, %v7264_v62  ;;  %6551 = vmatprep.subr.mxu1 %v7529_v1  ;;  %v1321_v25 = vpop.permute.xlu1 %1320  ;;  %v1741_v18 = vrot.slane %v7835_v12, %v1740_v17 }
 0x3f0   : > { %6529 = vmatmul.mubr.msk.f32.vlgmr.msra.gmra.mrb[4].mxu0 %vm661_vm2, %v1018_v15 }
 0x3f1   : > { %6537 = vmatpush3.msra.mxu0 %v6143_v19  ;;  %6538 = vmatprep.mubr.msk.f32.mxu0 %vm7528_vm0, %v7529_v1  ;;  %v7274_v23 = vpop.eup %7273 }
 0x3f2   : > { %6546 = vmatprep.subr.mxu0 %v7529_v1  ;;  %v1020_v27 = vmul.f32 %v7274_v23, %v7266_v2 }
 0x3f5   : > { %v7276_v28 = vpop.eup %7275 }
 0x3f6   : > { %v1021_v32 = vmul.f32 %v7276_v28, %v7268_v4 }
 0x4bf   : > { %v1170_v24 = vpop.f32.mrb[6].mxu1 }
 0x4c0   : > { %v6535_v26 = vpop.f32.mrb[7].mxu1  ;;  %6539 = vmatmul.mubr.msk.f32.vlgmr.msra.gmra.mrb[6].mxu0 %vm661_vm2, %v1170_v24 }
 0x4c1   : > { %6547 = vmatpush3.msra.mxu0 %v1321_v25  ;;  %6548 = vmatprep.mubr.msk.f32.mxu0 %vm7528_vm0, %v7529_v1  ;;  %v8012_v26 = vsub.s32 2, %v7827_v10 }
 0x4c2   : > { %6556 = vmatprep.subr.mxu0 %v7529_v1 }
 0x4c3   : > { %v1094_v29 = vpop.f32.mrb[4].mxu0  ;;  %v1643_v28 = vrot.slane %v7835_v12, %v8012_v26 }
 0x4c4   : > { %v6530_v31 = vpop.f32.mrb[5].mxu0  ;;  %6544 = vmatmul.mubr.msk.f32.vlgmr.msra.gmra.mrb[8].mxu1 %vm661_vm2, %v1094_v29  ;;  %6549 = vmatmul.mubr.msk.f32.vlgmr.msra.gmra.mrb[8].mxu0 %vm661_vm2, %v1020_v27  ;;  %v8015_v27 = vsub.s32 3, %v7827_v10 }
 0x4c5   : > { %6557 = vmatpush3.msra.mxu0 %v1471_v30  ;;  %6558 = vmatprep.mubr.msk.f32.mxu0 %vm7528_vm0, %v7529_v1 }
 0x4c6   : > { %6553 = vmatprep.mubr.msk.f32.mxu1 %vm7528_vm0, %v7529_v1  ;;  %6948 = vmatprep.subr.bf16.mxu0 %v7527_v0  ;;  %v1648_v31 = vrot.slane %v7835_v12, %v8015_v27 }
 0x4c7   : > { %6552 = vmatpush3.msra.mxu1 %v6144_v33  ;;  %v8023_v33 = vld [vmem:[%s8793_s30] sm:$0xff]  ;;  %s8803_s30 = smov 56  }
 0x4c8   : > { %6559 = vmatmul.mubr.msk.f32.vlgmr.msra.gmra.mrb[10].mxu0 %vm661_vm2, %v1021_v32  ;;  %6561 = vmatprep.subr.mxu1 %v7529_v1 }
 0x4c9   : > { %6574 = vmatprep.mubr.msk.f32.mxu0 %vm7528_vm0, %v7529_v1  ;;  %6950 = vmatpush3.bf16.msra.mxu0 %v6949_v7 }
 0x4ca   : > { %6951 = vmatprep.subr.bf16.mxu0 %v7527_v0 }
 0x4cd   : > { %6953 = vmatpush3.bf16.msra.mxu0 %v6952_v16 }
 0x4ce   : > { %6962 = vmatprep.subr.bf16.mxu0 %v7527_v0 }
 0x593   : > { %v1243_v34 = vpop.f32.mrb[6].mxu0 }
 0x594   : > { %v6540_v35 = vpop.f32.mrb[7].mxu0 }
 0x597   : > { %v1316_v37 = vpop.f32.mrb[8].mxu1  ;;  %v1392_v38 = vpop.f32.mrb[8].mxu0 }
 0x598   : > { %v1317_v39 = vadd.f32 %v1316_v37, %v1243_v34  ;;  %v6545_v40 = vpop.f32.mrb[9].mxu1  ;;  %v6550_v41 = vpop.f32.mrb[9].mxu0  ;;  %6554 = vmatmul.mubr.msk.f32.vlgmr.msra.gmra.mrb[10].mxu1 %vm661_vm2, %v1392_v38  ;;  %v7352_v37 = vld [vmem:[%s8075_s29 + $0x8] sm:$0xff] }
 0x599   : > { %6562 = vmatpush3.msra.mxu1 %v6145_v36  ;;  %6563 = vmatprep.mubr.msk.f32.mxu1 %vm7528_vm0, %v7529_v1 }
 0x59a   : > { %6955 = vmatprep.subr.bf16.mxu1 %v6954_v58 }
 0x59b   : > { %v1542_v42 = vpop.f32.mrb[10].mxu0 }
 0x59c   : > { %v6560_v43 = vpop.f32.mrb[11].mxu0  ;;  %6564 = vmatmul.mubr.msk.f32.vlgmr.msra.gmra.mrb[12].mxu1 %vm661_vm2, %v1542_v42  ;;  %v8045_v42 = vsub.s32 4, %v7827_v10 }
 0x59d   : > { %6585 = vmatprep.mubr.msk.f32.mxu1 %vm579_vm1, %v7975_v60  ;;  %6957 = vmatpush3.bf16.msra.mxu1 %v6954_v58 }
 0x66b   : > { %v1465_v45 = vpop.f32.mrb[10].mxu1 }
 0x66c   : > { %v1469_v46 = vadd.f32 %v1465_v45, %v1317_v39  ;;  %v6555_v47 = vpop.f32.mrb[11].mxu1  ;;  %v1659_v45 = vrot.slane %v7835_v12, %v8045_v42 }
 0x66f   : > { %v1615_v49 = vpop.f32.mrb[12].mxu1 }
 0x670   : > { %v1619_v50 = vadd.f32 %v1615_v49, %v1469_v46  ;;  %v6565_v51 = vpop.f32.mrb[13].mxu1 }
 0x672   : > { %v1624_v52 = vadd.f32 %v1623_v48, %v1619_v50 }
 0x674   : > { %v1625_v53 = vadd.f32 %v1624_v52, %v7819_v8  ;;  %v6170_v8 = vld [vmem:[%s8728_s6 + $0x78] sm:$0xff] }
 0x675   : > { %v6958_v59 = vpack.c.bf16 %v6170_v8, %v6169_v57 }
 0x676   : > { %v1626_v54 = vsel %vm579_vm1, %v1625_v53, 0.0 }
 0x677   : > { %1627 = vadd.xlane.f32.xlu0 %v1626_v54  ;;  %6959 = vmatprep.subr.bf16.mxu1 %v6958_v59 }
 0x678   : > { %6961 = vmatpush3.bf16.msra.mxu1 %v6958_v59 }
 0x679   : > { %6966 = vmatprep.subr.bf16.mxu1 %v7527_v0 }
 0x67b   : > { %6586 = vmatmul.mubr.msk.f32.vlgmr.msra.gmra.mrb[14].mxu1 %vm579_vm1, %v559_v61 }
 0x67c   : > { %6599 = vmatprep.mubr.msk.f32.mxu1 %vm7528_vm0, %v7529_v1 }
 0x704   : > { %v1628_v62 = vpop.xlane.xlu0 %1627 }
 0x705   : > { %v1630_v63 = vmul.f32 0.03125, %v1628_v62 }
 0x707   : > { %v1631_v2 = vsub.f32 %v1625_v53, %v1630_v63  ;;  %v565_v63 = vld [vmem:[%s8075_s29 + $0x8] sm:$0xff] }
 0x709   : > { %v1632_v3 = vmul.f32 %v1631_v2, %v1631_v2 }
 0x70b   : > { %v1633_v4 = vsel %vm579_vm1, %v1632_v3, 0.0 }
 0x70c   : > { %1634 = vadd.xlane.f32.xlu1 %v1633_v4 }
 0x74e   : > { %v6587_v15 = vpop.f32.mrb[14].mxu1 }
 0x74f   : > { %v1820_v19 = vadd.f32 %v6587_v15, %v1741_v18  ;;  %v1814_v20 = vpop.f32.mrb[15].mxu1 }
 0x750   : > { %v1815_v21 = vadd.f32 %v1814_v20, %v1741_v18  ;;  %v566_v18 = vld [vmem:[%s8075_s29 + $0x10] sm:$0xff] }
 0x752   : > { %v8003_v22 = vpack.i.bf16 %v1820_v19, %v1815_v21  ;;  %v6963_v35 = vpack.c.bf16 %v1820_v19, %v1815_v21 }
 0x754   : > { %7190 = vrot.lane.b32.xlu0 %v8003_v22, %s8765_s19 }
 0x758   : > { %7195 = vrot.lane.b32.xlu0 %v8003_v22, %s8763_s21 }
 0x75c   : > { %7200 = vrot.lane.b32.xlu0 %v8003_v22, %s8792_s17 }
 0x799   : > { %v1635_v23 = vpop.xlane.xlu1 %1634 }
 0x79a   : > { %v1636_v24 = vmul.f32 0.03125, %v1635_v23 }
 0x79c   : > { %v1637_v25 = vadd.f32 1e-05, %v1636_v24  ;;  %v567_v24 = vld [vmem:[%s8075_s29 + $0x18] sm:$0xff] }
 0x79e   : > { %7277 = vrsqrt.f32 %v1637_v25 }
 0x7a8   : > { %v7278_v29 = vpop.eup %7277 }
 0x7a9   : > { %v1639_v30 = vmul.f32 %v7278_v29, %v1631_v2 }
 0x7ab   : > { %v1644_v32 = vmul.f32 %v1643_v28, %v1639_v30 }
 0x7ad   : > { %v1649_v34 = vadd.f32 %v1648_v31, %v1644_v32 }
 0x7af   : > { %v8026_v36 = vmul.f32 %v1649_v34, %v8023_v33 }
 0x7b1   : > { %6575 = vmatmul.mubr.msk.f32.vlgmr.msra.gmra.mrb[12].mxu0 %vm579_vm1, %v8026_v36 }
 0x7b2   : > { %6965 = vmatpush3.bf16.xpose.msk.msra.mxu0 %vm8030_vm3, %v6963_v35  ;;  %6592 = vmatprep.mubr.msk.f32.mxu0 %vm7528_vm0, %v7529_v1 }
 0x7b3   : > { %6970 = vmatprep.subr.bf16.mxu0 %v7527_v0 }
 0x7c6   : > { %v7191_v38 = vpop.permute.xlu0 %7190 }
 0x7c7   : > { %v7193_v39 = vunpack.i.h.bf16 %v7191_v38  ;;  %v7192_v40 = vunpack.i.l.bf16 %v7191_v38 }
 0x7c9   : > { %v6967_v41 = vpack.c.bf16 %v7193_v39, %v7192_v40 }
 0x7ca   : > { %v7196_v43 = vpop.permute.xlu0 %7195 }
 0x7cb   : > { %6969 = vmatpush3.bf16.xpose.msk.msra.mxu1 %vm8030_vm3, %v6967_v41  ;;  %v7198_v46 = vunpack.i.h.bf16 %v7196_v43  ;;  %v7197_v47 = vunpack.i.l.bf16 %v7196_v43 }
 0x7cc   : > { %6974 = vmatprep.subr.bf16.mxu1 %v7527_v0 }
 0x7cd   : > { %v6971_v51 = vpack.c.bf16 %v7198_v46, %v7197_v47 }
 0x7ce   : > { %v7201_v52 = vpop.permute.xlu0 %7200 }
 0x7cf   : > { %v7203_v53 = vunpack.i.h.bf16 %v7201_v52  ;;  %v7202_v54 = vunpack.i.l.bf16 %v7201_v52 }
 0x7d1   : > { %v6975_v55 = vpack.c.bf16 %v7203_v53, %v7202_v54 }
 0x884   : > { %v1729_v48 = vpop.f32.mrb[12].mxu0 }
 0x885   : > { %v1730_v49 = vadd.f32 %v1729_v48, %v1659_v45  ;;  %v6576_v50 = vpop.f32.mrb[13].mxu0 }
 0x887   : > { %1989 = vrot.lane.b32.xlu0 %v1730_v49, %s8763_s21  ;;  %1907 = vrot.lane.b32.xlu1 %v1730_v49, %s8765_s19  ;;  %s8806_s21 = smov 40   ;;  %s8811_s19 = sld [smem:[#allocation23_spill]] }
 0x888   : > { %6593 = vmatmul.mubr.msk.f32.vlgmr.msra.gmra.mrb[14].mxu0 %vm661_vm2, %v1730_v49 }
 0x889   : > { %6973 = vmatpush3.bf16.xpose.msk.msra.mxu0 %vm8030_vm3, %v6971_v51  ;;  %6606 = vmatprep.mubr.msk.f32.mxu0 %vm7528_vm0, %v7529_v1 }
 0x88a   : > { %6978 = vmatprep.subr.bf16.mxu0 %v7527_v0 }
 0x88b   : > { %2071 = vrot.lane.b32.xlu0 %v1730_v49, %s8792_s17 }
 0x8f9   : > { %v1990_v56 = vpop.permute.xlu0 %1989  ;;  %v1908_v57 = vpop.permute.xlu1 %1907 }
 0x8fa   : > { %6600 = vmatmul.mubr.msk.f32.vlgmr.msra.gmra.mrb[16].mxu1 %vm661_vm2, %v1908_v57  ;;  %6607 = vmatmul.mubr.msk.f32.vlgmr.msra.gmra.mrb[16].mxu0 %vm661_vm2, %v1990_v56 }
 0x8fb   : > { %6977 = vmatpush3.bf16.xpose.msk.msra.mxu1 %vm8030_vm3, %v6975_v55  ;;  %6613 = vmatprep.mubr.msk.f32.mxu1 %vm7528_vm0, %v7529_v1 }
 0x8fc   : > { %6981 = vmatprep.subr.bf16.mxu1 %v7527_v0  ;;  %6620 = vmatprep.mubr.msk.f32.mxu0 %vm7528_vm0, %v7529_v1 }
 0x8fd   : > { %v2072_v58 = vpop.permute.xlu0 %2071 }
 0x902   : > { %6614 = vmatmul.mubr.msk.f32.vlgmr.msra.gmra.mrb[18].mxu1 %vm661_vm2, %v2072_v58 }
 0x903   : > { %6627 = vmatprep.mubr.msk.f32.mxu1 %vm7528_vm0, %v7529_v1 }
 0x95b   : > { %v1903_v8 = vpop.f32.mrb[14].mxu0 }
 0x95c   : > { %v6594_v59 = vpop.f32.mrb[15].mxu0  ;;  %v2153_v2 = vmul.f32 0.35355338, %v1903_v8 }
 0x95e   : > { %v2157_v16 = vadd.f32 %v2153_v2, %v564_v6  ;;  %v6174_v6 = vld [vmem:[%s8728_s6 + $0x88] sm:$0xff] }
 0x960   : > { %v2162_v21 = vsel %vm2161_vm4, %v2157_v16, -inf }
 0x9cd   : > { %v1985_v61 = vpop.f32.mrb[16].mxu1  ;;  %v2067_v62 = vpop.f32.mrb[16].mxu0 }
 0x9ce   : > { %v2154_v3 = vmul.f32 0.35355338, %v1985_v61  ;;  %v6601_v4 = vpop.f32.mrb[17].mxu1  ;;  %v6608_v5 = vpop.f32.mrb[17].mxu0  ;;  %v2155_v13 = vmul.f32 0.35355338, %v2067_v62 }
 0x9d0   : > { %v2158_v7 = vadd.f32 %v2154_v3, %v565_v63  ;;  %v2159_v23 = vadd.f32 %v2155_v13, %v566_v18 }
 0x9d2   : > { %v2165_v14 = vsel %vm2161_vm4, %v2158_v7, -inf  ;;  %v2168_v25 = vsel %vm2161_vm4, %v2159_v23, -inf }
 0x9d3   : > { %2166 = vmax.xlane.f32.xlu1 %v2165_v14 }
 0x9d5   : > { %v2149_v15 = vpop.f32.mrb[18].mxu1 }
 0x9d6   : > { %v2156_v19 = vmul.f32 0.35355338, %v2149_v15  ;;  %v6615_v20 = vpop.f32.mrb[19].mxu1 }
 0x9d7   : > { %2163 = vmax.xlane.f32.xlu1 %v2162_v21 }
 0x9d8   : > { %v2160_v28 = vadd.f32 %v2156_v19, %v567_v24 }
 0x9da   : > { %v2171_v29 = vsel %vm2161_vm4, %v2160_v28, -inf }
 0x9db   : > { %2169 = vmax.xlane.f32.xlu1 %v2168_v25 }
 0x9df   : > { %2172 = vmax.xlane.f32.xlu1 %v2171_v29 }
 0xa60   : > { %v2167_v30 = vpop.xlane.xlu1 %2166 }
 0xa61   : > { %v2175_v31 = vsub.f32 %v2158_v7, %v2167_v30  ;;  %v6173_v7 = vld [vmem:[%s8728_s6 + $0x80] sm:$0xff] }
 0xa63   : > { %v2180_v32 = vmul.f32 1.442695, %v2175_v31 }
 0xa64   : > { %v2164_v34 = vpop.xlane.xlu1 %2163 }
 0xa65   : > { %7279 = vpow2.f32 %v2180_v32  ;;  %v2174_v35 = vsub.f32 %v2157_v16, %v2164_v34 }
 0xa67   : > { %v2178_v38 = vmul.f32 1.442695, %v2174_v35 }
 0xa68   : > { %v2170_v39 = vpop.xlane.xlu1 %2169 }
 0xa69   : > { %7281 = vpow2.f32 %v2178_v38  ;;  %v2176_v40 = vsub.f32 %v2159_v23, %v2170_v39  ;;  %v6175_v38 = vld [vmem:[%s8728_s6 + $0x90] sm:$0xff] }
 0xa6b   : > { %v2182_v41 = vmul.f32 1.442695, %v2176_v40 }
 0xa6c   : > { %v2173_v43 = vpop.xlane.xlu1 %2172 }
 0xa6d   : > { %7283 = vpow2.f32 %v2182_v41  ;;  %v2177_v45 = vsub.f32 %v2160_v28, %v2173_v43  ;;  %v6176_v41 = vld [vmem:[%s8728_s6 + $0x98] sm:$0xff] }
 0xa6f   : > { %v7280_v46 = vpop.eup %7279  ;;  %v2184_v47 = vmul.f32 1.442695, %v2177_v45 }
 0xa70   : > { %v2189_v48 = vsel %vm2161_vm4, %v7280_v46, 0.0 }
 0xa71   : > { %7285 = vpow2.f32 %v2184_v47  ;;  %2190 = vadd.xlane.f32.xlu0 %v2189_v48 }
 0xa73   : > { %v7282_v49 = vpop.eup %7281 }
 0xa74   : > { %v2186_v50 = vsel %vm2161_vm4, %v7282_v49, 0.0 }
 0xa75   : > { %2187 = vadd.xlane.f32.xlu1 %v2186_v50 }
 0xa77   : > { %v7284_v51 = vpop.eup %7283 }
 0xa78   : > { %v2192_v52 = vsel %vm2161_vm4, %v7284_v51, 0.0 }
 0xa79   : > { %2193 = vadd.xlane.f32.xlu1 %v2192_v52 }
 0xa7b   : > { %v8088_v53 = vpop.eup %7285 }
 0xa7c   : > { %v2195_v54 = vsel %vm2161_vm4, %v8088_v53, 0.0 }
 0xa7d   : > { %2196 = vadd.xlane.f32.xlu1 %v2195_v54 }
 0xa87   : > { %7205 = vrot.lane.b32.xlu0 %v8003_v22, %s8797_s18 }
 0xa8b   : > { %7210 = vrot.lane.b32.xlu0 %v8003_v22, %s8798_s27 }
 0xa8e   : > { %7215 = vrot.lane.b32.xlu1 %v8003_v22, %s8799_s9 }
 0xa8f   : > { %7220 = vrot.lane.b32.xlu0 %v8003_v22, %s8800_s13 }
 0xafe   : > { %v2191_v55 = vpop.xlane.xlu0 %2190 }
 0xaff   : > { %7287 = vrcp.f32 %v2191_v55 }
 0xb02   : > { %v7206_v56 = vpop.permute.xlu0 %7205  ;;  %v2188_v57 = vpop.xlane.xlu1 %2187 }
 0xb03   : > { %v7208_v58 = vunpack.i.h.bf16 %v7206_v56  ;;  %v7207_v8 = vunpack.i.l.bf16 %v7206_v56  ;;  %7289 = vrcp.f32 %v2188_v57 }
 0xb05   : > { %v6982_v59 = vpack.c.bf16 %v7208_v58, %v7207_v8 }
 0xb06   : > { %v7211_v61 = vpop.permute.xlu0 %7210  ;;  %v2194_v13 = vpop.xlane.xlu1 %2193 }
 0xb07   : > { %v7213_v62 = vunpack.i.h.bf16 %v7211_v61  ;;  %v7212_v63 = vunpack.i.l.bf16 %v7211_v61  ;;  %6983 = vmatpush3.bf16.msra.mxu1 %v6982_v59  ;;  %7291 = vrcp.f32 %v2194_v13 }
 0xb08   : > { %6635 = vmatprep.subr.mxu1 %v7529_v1 }
 0xb09   : > { %v7288_v2 = vpop.eup %7287  ;;  %v6979_v3 = vpack.c.bf16 %v7213_v62, %v7212_v63 }
 0xb0a   : > { %v2203_v4 = vmul.f32 %v7288_v2, %v7280_v46  ;;  %v2197_v14 = vpop.xlane.xlu1 %2196  ;;  %v7221_v19 = vpop.permute.xlu0 %7220 }
 0xb0b   : > { %6980 = vmatpush3.bf16.msra.mxu0 %v6979_v3  ;;  %7293 = vrcp.f32 %v2197_v14  ;;  %v7223_v21 = vunpack.i.h.bf16 %v7221_v19  ;;  %v7222_v23 = vunpack.i.l.bf16 %v7221_v19  ;;  %v2929_v14 = vld [vmem:[%s8729_s7] sm:$0xff]  ;;  %v2932_v19 = vld [vmem:[%s8729_s7 + $0x18] sm:$0xff] }
 0xb0c   : > { %6628 = vmatmul.mubr.msk.f32.vlgmr.msra.gmra.mrb[20].mxu1 %vm2161_vm4, %v2203_v4  ;;  %6630 = vmatprep.subr.mxu0 %v7529_v1 }
 0xb0d   : > { %v7290_v22 = vpop.eup %7289  ;;  %6637 = vmatprep.mubr.msk.f32.mxu1 %vm7528_vm0, %v7529_v1  ;;  %6636 = vmatpush3.msra.mxu1 %v6173_v7  ;;  %v6988_v31 = vpack.c.bf16 %v7223_v21, %v7222_v23  ;;  %v6200_v7 = vld [vmem:[%s8728_s6 + $0xb8] sm:$0xff]  ;;  %v2933_v21 = vld [vmem:[%s8729_s7 + $0x20] sm:$0xff]  ;;  %v2934_v23 = vld [vmem:[%s8729_s7 + $0x28] sm:$0xff] }
 0xb0e   : > { %v2202_v5 = vmul.f32 %v7290_v22, %v7282_v49  ;;  %6647 = vmatprep.subr.mxu1 %v7529_v1  ;;  %v7216_v16 = vpop.permute.xlu1 %7215  ;;  %v6197_v22 = vld [vmem:[%s8728_s6 + $0xa0] sm:$0xff] }
 0xb0f   : > { %v7218_v18 = vunpack.i.h.bf16 %v7216_v16  ;;  %v7217_v15 = vunpack.i.l.bf16 %v7216_v16  ;;  %v2930_v16 = vld [vmem:[%s8729_s7 + $0x8] sm:$0xff] }
 0xb10   : > { %6621 = vmatmul.mubr.msk.f32.vlgmr.msra.gmra.mrb[18].mxu0 %vm2161_vm4, %v2202_v5  ;;  %v6198_v5 = vld [vmem:[%s8728_s6 + $0xa8] sm:$0xff] }
 0xb11   : > { %6631 = vmatpush3.msra.mxu0 %v6174_v6  ;;  %6632 = vmatprep.mubr.msk.f32.mxu0 %vm7528_vm0, %v7529_v1  ;;  %v7292_v20 = vpop.eup %7291  ;;  %v6985_v24 = vpack.c.bf16 %v7218_v18, %v7217_v15  ;;  %v6991_v6 = vpack.c.bf16 %v6198_v5, %v6197_v22  ;;  %v2931_v18 = vld [vmem:[%s8729_s7 + $0x10] sm:$0xff]  ;;  %v6997_v15 = vpack.c.bf16 %v2930_v16, %v2929_v14  ;;  %v6208_v22 = vld [vmem:[%s8728_s6 + $0xd8] sm:$0xff] }
 0xb12   : > { %6984 = vmatprep.subr.bf16.mxu0 %v7527_v0  ;;  %v2204_v29 = vmul.f32 %v7292_v20, %v7284_v51  ;;  %v2818_v51 = vsub.s32 6, %v7827_v10  ;;  %v7000_v20 = vpack.c.bf16 %v2932_v19, %v2931_v18 }
 0xb14   : > { %v2819_v55 = vrot.slane %v7835_v12, %v2818_v51 }
 0xb15   : > { %v7294_v30 = vpop.eup %7293 }
 0xb16   : > { %v2205_v35 = vmul.f32 %v7294_v30, %v8088_v53  ;;  %v2837_v30 = vsub.s32 7, %v7827_v10  ;;  %v6276_v10 = vld [vmem:[%s8729_s7 + $0x70] sm:$0xff] }
 0xbdf   : > { %v2360_v25 = vpop.f32.mrb[20].mxu1 }
 0xbe0   : > { %v6629_v28 = vpop.f32.mrb[21].mxu1  ;;  %6633 = vmatmul.mubr.msk.f32.vlgmr.msra.gmra.mrb[20].mxu0 %vm661_vm2, %v2360_v25 }
 0xbe1   : > { %6986 = vmatpush3.bf16.msra.mxu0 %v6985_v24  ;;  %6644 = vmatprep.mubr.msk.f32.mxu0 %vm7528_vm0, %v7529_v1  ;;  %v7003_v24 = vpack.c.bf16 %v2934_v23, %v2933_v21  ;;  %v8239_v21 = vld [vmem:[%s8730_s8 + $0x10] sm:$0xff] }
 0xbe2   : > { %6987 = vmatprep.subr.bf16.mxu0 %v7527_v0  ;;  %v3051_v23 = vrot.slane %v8239_v21, %v7830_v11 }
 0xbe3   : > { %v2281_v32 = vpop.f32.mrb[18].mxu0 }
 0xbe4   : > { %v6622_v34 = vpop.f32.mrb[19].mxu0  ;;  %6638 = vmatmul.mubr.msk.f32.vlgmr.msra.gmra.mrb[22].mxu1 %vm661_vm2, %v2281_v32  ;;  %6645 = vmatmul.mubr.msk.f32.vlgmr.msra.gmra.mrb[22].mxu0 %vm2161_vm4, %v2204_v29  ;;  %v2838_v32 = vrot.slane %v7835_v12, %v2837_v30  ;;  %v2936_v12 = vld [vmem:[%s8729_s7 + $0x38] sm:$0xff] }
 0xbe5   : > { %6989 = vmatpush3.bf16.msra.mxu0 %v6988_v31  ;;  %6656 = vmatprep.mubr.msk.f32.mxu0 %vm7528_vm0, %v7529_v1  ;;  %v570_v31 = vld [vmem:[%s8730_s8 + $0x8] sm:$0xff] }
 0xbe6   : > { %6649 = vmatprep.mubr.msk.f32.mxu1 %vm7528_vm0, %v7529_v1  ;;  %6990 = vmatprep.subr.bf16.mxu0 %v7527_v0  ;;  %v3037_v18 = vrot.slane %v570_v31, %v8045_v42 }
 0xbe7   : > { %6648 = vmatpush3.msra.mxu1 %v6175_v38  ;;  %v2843_v38 = vrot.slane %v570_v31, %v7830_v11 }
 0xbe8   : > { %6657 = vmatmul.mubr.msk.f32.vlgmr.msra.gmra.mrb[24].mxu0 %vm2161_vm4, %v2205_v35  ;;  %6659 = vmatprep.subr.mxu1 %v7529_v1 }
 0xbe9   : > { %6672 = vmatprep.mubr.msk.f32.mxu0 %vm7528_vm0, %v7529_v1  ;;  %6992 = vmatpush3.bf16.msra.mxu0 %v6991_v6 }
 0xbea   : > { %6993 = vmatprep.subr.bf16.mxu0 %v7527_v0 }
 0xcb3   : > { %v2433_v39 = vpop.f32.mrb[20].mxu0 }
 0xcb4   : > { %v6634_v40 = vpop.f32.mrb[21].mxu0 }
 0xcb7   : > { %v2506_v43 = vpop.f32.mrb[22].mxu1  ;;  %v2585_v45 = vpop.f32.mrb[22].mxu0 }
 0xcb8   : > { %v2507_v46 = vadd.f32 %v2506_v43, %v2433_v39  ;;  %v6639_v47 = vpop.f32.mrb[23].mxu1  ;;  %v6646_v48 = vpop.f32.mrb[23].mxu0  ;;  %6650 = vmatmul.mubr.msk.f32.vlgmr.msra.gmra.mrb[24].mxu1 %vm661_vm2, %v2585_v45  ;;  %v2935_v43 = vld [vmem:[%s8729_s7 + $0x30] sm:$0xff] }
 0xcb9   : > { %6660 = vmatpush3.msra.mxu1 %v6176_v41  ;;  %6661 = vmatprep.mubr.msk.f32.mxu1 %vm7528_vm0, %v7529_v1  ;;  %v7006_v45 = vpack.c.bf16 %v2936_v12, %v2935_v43  ;;  %v7347_v12 = vld [vmem:[%s7886_s12 + $0x8] sm:$0xff] }
 0xcba   : > { %6996 = vmatprep.subr.bf16.mxu1 %v7527_v0 }
 0xcbb   : > { %v2738_v49 = vpop.f32.mrb[24].mxu0 }
 0xcbc   : > { %v6658_v50 = vpop.f32.mrb[25].mxu0  ;;  %6662 = vmatmul.mubr.msk.f32.vlgmr.msra.gmra.mrb[26].mxu1 %vm661_vm2, %v2738_v49 }
 0xcbd   : > { %6691 = vmatprep.mubr.msk.f32.mxu1 %vm7528_vm0, %v7529_v1  ;;  %6998 = vmatpush3.bf16.msra.mxu1 %v6997_v15 }
 0xcbe   : > { %6999 = vmatprep.subr.bf16.mxu1 %v7527_v0 }
 0xcc1   : > { %7001 = vmatpush3.bf16.msra.mxu1 %v7000_v20 }
 0xcc2   : > { %7002 = vmatprep.subr.bf16.mxu1 %v7527_v0 }
 0xcc5   : > { %7004 = vmatpush3.bf16.msra.mxu1 %v7003_v24 }
 0xcc6   : > { %7005 = vmatprep.subr.bf16.mxu1 %v7527_v0 }
 0xcc9   : > { %7007 = vmatpush3.bf16.msra.mxu1 %v7006_v45 }
 0xcca   : > { %6710 = vmatprep.subr.mxu1 %v7529_v1 }
 0xd8b   : > { %v2658_v52 = vpop.f32.mrb[24].mxu1 }
 0xd8c   : > { %v2662_v53 = vadd.f32 %v2658_v52, %v2507_v46  ;;  %v6651_v54 = vpop.f32.mrb[25].mxu1  ;;  %v2854_v46 = vrot.slane %v570_v31, %v7950_v44  ;;  %v2940_v52 = vrot.slane %v570_v31, %v8012_v26 }
 0xd8f   : > { %v2811_v56 = vpop.f32.mrb[26].mxu1 }
 0xd90   : > { %v2815_v57 = vadd.f32 %v2811_v56, %v2662_v53  ;;  %v6663_v58 = vpop.f32.mrb[27].mxu1 }
 0xd92   : > { %v2820_v8 = vadd.f32 %v2819_v55, %v2815_v57 }
 0xd94   : > { %v2821_v59 = vadd.f32 %v2820_v8, %v8026_v36  ;;  %v6199_v36 = vld [vmem:[%s8728_s6 + $0xb0] sm:$0xff] }
 0xd95   : > { %v6994_v13 = vpack.c.bf16 %v6200_v7, %v6199_v36 }
 0xd96   : > { %v2822_v61 = vsel %vm579_vm1, %v2821_v59, 0.0 }
 0xd97   : > { %2823 = vadd.xlane.f32.xlu0 %v2822_v61  ;;  %6995 = vmatpush3.bf16.msra.mxu0 %v6994_v13  ;;  %v3032_v13 = vrot.slane %v570_v31, %v8015_v27 }
 0xd98   : > { %7008 = vmatprep.subr.bf16.mxu0 %v7527_v0 }
 0xe24   : > { %v2824_v62 = vpop.xlane.xlu0 %2823 }
 0xe25   : > { %v2825_v63 = vmul.f32 0.03125, %v2824_v62 }
 0xe27   : > { %v2826_v2 = vsub.f32 %v2821_v59, %v2825_v63  ;;  %v6205_v63 = vld [vmem:[%s8728_s6 + $0xc0] sm:$0xff] }
 0xe29   : > { %v2827_v3 = vmul.f32 %v2826_v2, %v2826_v2 }
 0xe2b   : > { %v2828_v4 = vsel %vm579_vm1, %v2827_v3, 0.0 }
 0xe2c   : > { %2829 = vadd.xlane.f32.xlu1 %v2828_v4  ;;  %v6207_v4 = vld [vmem:[%s8728_s6 + $0xd0] sm:$0xff] }
 0xe2d   : > { %v7012_v5 = vpack.c.bf16 %v6208_v22, %v6207_v4  ;;  %v7349_v4 = vld [vmem:[%s7886_s12 + $0x10] sm:$0xff] }
 0xeb9   : > { %v2830_v25 = vpop.xlane.xlu1 %2829 }
 0xeba   : > { %v2831_v28 = vmul.f32 0.03125, %v2830_v25 }
 0xebc   : > { %v2832_v29 = vadd.f32 1e-05, %v2831_v28 }
 0xebe   : > { %7295 = vrsqrt.f32 %v2832_v29 }
 0xec8   : > { %v7296_v34 = vpop.eup %7295 }
 0xec9   : > { %v2834_v35 = vmul.f32 %v7296_v34, %v2826_v2  ;;  %v6206_v2 = vld [vmem:[%s8728_s6 + $0xc8] sm:$0xff] }
 0xeca   : > { %v7009_v3 = vpack.c.bf16 %v6206_v2, %v6205_v63 }
 0xecb   : > { %v2839_v39 = vmul.f32 %v2838_v32, %v2834_v35 }
 0xecd   : > { %v2844_v40 = vadd.f32 %v2843_v38, %v2839_v39 }
 0xecf   : > { %v2845_v41 = vmul.f32 %v2844_v40, %v8023_v33 }
 0xed1   : > { %6673 = vmatmul.mubr.msk.f32.vlgmr.msra.gmra.mrb[26].mxu0 %vm579_vm1, %v2845_v41 }
 0xed2   : > { %6702 = vmatprep.mubr.msk.f32.mxu0 %vm7528_vm0, %v7529_v1  ;;  %7010 = vmatpush3.bf16.msra.mxu0 %v7009_v3 }
 0xed3   : > { %7011 = vmatprep.subr.bf16.mxu0 %v7527_v0 }
 0xed6   : > { %7013 = vmatpush3.bf16.msra.mxu0 %v7012_v5 }
 0xed7   : > { %6705 = vmatprep.subr.mxu0 %v7529_v1 }
 0xfa4   : > { %v2924_v47 = vpop.f32.mrb[26].mxu0 }
 0xfa5   : > { %v2925_v48 = vadd.f32 %v2924_v47, %v2854_v46  ;;  %v6674_v49 = vpop.f32.mrb[27].mxu0 }
 0xfa7   : > { %v2928_v50 = vmax.f32 %v2925_v48, 0.0 }
 0xfa9   : > { %6692 = vmatmul.mubr.msk.f32.vlgmr.msra.gmra.mrb[28].mxu1 %vm2941_vm5, %v2928_v50 }
 0xfaa   : > { %6712 = vmatprep.mubr.msk.f32.mxu1 %vm7528_vm0, %v7529_v1 }
0x107c   : > { %v3011_v53 = vpop.f32.mrb[28].mxu1 }
0x107d   : > { %v3012_v54 = vadd.f32 %v3011_v53, %v2940_v52  ;;  %v6693_v55 = vpop.f32.mrb[29].mxu1 }
0x107f   : > { %v3015_v56 = vadd.f32 %v3012_v54, %v2845_v41 }
0x1081   : > { %v3016_v57 = vsel %vm579_vm1, %v3015_v56, 0.0 }
0x1082   : > { %3017 = vadd.xlane.f32.xlu0 %v3016_v57 }
0x110f   : > { %v3018_v58 = vpop.xlane.xlu0 %3017 }
0x1110   : > { %v3019_v8 = vmul.f32 0.03125, %v3018_v58 }
0x1112   : > { %v3020_v59 = vsub.f32 %v3015_v56, %v3019_v8 }
0x1114   : > { %v3021_v61 = vmul.f32 %v3020_v59, %v3020_v59 }
0x1116   : > { %v3022_v62 = vsel %vm579_vm1, %v3021_v61, 0.0 }
0x1117   : > { %3023 = vadd.xlane.f32.xlu0 %v3022_v62  ;;  %v7348_v62 = vld [vmem:[%s7886_s12] sm:$0xff] }
0x11a4   : > { %v3024_v6 = vpop.xlane.xlu0 %3023 }
0x11a5   : > { %v3025_v36 = vmul.f32 0.03125, %v3024_v6  ;;  %v7350_v6 = vld [vmem:[%s7886_s12 + $0x18] sm:$0xff]  ;;  %s8804_s12 = smov 64  }
0x11a7   : > { %v3026_v7 = vadd.f32 1e-05, %v3025_v36 }
0x11a9   : > { %7297 = vrsqrt.f32 %v3026_v7 }
0x11b3   : > { %v7298_v14 = vpop.eup %7297 }
0x11b4   : > { %v3028_v16 = vmul.f32 %v7298_v14, %v3020_v59 }
0x11b6   : > { %v3033_v15 = vmul.f32 %v3032_v13, %v3028_v16 }
0x11b8   : > { %v3038_v19 = vadd.f32 %v3037_v18, %v3033_v15 }
0x11ba   : > { %v8230_v20 = vmul.f32 %v3038_v19, %v8023_v33 }
0x11bc   : > { %6703 = vmatmul.mubr.msk.f32.vlgmr.msra.gmra.mrb[28].mxu0 %vm579_vm1, %v8230_v20 }
0x11bd   : > { %6707 = vmatprep.mubr.msk.f32.mxu0 %vm7528_vm0, %v7529_v1 }
0x128f   : > { %v3121_v24 = vpop.f32.mrb[28].mxu0 }
0x1290   : > { %v8243_v25 = vadd.f32 %v3121_v24, %v3051_v23  ;;  %v6704_v28 = vpop.f32.mrb[29].mxu0 }
0x1292   : > { %3207 = vrot.lane.b32.xlu1 %v8243_v25, %s8801_s14  ;;  %3209 = vrot.lane.b32.xlu0 %v8243_v25, %s8797_s18 }
0x1296   : > { %3285 = vrot.lane.b32.xlu1 %v8243_v25, %s8802_s16  ;;  %3131 = vrot.lane.b32.xlu0 %v8243_v25, %s8798_s27 }
0x129a   : > { %3363 = vrot.lane.b32.xlu1 %v8243_v25, %s8792_s17  ;;  %3287 = vrot.lane.b32.xlu0 %v8243_v25, %s8799_s9 }
0x129e   : > { %3365 = vrot.lane.b32.xlu0 %v8243_v25, %s8800_s13 }
0x1304   : > { %v3210_v29 = vpop.permute.xlu0 %3209  ;;  %v3208_v31 = vpop.permute.xlu1 %3207 }
0x1305   : > { %6711 = vmatpush3.xpose.msk.msra.mxu1 %vm661_vm2, %v3210_v29 }
0x1306   : > { %6720 = vmatprep.subr.mxu1 %v7529_v1 }
0x1308   : > { %6713 = vmatmul.mubr.msk.f32.vlgmr.msra.gmra.mrb[30].mxu1 %vm661_vm2, %v3208_v31  ;;  %v3132_v32 = vpop.permute.xlu0 %3131  ;;  %v3286_v35 = vpop.permute.xlu1 %3285 }
0x1309   : > { %6706 = vmatpush3.xpose.msk.msra.mxu0 %vm661_vm2, %v3132_v32  ;;  %6722 = vmatprep.mubr.msk.f32.mxu1 %vm7528_vm0, %v7529_v1 }
0x130a   : > { %6715 = vmatprep.subr.mxu0 %v7529_v1 }
0x130c   : > { %6708 = vmatmul.mubr.msk.f32.vlgmr.msra.gmra.mrb[30].mxu0 %vm661_vm2, %v8243_v25  ;;  %v3288_v34 = vpop.permute.xlu0 %3287  ;;  %v3364_v39 = vpop.permute.xlu1 %3363 }
0x130d   : > { %6716 = vmatpush3.xpose.msk.msra.mxu0 %vm661_vm2, %v3288_v34  ;;  %6717 = vmatprep.mubr.msk.f32.mxu0 %vm7528_vm0, %v7529_v1 }
0x130e   : > { %6725 = vmatprep.subr.mxu0 %v7529_v1 }
0x1310   : > { %6718 = vmatmul.mubr.msk.f32.vlgmr.msra.gmra.mrb[32].mxu0 %vm661_vm2, %v3286_v35  ;;  %v3366_v38 = vpop.permute.xlu0 %3365 }
0x1311   : > { %6721 = vmatpush3.xpose.msk.msra.mxu1 %vm661_vm2, %v3366_v38  ;;  %6727 = vmatprep.mubr.msk.f32.mxu0 %vm7528_vm0, %v7529_v1 }
0x1312   : > { %6730 = vmatprep.subr.mxu1 %v7529_v1 }
0x1314   : > { %6723 = vmatmul.mubr.msk.f32.vlgmr.msra.gmra.mrb[32].mxu1 %vm661_vm2, %v3364_v39 }
0x1315   : > { %6732 = vmatprep.mubr.msk.f32.mxu1 %vm7528_vm0, %v7529_v1 }
0x13db   : > { %v3281_v40 = vpop.f32.mrb[30].mxu1 }
0x13dc   : > { %v3442_v41 = vmul.f32 0.35355338, %v3281_v40  ;;  %v6714_v43 = vpop.f32.mrb[31].mxu1 }
0x13de   : > { %v3446_v45 = vadd.f32 %v7347_v12, %v3442_v41 }
0x13df   : > { %v3203_v46 = vpop.f32.mrb[30].mxu0 }
0x13e0   : > { %v6709_v47 = vpop.f32.mrb[31].mxu0  ;;  %v3452_v48 = vsel %vm661_vm2, %v3446_v45, -inf  ;;  %v3441_v58 = vmul.f32 0.35355338, %v3203_v46 }
0x13e1   : > { %3453 = vmax.xlane.f32.xlu0 %v3452_v48  ;;  %v6211_v48 = vld [vmem:[%s8728_s6 + $0xe8] sm:$0xff] }
0x13e2   : > { %v3445_v63 = vadd.f32 %v7348_v62, %v3441_v58  ;;  %v6210_v58 = vld [vmem:[%s8728_s6 + $0xe0] sm:$0xff] }
0x13e3   : > { %v3359_v49 = vpop.f32.mrb[32].mxu0 }
0x13e4   : > { %v6719_v50 = vpop.f32.mrb[33].mxu0  ;;  %v3443_v59 = vmul.f32 0.35355338, %v3359_v49  ;;  %v3449_v3 = vsel %vm661_vm2, %v3445_v63, -inf }
0x13e6   : > { %v3447_v22 = vadd.f32 %v7349_v4, %v3443_v59 }
0x13e7   : > { %v3437_v52 = vpop.f32.mrb[32].mxu1 }
0x13e8   : > { %v6724_v53 = vpop.f32.mrb[33].mxu1  ;;  %v3444_v2 = vmul.f32 0.35355338, %v3437_v52  ;;  %v3455_v5 = vsel %vm661_vm2, %v3447_v22, -inf }
0x13ea   : > { %v3448_v36 = vadd.f32 %v7350_v6, %v3444_v2  ;;  %v6213_v2 = vld [vmem:[%s8728_s6 + $0xf8] sm:$0xff] }
0x13ec   : > { %v3458_v7 = vsel %vm661_vm2, %v3448_v36, -inf }
0x13f7   : > { %3569 = vrot.lane.b32.xlu0 %v8243_v25, %s8803_s30  ;;  %s5958_s30 = scalar_lea.sflag [#allocation4], %s7777_s15 }
0x146e   : > { %v3454_v54 = vpop.xlane.xlu0 %3453 }
0x146f   : > { %v3462_v55 = vsub.f32 %v3446_v45, %v3454_v54 }
0x1471   : > { %v3467_v56 = vmul.f32 1.442695, %v3462_v55 }
0x1472   : > { %v3570_v57 = vpop.permute.xlu0 %3569 }
0x1473   : > { %7299 = vpow2.f32 %v3467_v56  ;;  %6731 = vmatpush3.msra.mxu1 %v3570_v57 }
0x1474   : > { %6740 = vmatprep.subr.mxu1 %v7529_v1 }
0x147d   : > { %v7300_v8 = vpop.eup %7299 }
0x147e   : > { %v3476_v61 = vsel %vm661_vm2, %v7300_v8, 0.0 }
0x147f   : > { %3477 = vadd.xlane.f32.xlu1 %v3476_v61 }
0x1483   : > { %3450 = vmax.xlane.f32.xlu1 %v3449_v3 }
0x1487   : > { %3456 = vmax.xlane.f32.xlu1 %v3455_v5 }
0x148b   : > { %3459 = vmax.xlane.f32.xlu1 %v3458_v7 }
0x150c   : > { %v3478_v13 = vpop.xlane.xlu1 %3477 }
0x150d   : > { %7301 = vrcp.f32 %v3478_v13 }
0x1510   : > { %v3451_v14 = vpop.xlane.xlu1 %3450 }
0x1511   : > { %v3461_v16 = vsub.f32 %v3445_v63, %v3451_v14 }
0x1513   : > { %v3465_v18 = vmul.f32 1.442695, %v3461_v16 }
0x1514   : > { %v3457_v15 = vpop.xlane.xlu1 %3456 }
0x1515   : > { %7303 = vpow2.f32 %v3465_v18  ;;  %v3463_v19 = vsub.f32 %v3447_v22, %v3457_v15  ;;  %v4094_v18 = vrot.slane %v8239_v21, %v7950_v44 }
0x1517   : > { %v7302_v23 = vpop.eup %7301  ;;  %v3469_v24 = vmul.f32 1.442695, %v3463_v19 }
0x1518   : > { %v3490_v28 = vmul.f32 %v7302_v23, %v7300_v8  ;;  %v3460_v29 = vpop.xlane.xlu1 %3459  ;;  %v6212_v8 = vld [vmem:[%s8728_s6 + $0xf0] sm:$0xff] }
0x1519   : > { %7305 = vpow2.f32 %v3469_v24  ;;  %v3464_v31 = vsub.f32 %v3448_v36, %v3460_v29 }
0x151a   : > { %6733 = vmatmul.mubr.msk.f32.vlgmr.msra.gmra.mrb[34].mxu1 %vm661_vm2, %v3490_v28 }
0x151b   : > { %v3471_v32 = vmul.f32 1.442695, %v3464_v31  ;;  %6742 = vmatprep.mubr.msk.f32.mxu1 %vm7528_vm0, %v7529_v1  ;;  %6741 = vmatpush3.msra.mxu1 %v6210_v58 }
0x151c   : > { %6750 = vmatprep.subr.mxu1 %v7529_v1 }
0x151d   : > { %7307 = vpow2.f32 %v3471_v32 }
0x151f   : > { %v7304_v34 = vpop.eup %7303 }
0x1520   : > { %v3473_v35 = vsel %vm661_vm2, %v7304_v34, 0.0 }
0x1521   : > { %3474 = vadd.xlane.f32.xlu1 %v3473_v35 }
0x1523   : > { %v7306_v38 = vpop.eup %7305 }
0x1524   : > { %v3479_v39 = vsel %vm661_vm2, %v7306_v38, 0.0 }
0x1525   : > { %3480 = vadd.xlane.f32.xlu1 %v3479_v39  ;;  %v6236_v39 = vld [vmem:[%s8728_s6 + $0x128] sm:$0xff] }
0x1527   : > { %v7308_v40 = vpop.eup %7307 }
0x1528   : > { %v3482_v41 = vsel %vm661_vm2, %v7308_v40, 0.0 }
0x1529   : > { %3483 = vadd.xlane.f32.xlu0 %v3482_v41  ;;  %v6238_v41 = vld [vmem:[%s8728_s6 + $0x138] sm:$0xff] }
0x1536   : > { %3493 = vrot.lane.b32.xlu1 %v8243_v25, %s8804_s12  ;;  %s8808_s12 = scalar_lea.vmem [#allocation2], %s7780_s20 }
0x153a   : > { %3791 = vrot.lane.b32.xlu1 %v8243_v25, %s8805_s1 }
0x153e   : > { %3941 = vrot.lane.b32.xlu1 %v8243_v25, %s8806_s21 }
0x15ae   : > { %v3475_v43 = vpop.xlane.xlu1 %3474 }
0x15af   : > { %7309 = vrcp.f32 %v3475_v43 }
0x15b2   : > { %v3481_v12 = vpop.xlane.xlu1 %3480 }
0x15b3   : > { %7311 = vrcp.f32 %v3481_v12  ;;  %v7351_v12 = vld [vmem:[%s7972_s28 + $0x8] sm:$0xff]  ;;  %s8807_s28 = scalar_lea.vmem [#allocation5], %s7780_s20 }
0x15b6   : > { %v3494_v45 = vpop.permute.xlu1 %3493  ;;  %v3484_v25 = vpop.xlane.xlu0 %3483 }
0x15b7   : > { %6726 = vmatpush3.msra.mxu0 %v3494_v45  ;;  %7313 = vrcp.f32 %v3484_v25  ;;  %v6230_v45 = vld [vmem:[%s8728_s6 + $0x100] sm:$0xff]  ;;  %v6233_v25 = vld [vmem:[%s8728_s6 + $0x118] sm:$0xff] }
0x15b8   : > { %6735 = vmatprep.subr.mxu0 %v7529_v1 }
0x15b9   : > { %v7310_v46 = vpop.eup %7309 }
0x15ba   : > { %v3489_v47 = vmul.f32 %v7310_v46, %v7304_v34  ;;  %v3792_v49 = vpop.permute.xlu1 %3791  ;;  %v6231_v46 = vld [vmem:[%s8728_s6 + $0x108] sm:$0xff] }
0x15bc   : > { %6728 = vmatmul.mubr.msk.f32.vlgmr.msra.gmra.mrb[34].mxu0 %vm661_vm2, %v3489_v47  ;;  %v7015_v47 = vpack.c.bf16 %v6231_v46, %v6230_v45 }
0x15bd   : > { %6736 = vmatpush3.msra.mxu0 %v6211_v48  ;;  %6737 = vmatprep.mubr.msk.f32.mxu0 %vm7528_vm0, %v7529_v1  ;;  %v7312_v50 = vpop.eup %7311  ;;  %v6232_v48 = vld [vmem:[%s8728_s6 + $0x110] sm:$0xff] }
0x15be   : > { %6745 = vmatprep.subr.mxu0 %v7529_v1  ;;  %v3491_v54 = vmul.f32 %v7312_v50, %v7306_v38  ;;  %v3942_v56 = vpop.permute.xlu1 %3941  ;;  %v6235_v38 = vld [vmem:[%s8728_s6 + $0x120] sm:$0xff] }
0x15c1   : > { %v7314_v55 = vpop.eup %7313 }
0x15c2   : > { %v3492_v57 = vmul.f32 %v7314_v55, %v7308_v40  ;;  %v6237_v40 = vld [vmem:[%s8728_s6 + $0x130] sm:$0xff] }
0x15c3   : > { %v7024_v43 = vpack.c.bf16 %v6238_v41, %v6237_v40 }
0x15ed   : > { %v3641_v52 = vpop.f32.mrb[34].mxu1 }
0x15ee   : > { %v6734_v53 = vpop.f32.mrb[35].mxu1  ;;  %6738 = vmatmul.mubr.msk.f32.vlgmr.msra.gmra.mrb[36].mxu0 %vm661_vm2, %v3641_v52 }
0x15ef   : > { %6746 = vmatpush3.msra.mxu0 %v3792_v49  ;;  %6747 = vmatprep.mubr.msk.f32.mxu0 %vm7528_vm0, %v7529_v1  ;;  %v7018_v49 = vpack.c.bf16 %v6233_v25, %v6232_v48 }
0x15f0   : > { %6755 = vmatprep.subr.mxu0 %v7529_v1 }
0x15f2   : > { %6748 = vmatmul.mubr.msk.f32.vlgmr.msra.gmra.mrb[38].mxu0 %vm661_vm2, %v3491_v54  ;;  %v4113_v54 = vrot.slane %v8239_v21, %v8012_v26 }
0x15f3   : > { %6756 = vmatpush3.msra.mxu0 %v3942_v56  ;;  %6757 = vmatprep.mubr.msk.f32.mxu0 %vm7528_vm0, %v7529_v1 }
0x15f4   : > { %7014 = vmatprep.subr.bf16.mxu0 %v7527_v0 }
0x15f6   : > { %6758 = vmatmul.mubr.msk.f32.vlgmr.msra.gmra.mrb[40].mxu0 %vm661_vm2, %v3492_v57  ;;  %v4118_v57 = vrot.slane %v8239_v21, %v8015_v27 }
0x15f7   : > { %6773 = vmatprep.mubr.msk.f32.mxu0 %vm7528_vm0, %v7529_v1  ;;  %7016 = vmatpush3.bf16.msra.mxu0 %v7015_v47 }
0x15f8   : > { %7017 = vmatprep.subr.bf16.mxu0 %v7527_v0 }
0x15fb   : > { %7019 = vmatpush3.bf16.msra.mxu0 %v7018_v49 }
0x15fc   : > { %7028 = vmatprep.subr.bf16.mxu0 %v7527_v0 }
0x168f   : > { %v3565_v59 = vpop.f32.mrb[34].mxu0 }
0x1690   : > { %v6729_v61 = vpop.f32.mrb[35].mxu0  ;;  %6743 = vmatmul.mubr.msk.f32.vlgmr.msra.gmra.mrb[36].mxu1 %vm661_vm2, %v3565_v59 }
0x1691   : > { %6751 = vmatpush3.msra.mxu1 %v6212_v8  ;;  %6752 = vmatprep.mubr.msk.f32.mxu1 %vm7528_vm0, %v7529_v1  ;;  %v4211_v61 = vrot.slane %v8239_v21, %v1740_v17 }
0x1692   : > { %6760 = vmatprep.subr.mxu1 %v7529_v1 }
0x16c1   : > { %v3714_v62 = vpop.f32.mrb[36].mxu0 }
0x16c2   : > { %v6739_v63 = vpop.f32.mrb[37].mxu0 }
0x16c5   : > { %v3863_v3 = vpop.f32.mrb[38].mxu0 }
0x16c6   : > { %v6749_v4 = vpop.f32.mrb[39].mxu0  ;;  %6753 = vmatmul.mubr.msk.f32.vlgmr.msra.gmra.mrb[38].mxu1 %vm661_vm2, %v3863_v3 }
0x16c7   : > { %6761 = vmatpush3.msra.mxu1 %v6213_v2  ;;  %6762 = vmatprep.mubr.msk.f32.mxu1 %vm7528_vm0, %v7529_v1 }
0x16c9   : > { %v4013_v22 = vpop.f32.mrb[40].mxu0 }
0x16ca   : > { %v6759_v5 = vpop.f32.mrb[41].mxu0  ;;  %6763 = vmatmul.mubr.msk.f32.vlgmr.msra.gmra.mrb[40].mxu1 %vm661_vm2, %v4013_v22 }
0x16cb   : > { %6784 = vmatprep.mubr.msk.f32.mxu1 %vm579_vm1, %v7975_v60 }
0x1763   : > { %v3787_v6 = vpop.f32.mrb[36].mxu1 }
0x1764   : > { %v3788_v36 = vadd.f32 %v3787_v6, %v3714_v62  ;;  %v6744_v7 = vpop.f32.mrb[37].mxu1 }
0x1799   : > { %v3936_v13 = vpop.f32.mrb[38].mxu1 }
0x179a   : > { %v3940_v14 = vadd.f32 %v3936_v13, %v3788_v36  ;;  %v6754_v16 = vpop.f32.mrb[39].mxu1  ;;  %v4129_v36 = vrot.slane %v8239_v21, %v8045_v42 }
0x179d   : > { %v4086_v15 = vpop.f32.mrb[40].mxu1 }
0x179e   : > { %v4090_v19 = vadd.f32 %v4086_v15, %v3940_v14  ;;  %v6764_v23 = vpop.f32.mrb[41].mxu1 }
0x17a0   : > { %v4095_v24 = vadd.f32 %v4094_v18, %v4090_v19 }
0x17a2   : > { %v4096_v28 = vadd.f32 %v4095_v24, %v8230_v20  ;;  %v7020_v20 = vpack.c.bf16 %v6236_v39, %v6235_v38 }
0x17a4   : > { %v4097_v29 = vsel %vm579_vm1, %v4096_v28, 0.0  ;;  %7021 = vmatprep.subr.bf16.mxu1 %v7020_v20 }
0x17a5   : > { %4098 = vadd.xlane.f32.xlu1 %v4097_v29  ;;  %7023 = vmatpush3.bf16.msra.mxu1 %v7020_v20 }
0x17a6   : > { %7025 = vmatprep.subr.bf16.mxu1 %v7024_v43 }
0x17a9   : > { %7027 = vmatpush3.bf16.msra.mxu1 %v7024_v43 }
0x17aa   : > { %7032 = vmatprep.subr.bf16.mxu1 %v7527_v0 }
0x17ac   : > { %6785 = vmatmul.mubr.msk.f32.vlgmr.msra.gmra.mrb[42].mxu1 %vm579_vm1, %v7351_v12 }
0x17ad   : > { %6798 = vmatprep.mubr.msk.f32.mxu1 %vm7528_vm0, %v7529_v1 }
0x1832   : > { %v4099_v31 = vpop.xlane.xlu1 %4098 }
0x1833   : > { %v4100_v60 = vmul.f32 0.03125, %v4099_v31 }
0x1835   : > { %v4101_v32 = vsub.f32 %v4096_v28, %v4100_v60 }
0x1837   : > { %v4102_v34 = vmul.f32 %v4101_v32, %v4101_v32 }
0x1839   : > { %v4103_v35 = vsel %vm579_vm1, %v4102_v34, 0.0 }
0x183a   : > { %4104 = vadd.xlane.f32.xlu0 %v4103_v35 }
0x187f   : > { %v6786_v62 = vpop.f32.mrb[42].mxu1 }
0x1880   : > { %v4284_v63 = vadd.f32 %v6786_v62, %v4211_v61  ;;  %v4278_v2 = vpop.f32.mrb[43].mxu1 }
0x1881   : > { %v4279_v3 = vadd.f32 %v4278_v2, %v4211_v61 }
0x1883   : > { %v8393_v4 = vpack.i.bf16 %v4284_v63, %v4279_v3  ;;  %v7029_v22 = vpack.c.bf16 %v4284_v63, %v4279_v3  ;;  %v7354_v63 = vld [vmem:[%s8075_s29 + $0x10] sm:$0xff] }
0x1885   : > { %7225 = vrot.lane.b32.xlu0 %v8393_v4, %s8801_s14  ;;  %7235 = vrot.lane.b32.xlu1 %v8393_v4, %s8792_s17 }
0x18c7   : > { %v4105_v50 = vpop.xlane.xlu0 %4104 }
0x18c8   : > { %v4106_v52 = vmul.f32 0.03125, %v4105_v50 }
0x18ca   : > { %v4107_v53 = vadd.f32 1e-05, %v4106_v52 }
0x18cc   : > { %7315 = vrsqrt.f32 %v4107_v53 }
0x18d6   : > { %v7316_v55 = vpop.eup %7315 }
0x18d7   : > { %v4109_v56 = vmul.f32 %v7316_v55, %v4101_v32 }
0x18d9   : > { %v4114_v58 = vmul.f32 %v4113_v54, %v4109_v56 }
0x18db   : > { %v4119_v8 = vadd.f32 %v4118_v57, %v4114_v58  ;;  %v7353_v58 = vld [vmem:[%s8075_s29] sm:$0xff] }
0x18dd   : > { %v8384_v59 = vmul.f32 %v4119_v8, %v8023_v33 }
0x18df   : > { %6774 = vmatmul.mubr.msk.f32.vlgmr.msra.gmra.mrb[42].mxu0 %vm579_vm1, %v8384_v59 }
0x18e0   : > { %6791 = vmatprep.mubr.msk.f32.mxu0 %vm7528_vm0, %v7529_v1  ;;  %7031 = vmatpush3.bf16.xpose.msk.msra.mxu0 %vm8030_vm3, %v7029_v22  ;;  %v7355_v22 = vld [vmem:[%s8075_s29 + $0x18] sm:$0xff] }
0x18e1   : > { %7036 = vmatprep.subr.bf16.mxu0 %v7527_v0 }
0x18f7   : > { %v7226_v33 = vpop.permute.xlu0 %7225  ;;  %v7236_v16 = vpop.permute.xlu1 %7235 }
0x18f8   : > { %v7228_v17 = vunpack.i.h.bf16 %v7226_v33  ;;  %v7227_v5 = vunpack.i.l.bf16 %v7226_v33  ;;  %v7238_v18 = vunpack.i.h.bf16 %v7236_v16  ;;  %v7237_v15 = vunpack.i.l.bf16 %v7236_v16 }
0x18fa   : > { %v7033_v6 = vpack.c.bf16 %v7228_v17, %v7227_v5  ;;  %v7041_v19 = vpack.c.bf16 %v7238_v18, %v7237_v15  ;;  %v8447_v5 = vld [vmem:[%s8733_s11] sm:$0xff] }
0x18fc   : > { %7035 = vmatpush3.bf16.xpose.msk.msra.mxu1 %vm8030_vm3, %v7033_v6  ;;  %v8450_v6 = vrot.slane %v8447_v5, 2 }
0x18fd   : > { %7040 = vmatprep.subr.bf16.mxu1 %v7527_v0 }
0x18fe   : > { %7098 = vpush %v8450_v6 }
0x192f   : > { %s7099_s29 = spop %7098 }
0x19b2   : > { %v4199_v7 = vpop.f32.mrb[42].mxu0 }
0x19b3   : > { %v4200_v13 = vadd.f32 %v4199_v7, %v4129_v36  ;;  %v6775_v14 = vpop.f32.mrb[43].mxu0 }
0x19b5   : > { %4371 = vrot.lane.b32.xlu0 %v4200_v13, %s8801_s14  ;;  %6792 = vmatmul.mubr.msk.f32.vlgmr.msra.gmra.mrb[44].mxu0 %vm661_vm2, %v4200_v13  ;;  %s6295_s14 = sshll.u32 %s7633_s25, 7  ;;  %s7546_s25 = smov [#allocation8]  }
0x19b6   : > { %6805 = vmatprep.mubr.msk.f32.mxu0 %vm7528_vm0, %v7529_v1  ;;  %s8678_s5 = scalar_lea.hbm %s8811_s19, %s6295_s14 }
0x19b9   : > { %7230 = vrot.lane.b32.xlu0 %v8393_v4, %s8802_s16 }
0x19bd   : > { %4453 = vrot.lane.b32.xlu0 %v4200_v13, %s8802_s16  ;;  %s537_s16 = scalar_lea.vmem [#allocation8], %s7780_s20  ;;  %s7450_s20 = sshll.u32 %s7546_s25, 4  ;;  %s7451_s20 = int_to_ptr.vmem [resolvable:$false] %s7450_s20 }
0x19be   : > { %s5971_s21 = sshll.u32 %s537_s16, 4  ;;  %s8680_s21 = int_to_ptr.vmem [resolvable:$true] %s5971_s21 }
0x19bf   : > { %p7453_p2 = scmp.lt.s32.totalorder %s8680_s21, %s7451_s20 }
0x19c1   : > { %4535 = vrot.lane.b32.xlu0 %v4200_v13, %s8792_s17  ;;  %s8809_s17 = sld [smem:[#allocation21_spill]] }
0x1a27   : > { %v4372_v23 = vpop.permute.xlu0 %4371 }
0x1a28   : > { %6799 = vmatmul.mubr.msk.f32.vlgmr.msra.gmra.mrb[44].mxu1 %vm661_vm2, %v4372_v23 }
0x1a29   : > { %7043 = vmatpush3.bf16.xpose.msk.msra.mxu1 %vm8030_vm3, %v7041_v19  ;;  %6812 = vmatprep.mubr.msk.f32.mxu1 %vm7528_vm0, %v7529_v1 }
0x1a2a   : > { %7047 = vmatprep.subr.bf16.mxu1 %v7527_v0 }
0x1a2b   : > { %v7231_v24 = vpop.permute.xlu0 %7230 }
0x1a2c   : > { %v7233_v28 = vunpack.i.h.bf16 %v7231_v24  ;;  %v7232_v29 = vunpack.i.l.bf16 %v7231_v24 }
0x1a2e   : > { %v7037_v31 = vpack.c.bf16 %v7233_v28, %v7232_v29 }
0x1a2f   : > { %v4454_v60 = vpop.permute.xlu0 %4453 }
0x1a30   : > { %7039 = vmatpush3.bf16.xpose.msk.msra.mxu0 %vm8030_vm3, %v7037_v31 }
0x1a31   : > { %7044 = vmatprep.subr.bf16.mxu0 %v7527_v0 }
0x1a33   : > { %v4536_v32 = vpop.permute.xlu0 %4535 }
0x1a34   : > { %6813 = vmatmul.mubr.msk.f32.vlgmr.msra.gmra.mrb[46].mxu1 %vm661_vm2, %v4536_v32 }
0x1a35   : > { %6826 = vmatprep.mubr.msk.f32.mxu1 %vm7528_vm0, %v7529_v1 }
0x1a37   : > { %6806 = vmatmul.mubr.msk.f32.vlgmr.msra.gmra.mrb[46].mxu0 %vm661_vm2, %v4454_v60 }
0x1a38   : > { %6819 = vmatprep.mubr.msk.f32.mxu0 %vm7528_vm0, %v7529_v1 }
0x1a88   : > { %v4367_v34 = vpop.f32.mrb[44].mxu0 }
0x1a89   : > { %v6793_v35 = vpop.f32.mrb[45].mxu0  ;;  %v4617_v54 = vmul.f32 0.35355338, %v4367_v34 }
0x1a8b   : > { %v4621_v8 = vadd.f32 %v7353_v58, %v4617_v54 }
0x1a8d   : > { %v4625_v62 = vsel %vm2161_vm4, %v4621_v8, -inf }
0x1afb   : > { %v4449_v38 = vpop.f32.mrb[44].mxu1 }
0x1afc   : > { %v4618_v39 = vmul.f32 0.35355338, %v4449_v38  ;;  %v6800_v20 = vpop.f32.mrb[45].mxu1 }
0x1afe   : > { %v4622_v40 = vadd.f32 %v7352_v37, %v4618_v39 }
0x1b00   : > { %v4628_v41 = vsel %vm2161_vm4, %v4622_v40, -inf }
0x1b01   : > { %4629 = vmax.xlane.f32.xlu0 %v4628_v41 }
0x1b07   : > { %v4613_v43 = vpop.f32.mrb[46].mxu1 }
0x1b08   : > { %v6814_v12 = vpop.f32.mrb[47].mxu1  ;;  %v4620_v61 = vmul.f32 0.35355338, %v4613_v43 }
0x1b0a   : > { %v4531_v45 = vpop.f32.mrb[46].mxu0  ;;  %v4624_v33 = vadd.f32 %v7355_v22, %v4620_v61 }
0x1b0b   : > { %v6807_v46 = vpop.f32.mrb[47].mxu0  ;;  %v4619_v56 = vmul.f32 0.35355338, %v4531_v45  ;;  %v6242_v45 = vld [vmem:[%s8728_s6 + $0x148] sm:$0xff] }
0x1b0c   : > { %v4634_v17 = vsel %vm2161_vm4, %v4624_v33, -inf }
0x1b0d   : > { %v4623_v2 = vadd.f32 %v7354_v63, %v4619_v56  ;;  %v6243_v63 = vld [vmem:[%s8728_s6 + $0x150] sm:$0xff] }
0x1b0f   : > { %v4631_v3 = vsel %vm2161_vm4, %v4623_v2, -inf }
0x1b17   : > { %7240 = vrot.lane.b32.xlu0 %v8393_v4, %s8797_s18 }
0x1b8e   : > { %v4630_v47 = vpop.xlane.xlu0 %4629 }
0x1b8f   : > { %v4638_v48 = vsub.f32 %v4622_v40, %v4630_v47 }
0x1b91   : > { %v4643_v25 = vmul.f32 1.442695, %v4638_v48 }
0x1b92   : > { %v7241_v49 = vpop.permute.xlu0 %7240 }
0x1b93   : > { %7317 = vpow2.f32 %v4643_v25  ;;  %v7243_v50 = vunpack.i.h.bf16 %v7241_v49  ;;  %v7242_v52 = vunpack.i.l.bf16 %v7241_v49 }
0x1b95   : > { %v7048_v53 = vpack.c.bf16 %v7243_v50, %v7242_v52 }
0x1b97   : > { %7049 = vmatpush3.bf16.msra.mxu1 %v7048_v53 }
0x1b98   : > { %6834 = vmatprep.subr.mxu1 %v7529_v1 }
0x1b9d   : > { %v7318_v55 = vpop.eup %7317 }
0x1b9e   : > { %v4652_v57 = vsel %vm2161_vm4, %v7318_v55, 0.0 }
0x1b9f   : > { %4653 = vadd.xlane.f32.xlu1 %v4652_v57 }
0x1ba3   : > { %4626 = vmax.xlane.f32.xlu1 %v4625_v62  ;;  %v6241_v62 = vld [vmem:[%s8728_s6 + $0x140] sm:$0xff] }
0x1ba7   : > { %4632 = vmax.xlane.f32.xlu1 %v4631_v3 }
0x1bab   : > { %4635 = vmax.xlane.f32.xlu1 %v4634_v17  ;;  %v6244_v17 = vld [vmem:[%s8728_s6 + $0x158] sm:$0xff] }
0x1bbc   : > { %7245 = vrot.lane.b32.xlu1 %v8393_v4, %s8798_s27  ;;  %s7541_s27 = smov 126  }
0x1c2c   : > { %v4654_v36 = vpop.xlane.xlu1 %4653 }
0x1c2d   : > { %7319 = vrcp.f32 %v4654_v36 }
0x1c30   : > { %v4627_v7 = vpop.xlane.xlu1 %4626 }
0x1c31   : > { %v4637_v13 = vsub.f32 %v4621_v8, %v4627_v7 }
0x1c33   : > { %v4641_v14 = vmul.f32 1.442695, %v4637_v13 }
0x1c34   : > { %v4633_v16 = vpop.xlane.xlu1 %4632 }
0x1c35   : > { %7321 = vpow2.f32 %v4641_v14  ;;  %v4639_v18 = vsub.f32 %v4623_v2, %v4633_v16 }
0x1c37   : > { %v7320_v15 = vpop.eup %7319  ;;  %v4645_v19 = vmul.f32 1.442695, %v4639_v18 }
0x1c38   : > { %v8453_v23 = vmul.f32 %v7320_v15, %v7318_v55  ;;  %v4636_v24 = vpop.xlane.xlu1 %4635 }
0x1c39   : > { %7323 = vpow2.f32 %v4645_v19  ;;  %v4640_v28 = vsub.f32 %v4624_v33, %v4636_v24 }
0x1c3a   : > { %6827 = vmatmul.mubr.msk.f32.vlgmr.msra.gmra.mrb[48].mxu1 %vm2161_vm4, %v8453_v23 }
0x1c3b   : > { %v4647_v29 = vmul.f32 1.442695, %v4640_v28  ;;  %6836 = vmatprep.mubr.msk.f32.mxu1 %vm7528_vm0, %v7529_v1  ;;  %6835 = vmatpush3.msra.mxu1 %v6241_v62 }
0x1c3c   : > { %v7246_v31 = vpop.permute.xlu1 %7245  ;;  %6846 = vmatprep.subr.mxu1 %v7529_v1 }
0x1c3d   : > { %7325 = vpow2.f32 %v4647_v29  ;;  %v7248_v60 = vunpack.i.h.bf16 %v7246_v31  ;;  %v7247_v32 = vunpack.i.l.bf16 %v7246_v31  ;;  %v5282_v29 = vrot.slane %v8239_v21, %v2818_v51  ;;  %v6265_v51 = vld [vmem:[%s8728_s6 + $0x160] sm:$0xff] }
0x1c3f   : > { %v7322_v34 = vpop.eup %7321  ;;  %v7045_v35 = vpack.c.bf16 %v7248_v60, %v7247_v32 }
0x1c40   : > { %v4649_v38 = vsel %vm2161_vm4, %v7322_v34, 0.0 }
0x1c41   : > { %4650 = vadd.xlane.f32.xlu0 %v4649_v38  ;;  %7046 = vmatpush3.bf16.msra.mxu0 %v7045_v35 }
0x1c42   : > { %6829 = vmatprep.subr.mxu0 %v7529_v1 }
0x1c43   : > { %v7324_v39 = vpop.eup %7323 }
0x1c44   : > { %v4655_v20 = vsel %vm2161_vm4, %v7324_v39, 0.0 }
0x1c45   : > { %4656 = vadd.xlane.f32.xlu1 %v4655_v20 }
0x1c47   : > { %v7326_v37 = vpop.eup %7325 }
0x1c48   : > { %v4658_v40 = vsel %vm2161_vm4, %v7326_v37, 0.0 }
0x1c49   : > { %4659 = vadd.xlane.f32.xlu1 %v4658_v40 }
0x1c57   : > { %7255 = vrot.lane.b32.xlu0 %v8393_v4, %s8800_s13  ;;  %s7543_s13 = smov 125  }
0x1c5a   : > { %7250 = vrot.lane.b32.xlu1 %v8393_v4, %s8799_s9  ;;  %s7542_s9 = smov 127  }
0x1cce   : > { %v4651_v41 = vpop.xlane.xlu0 %4650 }
0x1ccf   : > { %7327 = vrcp.f32 %v4651_v41 }
0x1cd2   : > { %v4657_v46 = vpop.xlane.xlu1 %4656  ;;  %v7256_v49 = vpop.permute.xlu0 %7255 }
0x1cd3   : > { %7329 = vrcp.f32 %v4657_v46  ;;  %v7258_v52 = vunpack.i.h.bf16 %v7256_v49  ;;  %v7257_v53 = vunpack.i.l.bf16 %v7256_v49  ;;  %v6267_v46 = vld [vmem:[%s8728_s6 + $0x170] sm:$0xff] }
0x1cd4   : > { %v6272_v49 = vld [vmem:[%s8729_s7 + $0x50] sm:$0xff] }
0x1cd5   : > { %v7054_v8 = vpack.c.bf16 %v7258_v52, %v7257_v53  ;;  %v6273_v52 = vld [vmem:[%s8729_s7 + $0x58] sm:$0xff] }
0x1cd6   : > { %v4660_v4 = vpop.xlane.xlu1 %4659  ;;  %v7066_v53 = vpack.c.bf16 %v6273_v52, %v6272_v49 }
0x1cd7   : > { %7331 = vrcp.f32 %v4660_v4  ;;  %v6268_v4 = vld [vmem:[%s8728_s6 + $0x178] sm:$0xff] }
0x1cd9   : > { %v7328_v43 = vpop.eup %7327 }
0x1cda   : > { %v8467_v12 = vmul.f32 %v7328_v43, %v7322_v34  ;;  %v7251_v47 = vpop.permute.xlu1 %7250  ;;  %v6266_v43 = vld [vmem:[%s8728_s6 + $0x168] sm:$0xff] }
0x1cdb   : > { %v7253_v48 = vunpack.i.h.bf16 %v7251_v47  ;;  %v7252_v25 = vunpack.i.l.bf16 %v7251_v47  ;;  %v7060_v47 = vpack.c.bf16 %v6268_v4, %v6267_v46  ;;  %v5596_v4 = vld [vmem:[%s8732_s10 + $0x10] sm:$0xff] }
0x1cdc   : > { %6820 = vmatmul.mubr.msk.f32.vlgmr.msra.gmra.mrb[48].mxu0 %vm2161_vm4, %v8467_v12 }
0x1cdd   : > { %6830 = vmatpush3.msra.mxu0 %v6242_v45  ;;  %6831 = vmatprep.mubr.msk.f32.mxu0 %vm7528_vm0, %v7529_v1  ;;  %v7330_v50 = vpop.eup %7329  ;;  %v7051_v54 = vpack.c.bf16 %v7253_v48, %v7252_v25  ;;  %v7057_v45 = vpack.c.bf16 %v6266_v43, %v6265_v51  ;;  %v6270_v48 = vld [vmem:[%s8729_s7 + $0x40] sm:$0xff]  ;;  %v6271_v25 = vld [vmem:[%s8729_s7 + $0x48] sm:$0xff]  ;;  %v5507_v51 = vld [vmem:[#allocation7 + $0x18] sm:$0xff] }
0x1cde   : > { %7050 = vmatprep.subr.bf16.mxu0 %v7527_v0  ;;  %v8480_v57 = vmul.f32 %v7330_v50, %v7324_v39  ;;  %v7063_v50 = vpack.c.bf16 %v6271_v25, %v6270_v48  ;;  %v7357_v25 = vld [vmem:[%s8808_s12] sm:$0xff]  ;;  %s6140_s12 = sshll.u32 %s7878_s26, 3 }
0x1cdf   : > { %s556_s18 = scalar_lea.vmem %s8809_s17, %s6140_s12  ;;  %s7446_s12 = scalar_lea.vmem %s8680_s21, 128 }
0x1ce0   : > { %p7447_p13 = scmp.ne.s32.totalorder %s8680_s21, %s7446_s12 }
0x1ce1   : > { %v7332_v58 = vpop.eup %7331 }
0x1ce2   : > { %v8487_v61 = vmul.f32 %v7332_v58, %v7326_v37 }
0x1d0d   : > { %v4823_v55 = vpop.f32.mrb[48].mxu1 }
0x1d0e   : > { %v6828_v56 = vpop.f32.mrb[49].mxu1  ;;  %6832 = vmatmul.mubr.msk.f32.vlgmr.msra.gmra.mrb[50].mxu0 %vm661_vm2, %v4823_v55  ;;  %v6275_v55 = vld [vmem:[%s8729_s7 + $0x68] sm:$0xff] }
0x1d0f   : > { %7052 = vmatpush3.bf16.msra.mxu0 %v7051_v54  ;;  %6843 = vmatprep.mubr.msk.f32.mxu0 %vm7528_vm0, %v7529_v1  ;;  %v6274_v54 = vld [vmem:[%s8729_s7 + $0x60] sm:$0xff] }
0x1d10   : > { %7053 = vmatprep.subr.bf16.mxu0 %v7527_v0  ;;  %v7069_v56 = vpack.c.bf16 %v6275_v55, %v6274_v54 }
0x1d12   : > { %6844 = vmatmul.mubr.msk.f32.vlgmr.msra.gmra.mrb[52].mxu0 %vm2161_vm4, %v8480_v57 }
0x1d13   : > { %7055 = vmatpush3.bf16.msra.mxu0 %v7054_v8  ;;  %6855 = vmatprep.mubr.msk.f32.mxu0 %vm7528_vm0, %v7529_v1 }
0x1d14   : > { %7056 = vmatprep.subr.bf16.mxu0 %v7527_v0 }
0x1d16   : > { %6856 = vmatmul.mubr.msk.f32.vlgmr.msra.gmra.mrb[54].mxu0 %vm2161_vm4, %v8487_v61 }
0x1d17   : > { %6871 = vmatprep.mubr.msk.f32.mxu0 %vm7528_vm0, %v7529_v1  ;;  %7058 = vmatpush3.bf16.msra.mxu0 %v7057_v45  ;;  %v5594_v45 = vld [vmem:[%s8732_s10] sm:$0xff] }
0x1d18   : > { %7059 = vmatprep.subr.bf16.mxu0 %v7527_v0 }
0x1d1b   : > { %7061 = vmatpush3.bf16.msra.mxu0 %v7060_v47  ;;  %v5597_v47 = vld [vmem:[%s8732_s10 + $0x18] sm:$0xff] }
0x1d1c   : > { %7074 = vmatprep.subr.bf16.mxu0 %v7527_v0  ;;  %v7090_v48 = vpack.c.bf16 %v5597_v47, %v5596_v4 }
0x1daf   : > { %v4744_v2 = vpop.f32.mrb[48].mxu0 }
0x1db0   : > { %v6821_v3 = vpop.f32.mrb[49].mxu0  ;;  %6837 = vmatmul.mubr.msk.f32.vlgmr.msra.gmra.mrb[50].mxu1 %vm661_vm2, %v4744_v2  ;;  %v5301_v2 = vrot.slane %v8239_v21, %v2837_v30  ;;  %v6277_v30 = vld [vmem:[%s8729_s7 + $0x78] sm:$0xff] }
0x1db1   : > { %6847 = vmatpush3.msra.mxu1 %v6243_v63  ;;  %6848 = vmatprep.mubr.msk.f32.mxu1 %vm7528_vm0, %v7529_v1  ;;  %v8559_v63 = vld [vmem:[%s8730_s8 + $0x18] sm:$0xff]  ;;  %v7072_v21 = vpack.c.bf16 %v6277_v30, %v6276_v10  ;;  %v6287_v10 = vld [vmem:[%s8732_s10 + $0x48] sm:$0xff] }
0x1db2   : > { %6858 = vmatprep.subr.mxu1 %v7529_v1 }
0x1de1   : > { %v4896_v22 = vpop.f32.mrb[50].mxu0 }
0x1de2   : > { %v6833_v33 = vpop.f32.mrb[51].mxu0 }
0x1de3   : > { %v5306_v33 = vrot.slane %v8559_v63, %v7830_v11 }
0x1de5   : > { %v5048_v36 = vpop.f32.mrb[52].mxu0 }
0x1de6   : > { %v6845_v7 = vpop.f32.mrb[53].mxu0  ;;  %6849 = vmatmul.mubr.msk.f32.vlgmr.msra.gmra.mrb[52].mxu1 %vm661_vm2, %v5048_v36 }
0x1de7   : > { %6859 = vmatpush3.msra.mxu1 %v6244_v17  ;;  %6860 = vmatprep.mubr.msk.f32.mxu1 %vm7528_vm0, %v7529_v1  ;;  %v8568_v7 = vld [vmem:[%s8807_s28] sm:$0xff]  ;;  %s7452_s28 = scalar_lea.vmem %s7451_s20, 256 }
0x1de8   : > { %7062 = vmatprep.subr.bf16.mxu1 %v7527_v0  ;;  %p7454_p5 = scmp.lt.s32.totalorder %s7452_s28, %s7446_s12 }
0x1de9   : > { %v5201_v13 = vpop.f32.mrb[54].mxu0 }
0x1dea   : > { %v6857_v14 = vpop.f32.mrb[55].mxu0  ;;  %6861 = vmatmul.mubr.msk.f32.vlgmr.msra.gmra.mrb[54].mxu1 %vm661_vm2, %v5201_v13  ;;  %p7455_p1 = por %p7454_p5, %p7453_p2 }
0x1deb   : > { %6890 = vmatprep.mubr.msk.f32.mxu1 %vm7528_vm0, %v7529_v1  ;;  %7064 = vmatpush3.bf16.msra.mxu1 %v7063_v50  ;;  %v5317_v14 = vrot.slane %v8559_v63, %v7950_v44 }
0x1dec   : > { %7065 = vmatprep.subr.bf16.mxu1 %v7527_v0 }
0x1def   : > { %7067 = vmatpush3.bf16.msra.mxu1 %v7066_v53 }
0x1df0   : > { %7068 = vmatprep.subr.bf16.mxu1 %v7527_v0 }
0x1df3   : > { %7070 = vmatpush3.bf16.msra.mxu1 %v7069_v56  ;;  %v5495_v56 = vrot.slane %v8559_v63, %v8015_v27  ;;  %v6282_v27 = vld [vmem:[%s8732_s10 + $0x30] sm:$0xff] }
0x1df4   : > { %7071 = vmatprep.subr.bf16.mxu1 %v7527_v0 }
0x1df7   : > { %7073 = vmatpush3.bf16.msra.mxu1 %v7072_v21  ;;  %v6288_v21 = vld [vmem:[%s8732_s10 + $0x50] sm:$0xff] }
0x1df8   : > { %7086 = vmatprep.subr.bf16.mxu1 %v7527_v0 }
0x1e83   : > { %v4969_v16 = vpop.f32.mrb[50].mxu1 }
0x1e84   : > { %v4970_v18 = vadd.f32 %v4969_v16, %v4896_v22  ;;  %v6838_v15 = vpop.f32.mrb[51].mxu1 }
0x1eb9   : > { %v5121_v19 = vpop.f32.mrb[52].mxu1 }
0x1eba   : > { %v5125_v24 = vadd.f32 %v5121_v19, %v4970_v18  ;;  %v6850_v28 = vpop.f32.mrb[53].mxu1 }
0x1ebd   : > { %v5274_v31 = vpop.f32.mrb[54].mxu1 }
0x1ebe   : > { %v5278_v60 = vadd.f32 %v5274_v31, %v5125_v24  ;;  %v6862_v32 = vpop.f32.mrb[55].mxu1  ;;  %v5404_v24 = vrot.slane %v8559_v63, %v8012_v26  ;;  %v5504_v26 = vld [vmem:[#allocation7] sm:$0xff] }
0x1ec0   : > { %v5283_v34 = vadd.f32 %v5282_v29, %v5278_v60 }
0x1ec2   : > { %v5284_v35 = vadd.f32 %v5283_v34, %v8384_v59 }
0x1ec4   : > { %v5285_v38 = vsel %vm579_vm1, %v5284_v35, 0.0 }
0x1ec5   : > { %5286 = vadd.xlane.f32.xlu1 %v5285_v38 }
0x1f52   : > { %v5287_v39 = vpop.xlane.xlu1 %5286 }
0x1f53   : > { %v5288_v20 = vmul.f32 0.03125, %v5287_v39 }
0x1f55   : > { %v5289_v37 = vsub.f32 %v5284_v35, %v5288_v20 }
0x1f57   : > { %v5290_v40 = vmul.f32 %v5289_v37, %v5289_v37 }
0x1f59   : > { %v5291_v41 = vsel %vm579_vm1, %v5290_v40, 0.0 }
0x1f5a   : > { %5292 = vadd.xlane.f32.xlu0 %v5291_v41  ;;  %v5506_v41 = vld [vmem:[#allocation7 + $0x10] sm:$0xff] }
0x1f5b   : > { %v7078_v43 = vpack.c.bf16 %v5507_v51, %v5506_v41  ;;  %v5833_v51 = vstv %s7099_s29 }
0x1f70   : > { %5843 = vrot.lane.b32.xlu0 %v8450_v6, %s7541_s27 }
0x1fe7   : > { %v5293_v58 = vpop.xlane.xlu0 %5292 }
0x1fe8   : > { %v5294_v8 = vmul.f32 0.03125, %v5293_v58 }
0x1fea   : > { %v5295_v62 = vadd.f32 1e-05, %v5294_v8 }
0x1feb   : > { %v5844_v53 = vpop.permute.xlu0 %5843 }
0x1fec   : > { %7333 = vrsqrt.f32 %v5295_v62  ;;  %v5500_v62 = vrot.slane %v8559_v63, %v8045_v42  ;;  %v6283_v42 = vld [vmem:[%s8732_s10 + $0x38] sm:$0xff] }
0x1fed   : > { %v7084_v63 = vpack.c.bf16 %v6283_v42, %v6282_v27 }
0x1ff6   : > { %v7334_v3 = vpop.eup %7333 }
0x1ff7   : > { %v5297_v22 = vmul.f32 %v7334_v3, %v5289_v37  ;;  %v5505_v37 = vld [vmem:[#allocation7 + $0x8] sm:$0xff]  ;;  %v6280_v3 = vld [vmem:[%s8732_s10 + $0x20] sm:$0xff] }
0x1ff8   : > { %v7075_v40 = vpack.c.bf16 %v5505_v37, %v5504_v26  ;;  %v5870_v37 = vld [vmem:[%s556_s18] sm:$0xff] }
0x1ff9   : > { %v5302_v17 = vmul.f32 %v5301_v2, %v5297_v22  ;;  %v6281_v22 = vld [vmem:[%s8732_s10 + $0x28] sm:$0xff] }
0x1ffb   : > { %v5307_v36 = vadd.f32 %v5306_v33, %v5302_v17  ;;  %v7081_v17 = vpack.c.bf16 %v6281_v22, %v6280_v3 }
0x1ffd   : > { %v8571_v13 = vmul.f32 %v8568_v7, %v5307_v36 }
0x1fff   : > { %6872 = vmatmul.mubr.msk.f32.vlgmr.msra.gmra.mrb[56].mxu0 %vm579_vm1, %v8571_v13 }
0x2000   : > { %6901 = vmatprep.mubr.msk.f32.mxu0 %vm7528_vm0, %v7529_v1  ;;  %7076 = vmatpush3.bf16.msra.mxu0 %v7075_v40 }
0x2001   : > { %7077 = vmatprep.subr.bf16.mxu0 %v7527_v0 }
0x2004   : > { %7079 = vmatpush3.bf16.msra.mxu0 %v7078_v43 }
0x2005   : > { %7080 = vmatprep.subr.bf16.mxu0 %v7527_v0 }
0x20d2   : > { %v5387_v16 = vpop.f32.mrb[56].mxu0 }
0x20d3   : > { %v5388_v18 = vadd.f32 %v5387_v16, %v5317_v14  ;;  %v6873_v15 = vpop.f32.mrb[57].mxu0  ;;  %v6289_v14 = vld [vmem:[%s8732_s10 + $0x58] sm:$0xff] }
0x20d4   : > { %v7096_v16 = vpack.c.bf16 %v6289_v14, %v6288_v21 }
0x20d5   : > { %v5391_v19 = vmax.f32 %v5388_v18, 0.0 }
0x20d7   : > { %6891 = vmatmul.mubr.msk.f32.vlgmr.msra.gmra.mrb[56].mxu1 %vm2941_vm5, %v5391_v19  ;;  %v7544_v19 = vmov 0  }
0x20d8   : > { %6923 = vmatprep.mubr.msk.f32.mxu1 %vm7528_vm0, %v7529_v1  ;;  %7259 = vset.pattern.permute.xlu1 %v7544_v19 }
0x20d9   : > { %7260 = vset.pattern.permute.xlu0 %v7544_v19 }
0x21aa   : > { %v5474_v28 = vpop.f32.mrb[56].mxu1 }
0x21ab   : > { %v5475_v29 = vadd.f32 %v5474_v28, %v5404_v24  ;;  %v6892_v31 = vpop.f32.mrb[57].mxu1 }
0x21ad   : > { %v5478_v60 = vadd.f32 %v5475_v29, %v8571_v13 }
0x21af   : > { %v5479_v32 = vsel %vm579_vm1, %v5478_v60, 0.0 }
0x21b0   : > { %5480 = vadd.xlane.f32.xlu1 %v5479_v32 }
0x223d   : > { %v5481_v34 = vpop.xlane.xlu1 %5480 }
0x223e   : > { %v5482_v35 = vmul.f32 0.03125, %v5481_v34 }
0x2240   : > { %v5483_v38 = vsub.f32 %v5478_v60, %v5482_v35 }
0x2242   : > { %v5484_v39 = vmul.f32 %v5483_v38, %v5483_v38 }
0x2244   : > { %v5485_v20 = vsel %vm579_vm1, %v5484_v39, 0.0 }
0x2245   : > { %5486 = vadd.xlane.f32.xlu1 %v5485_v20 }
0x2256   : > { %5836 = vrot.lane.b32.xlu1 %v8450_v6, %s7542_s9 }
0x225a   : > { %5850 = vrot.lane.b32.xlu1 %v8450_v6, %s7543_s13  ;;  %v5595_v6 = vld [vmem:[%s8732_s10 + $0x8] sm:$0xff]  ;;  %s8810_s13 = sld [smem:[#allocation18_spill]] }
0x225b   : > { %v7087_v46 = vpack.c.bf16 %v5595_v6, %v5594_v45  ;;  %v5835_v45 = vmul.f32 %v5833_v51, %v8467_v12 }
0x225d   : > { %7088 = vmatpush3.bf16.msra.mxu1 %v7087_v46 }
0x225e   : > { %7089 = vmatprep.subr.bf16.mxu1 %v7527_v0 }
0x2260   : > { %p8812_p3 = scmp.ne.s32.totalorder %s8810_s13, 0 }
0x2261   : > { %7091 = vmatpush3.bf16.msra.mxu1 %v7090_v48 }
0x2262   : > { %6937 = vmatprep.subr.mxu1 %v7529_v1  ;;  %p7448_p7 = pnand %p7447_p13, %p8812_p3 }
0x2264   : > { %6924 = vmatmul.mubr.msk.f32.vlgmr.msra.gmra.mrb[58].mxu1 %vm579_vm1, %v7357_v25  ;;  %v5872_v25 = vand.u32 127, %v575_v9  ;;  %p7449_p9 = pneg %p7448_p7 }
0x2265   : > { %6939 = vmatprep.mubr.msk.f32.mxu1 %vm7528_vm0, %v7529_v1 }
0x2266   : > { %p7456_p6 = pnand %p7455_p1, %p7449_p9 }
0x22d2   : > { %v5487_v49 = vpop.xlane.xlu1 %5486 }
0x22d3   : > { %v5488_v50 = vmul.f32 0.03125, %v5487_v49 }
0x22d5   : > { %v5489_v52 = vadd.f32 1e-05, %v5488_v50 }
0x22d6   : > { %v5837_v54 = vpop.permute.xlu1 %5836 }
0x22d7   : > { %7335 = vrsqrt.f32 %v5489_v52  ;;  %7100 = vpush %v5837_v54 }
0x22d8   : > { %7102 = vpush %v5844_v53 }
0x22da   : > { %v5851_v55 = vpop.permute.xlu1 %5850 }
0x22db   : > { %7104 = vpush %v5851_v55 }
0x22e1   : > { %v7336_v58 = vpop.eup %7335 }
0x22e2   : > { %v5491_v8 = vmul.f32 %v7336_v58, %v5483_v38 }
0x22e4   : > { %v5496_v2 = vmul.f32 %v5495_v56, %v5491_v8 }
0x22e6   : > { %v5501_v33 = vadd.f32 %v5500_v62, %v5496_v2 }
0x22e8   : > { %v5502_v36 = vmul.f32 %v8568_v7, %v5501_v33  ;;  %v6286_v7 = vld [vmem:[%s8732_s10 + $0x40] sm:$0xff] }
0x22e9   : > { %v7093_v30 = vpack.c.bf16 %v6287_v10, %v6286_v7 }
0x22ea   : > { %6902 = vmatmul.mubr.msk.f32.vlgmr.msra.gmra.mrb[58].mxu0 %vm579_vm1, %v5502_v36 }
0x22eb   : > { %7082 = vmatpush3.bf16.msra.mxu0 %v7081_v17  ;;  %6912 = vmatprep.mubr.msk.f32.mxu0 %vm7528_vm0, %v7529_v1 }
0x22ec   : > { %7083 = vmatprep.subr.bf16.mxu0 %v7527_v0 }
0x22ef   : > { %7085 = vmatpush3.bf16.msra.mxu0 %v7084_v63 }
0x22f0   : > { %7092 = vmatprep.subr.bf16.mxu0 %v7527_v0 }
0x22f2   : > { %6913 = vmatmul.mubr.msk.f32.vlgmr.msra.gmra.mrb[60].mxu0 %vm579_vm1, %v8384_v59 }
0x22f3   : > { %7094 = vmatpush3.bf16.msra.mxu0 %v7093_v30  ;;  %6934 = vmatprep.mubr.msk.f32.mxu0 %vm7528_vm0, %v7529_v1  ;;  %v5822_v1 = vrot.slane %v8447_v5, %v7950_v44  ;;  %v5511_v44 = vrot.slane %v8447_v5, %v7830_v11 }
0x22f4   : > { %7095 = vmatprep.subr.bf16.mxu0 %v7527_v0 }
0x22f7   : > { %7097 = vmatpush3.bf16.msra.mxu0 %v7096_v16 }
0x22fa   : > { %6935 = vmatmul.mubr.msk.f32.vlgmr.msra.gmra.mrb[62].mxu0 %vm579_vm1, %v8571_v13 }
0x2308   : > { %s7101_s27 = spop %7100 }
0x2309   : > { %v5839_v41 = vstv %s7101_s27  ;;  %s7103_s26 = spop %7102 }
0x230a   : > { %v5841_v43 = vmul.f32 %v5839_v41, %v8453_v23  ;;  %v5846_v6 = vstv %s7103_s26  ;;  %v7545_v23 = vmov 1.0  }
0x230b   : > { %v5848_v47 = vmul.f32 %v5846_v6, %v8480_v57 }
0x230c   : > { %s7105_s9 = spop %7104  ;;  %v5842_v46 = vadd.f32 %v5841_v43, %v5835_v45 }
0x230d   : > { %v5853_v4 = vstv %s7105_s9 }
0x230e   : > { %v5849_v48 = vadd.f32 %v5848_v47, %v5842_v46  ;;  %v5855_v11 = vmul.f32 %v5853_v4, %v8487_v61 }
0x2310   : > { %v5856_v49 = vadd.f32 %v5855_v11, %v5849_v48 }
0x2337   : > { %v5739_v18 = vpop.f32.mrb[58].mxu1 }
0x2338   : > { %v6925_v15 = vpop.f32.mrb[59].mxu1 }
0x23bd   : > { %v5581_v24 = vpop.f32.mrb[58].mxu0 }
0x23be   : > { %v6903_v28 = vpop.f32.mrb[59].mxu0  ;;  %v5582_v40 = vadd.f32 %v5581_v24, %v5511_v44 }
0x23c5   : > { %v5669_v59 = vpop.f32.mrb[60].mxu0 }
0x23c6   : > { %v5740_v29 = vadd.f32 %v5739_v18, %v5669_v59  ;;  %v6914_v31 = vpop.f32.mrb[61].mxu0 }
0x23cd   : > { %v5814_v60 = vpop.f32.mrb[62].mxu0 }
0x23ce   : > { %v5818_v0 = vadd.f32 %v5814_v60, %v5740_v29  ;;  %v6936_v32 = vpop.f32.mrb[63].mxu0 }
0x23d0   : > { %v5823_v34 = vadd.f32 %v5822_v1, %v5818_v0 }
0x23d2   : > { %v5824_v35 = vsub.f32 0.0, %v5823_v34 }
0x23d4   : > { %v5825_v13 = vmul.f32 1.442695, %v5824_v35 }
0x23d6   : > { %7337 = vpow2.f32 %v5825_v13 }
0x23e0   : > { %v7338_v38 = vpop.eup %7337 }
0x23e1   : > { %v5827_v39 = vadd.f32 1.0, %v7338_v38 }
0x23e3   : > { %7339 = vrcp.f32 %v5827_v39 }
0x23ed   : > { %v7340_v20 = vpop.eup %7339 }
0x23ee   : > { %v5863_v26 = vsub.f32 1.0, %v7340_v20 }
0x23f0   : > { %5866 = vperm.xlu1 %7259, %v5863_v26  }
0x23f4   : > { %5874 = vperm.xlu1 %7259, %v5870_v37  }
0x2418   : > { %5585 = vmax.xlane.f32.xlu1 %v5582_v40 }
0x246f   : > { %v5867_v5 = vpop.permute.xlu1 %5866 }
0x2470   : > { %v5869_v52 = vmul.f32 %v5867_v5, %v5856_v49 }
0x2473   : > { %v5875_v50 = vpop.permute.xlu1 %5874 }
0x2474   : > { %vm5876_vm6 = vcmp.eq.s32.totalorder %v5872_v25, %v5875_v50 }
0x2475   : > { %6938 = vmatpush3.msk.msra.mxu1 %vm5876_vm6, %v7545_v23 }
0x2476   : > { %6940 = vmatmul.mubr.msk.f32.vlgmr.msra.gmra.mrb[60].mxu1 %vm661_vm2, %v5869_v52 }
0x24a5   : > { %v5586_v12 = vpop.xlane.xlu1 %5585 }
0x24a6   : > { %v5587_v53 = vsub.f32 %v5582_v40, %v5586_v12 }
0x24a8   : > { %v5588_v54 = vmul.f32 1.442695, %v5587_v53 }
0x24aa   : > { %7341 = vpow2.f32 %v5588_v54 }
0x24b4   : > { %v7342_v57 = vpop.eup %7341 }
0x24b5   : > { %5590 = vadd.xlane.f32.xlu0 %v7342_v57 }
0x24cb   : > { %5859 = vperm.xlu0 %7260, %v7340_v20  }
0x2542   : > { %v5591_v61 = vpop.xlane.xlu0 %5590 }
0x2543   : > { %7343 = vrcp.f32 %v5591_v61 }
0x2549   : > { %v5948_v9 = vpop.f32.mrb[60].mxu1 }
0x254a   : > { %v6941_v55 = vpop.f32.mrb[61].mxu1  ;;  %v5860_v8 = vpop.permute.xlu0 %5859 }
0x254d   : > { %v7344_v56 = vpop.eup %7343 }
0x254e   : > { %v5593_v58 = vmul.f32 %v7344_v56, %v7342_v57 }
0x2550   : > { %v5862_v62 = vmul.f32 %v5860_v8, %v5593_v58 }
0x2552   : > { %v5952_v2 = vadd.f32 %v5948_v9, %v5862_v62 }
0x2554   : > { %v5953_v3 = vadd.f32 1e-12, %v5952_v2 }
0x2556   : > { %7345 = vlog2.f32 %v5953_v3 }
0x2560   : > { %v7346_v22 = vpop.eup %7345 }
0x2561   : > { %v5955_v33 = vmul.f32 0.6931472, %v7346_v22 }
0x2563   : > { %5956 = vst [vmem:[%s537_s16] sm:$0xff] %v5955_v33 }
0x2564   : > { %7459 = shalt.err (!%p7456_p6)
}
0x2565   : > { %s7460_s15 = scalar_lea.hbm %s8678_s5, 128  ;;  %s7464_s18 = scalar_lea.hbm %s8811_s19, 256 }
0x2566   : > { %p7461_p8 = scmp.ne.s32.totalorder %s8678_s5, %s7460_s15  ;;  %p7465_p11 = scmp.lt.u32.totalorder %s8678_s5, %s8811_s19 }
0x2567   : > { %p7466_p0 = scmp.lt.u32.totalorder %s7464_s18, %s7460_s15  ;;  %p7468_p13 = scmp.lt.u32.totalorder %s7460_s15, %s8678_s5 }
0x2568   : > { %p7462_p4 = pnand %p7461_p8, %p8812_p3 }
0x2569   : > { %p7467_p10 = por %p7466_p0, %p7465_p11 }
0x256a   : > { %p7463_p12 = pneg %p7462_p4 }
0x256b   : > { %p7469_p7 = por %p7468_p13, %p7467_p10 }
0x256d   : > { %p7470_p9 = pnand %p7469_p7, %p7463_p12 }
0x256f   : > { %7473 = shalt.err (!%p7470_p9)
}
0x2570   : > { %7114 = dma.vmem_to_hbm [thread:$0]  (%p8812_p3), %s8680_s21, 128, %s8678_s5, %s5958_s30  }
0x2571 PF: > { %s8813_s26 = sld [smem:[#allocation13_spill]]  ;;  %s8814_s9 = sld [smem:[#allocation15_spill]] }
0x2572   : > { %p8816_p5 = scmp.ge.s32.totalorder %s7520_s24, 2 }
0x2577   : > { %s5983_s14 = sand.u32 1, %s8813_s26   ;;  %p8815_p2 = scmp.ne.s32.totalorder %s8814_s9, 0 }
0x2578   : > { %s5984_s16 = scalar_lea.sflag [#allocation4], %s5983_s14 }
0x2579   : > { %p7128_p1 = pnand %p8816_p5, %p8815_p2 }
0x257b   : > { %7503 = dma.done.wait (!%p7128_p1), %s5984_s16, 128  }
0x257c   : > { %7505 = vsyncadd (!%p7128_p1), %s5984_s16, 4294967168  ;;  %s8817_s24 = sld [smem:[#allocation16_spill]]  ;;  %s8818_s23 = sld [smem:[#allocation14_spill]] }
0x257d   : > { %s8819_s0 = sld [smem:[#allocation17_spill]]  ;;  %s8820_s21 = smov %s7512_s22 }
0x2582   : > { %p28_p6 = scmp.ge.s32.totalorder %s8817_s24, 4   ;;  %s8821_s22 = smov %s8818_s23 }
0x2583   : > { %s8822_s23 = smov %s8819_s0 }
0x2584   :  { %30 = sbr.rel (!%p28_p6) target bundleno = 13 (0xd), region = 157 }
0x258b   :  { %5989 = vsyncpa [#allocation3], 1 }
0x258c   :  { %5991 = vsyncpa [#allocation3 + $0x1], 1 }
0x258d   :  { %5992 = vsyncpa [#allocation6], 1 }
0x258e   :  { %5994 = vsyncpa [#allocation6 + $0x1], 1 }
0x258f   :  { %5995 = vsyncpa [#allocation4], 1 }
0x2590   :  { %5997 = vsyncpa [#allocation4 + $0x1], 1 }

</bundles_post_ra>
